<compile_context>
chip_gen: v7x
topology: tpu7x:2x2x1
jax: 0.10.0
libtpu: 0.0.40
codegen_flags: <defaults>
</compile_context>

<pallas_src>
import numpy as np
import jax
import jax.numpy as jnp
from jax.experimental import pallas as pl
from jax.experimental.pallas import tpu as pltpu


# ------------------------------ Pallas kernel -------------------------------

def _double_conv_kernel(x_ref, w1_ref, s1_ref, b1_ref, w2_ref, s2_ref, b2_ref,
                        o_ref, h1pad_ref):
    # x_ref    : (H+2, W+2, Cin)   padded input image (batch dim squeezed)
    # w1_ref   : (9*Cin, Cmid)     conv1 weights, im2col layout
    # s1_ref   : (1, Cmid)         folded BN1 scale     b1_ref: folded BN1 bias
    # w2_ref   : (9*Cmid, Cout)    conv2 weights, im2col layout
    # s2_ref   : (1, Cout)         folded BN2 scale     b2_ref: folded BN2 bias
    # o_ref    : (H, W, Cout)      output image
    # h1pad_ref: (H+2, W+2, Cmid)  VMEM scratch for the padded mid activation
    H, W, Cout = o_ref.shape
    Cin = x_ref.shape[-1]
    Cmid = w1_ref.shape[-1]

    # ---- conv1 as one im2col matmul (K = 9*Cin), fused BN + ReLU ----
    p1 = jnp.concatenate(
        [x_ref[dy:dy + H, dx:dx + W, :].reshape(H * W, Cin)
         for dy in range(3) for dx in range(3)],
        axis=1)                                                    # (H*W, 9*Cin)
    a1 = jnp.dot(p1, w1_ref[...], preferred_element_type=jnp.float32)
    h1 = jnp.maximum(a1 * s1_ref[...] + b1_ref[...], 0.0)          # (H*W, Cmid) f32

    # Stage the padded mid activation in VMEM (no HBM round trip between convs).
    h1pad_ref[...] = jnp.zeros_like(h1pad_ref)
    h1pad_ref[1:H + 1, 1:W + 1, :] = h1.reshape(H, W, Cmid)

    # ---- conv2 as one im2col matmul (K = 9*Cmid), fused BN + ReLU ----
    p2 = jnp.concatenate(
        [h1pad_ref[dy:dy + H, dx:dx + W, :].reshape(H * W, Cmid)
         for dy in range(3) for dx in range(3)],
        axis=1)                                                    # (H*W, 9*Cmid)
    a2 = jnp.dot(p2, w2_ref[...], preferred_element_type=jnp.float32)
    h2 = jnp.maximum(a2 * s2_ref[...] + b2_ref[...], 0.0)
    o_ref[...] = h2.reshape(H, W, Cout).astype(o_ref.dtype)


# ------------------------------ wrapper / glue -------------------------------

@jax.jit
def double_conv_forward(x_nchw, fp):
    """x_nchw: (B, Cin, H, W) float32 -> (B, Cout, H, W). fp holds arrays only."""
    B, Cin, H, W = x_nchw.shape            # static under jit
    Cmid = fp["w1"].shape[1]
    Cout = fp["w2"].shape[1]
    Hp, Wp = H + 2, W + 2

    x = jnp.transpose(x_nchw, (0, 2, 3, 1))                 # NHWC
    x_pad = jnp.pad(x, ((0, 0), (1, 1), (1, 1), (0, 0)))    # pad=1 spatially

    out_nhwc = pl.pallas_call(
        _double_conv_kernel,
        out_shape=jax.ShapeDtypeStruct((B, H, W, Cout), x.dtype),
        grid=(B,),
        in_specs=[
            pl.BlockSpec((None, Hp, Wp, Cin), lambda b: (b, 0, 0, 0)),
            pl.BlockSpec((9 * Cin, Cmid), lambda b: (0, 0)),
            pl.BlockSpec((1, Cmid), lambda b: (0, 0)),
            pl.BlockSpec((1, Cmid), lambda b: (0, 0)),
            pl.BlockSpec((9 * Cmid, Cout), lambda b: (0, 0)),
            pl.BlockSpec((1, Cout), lambda b: (0, 0)),
            pl.BlockSpec((1, Cout), lambda b: (0, 0)),
        ],
        out_specs=pl.BlockSpec((None, H, W, Cout), lambda b: (b, 0, 0, 0)),
        scratch_shapes=[pltpu.VMEM((Hp, Wp, Cmid), jnp.float32)],
        compiler_params=pltpu.CompilerParams(
            dimension_semantics=("parallel",)),
    )(x_pad, fp["w1"], fp["s1"], fp["b1"], fp["w2"], fp["s2"], fp["b2"])

    return jnp.transpose(out_nhwc, (0, 3, 1, 2))             # back to NCHW


# --------------------------- params: init & folding --------------------------

def init_double_conv_params(key, in_channels, out_channels, dtype=jnp.float32):
    """Conv weights in HWIO layout + conv bias + eval-mode BN params."""
    ks = jax.random.split(key, 12)

    def conv_w(k, cin, cout):
        fan_in = 9 * cin
        return (jax.random.normal(k, (3, 3, cin, cout)) / np.sqrt(fan_in)).astype(dtype)

    def bn(kg, kb, km, kv, c):
        gamma = (1.0 + 0.1 * jax.random.normal(kg, (c,))).astype(dtype)
        beta = (0.1 * jax.random.normal(kb, (c,))).astype(dtype)
        mean = (0.1 * jax.random.normal(km, (c,))).astype(dtype)
        var = (0.5 + jax.random.uniform(kv, (c,))).astype(dtype)
        return gamma, beta, mean, var

    g1, be1, m1, v1 = bn(ks[2], ks[3], ks[4], ks[5], out_channels)
    g2, be2, m2, v2 = bn(ks[8], ks[9], ks[10], ks[11], out_channels)
    return {
        "w1": conv_w(ks[0], in_channels, out_channels),
        "b1": (0.1 * jax.random.normal(ks[1], (out_channels,))).astype(dtype),
        "g1": g1, "be1": be1, "m1": m1, "v1": v1,
        "w2": conv_w(ks[6], out_channels, out_channels),
        "b2": (0.1 * jax.random.normal(ks[7], (out_channels,))).astype(dtype),
        "g2": g2, "be2": be2, "m2": m2, "v2": v2,
    }


def fold_params(raw, eps=1e-5):
    """Fold conv bias + eval-mode BN into per-channel scale/bias; im2col weights."""
    def fold(w, b, gamma, beta, mean, var):
        scale = gamma / jnp.sqrt(var + eps)
        bias = beta + (b - mean) * scale
        kh, kw, cin, cout = w.shape
        return (w.reshape(kh * kw * cin, cout),
                scale.reshape(1, cout), bias.reshape(1, cout))

    w1m, s1, fb1 = fold(raw["w1"], raw["b1"], raw["g1"], raw["be1"], raw["m1"], raw["v1"])
    w2m, s2, fb2 = fold(raw["w2"], raw["b2"], raw["g2"], raw["be2"], raw["m2"], raw["v2"])
    return {"w1": w1m, "s1": s1, "b1": fb1, "w2": w2m, "s2": s2, "b2": fb2}


# ----------------------------- pure-JAX reference ----------------------------

def reference_forward(x_nchw, raw, eps=1e-5):
    x = jnp.transpose(x_nchw, (0, 2, 3, 1))

    def block(h, w, b, gamma, beta, mean, var):
        y = jax.lax.conv_general_dilated(
            h, w, window_strides=(1, 1), padding=((1, 1), (1, 1)),
            dimension_numbers=("NHWC", "HWIO", "NHWC"))
        y = y + b
        y = (y - mean) / jnp.sqrt(var + eps) * gamma + beta
        return jnp.maximum(y, 0.0)

    h = block(x, raw["w1"], raw["b1"], raw["g1"], raw["be1"], raw["m1"], raw["v1"])
    h = block(h, raw["w2"], raw["b2"], raw["g2"], raw["be2"], raw["m2"], raw["v2"])
    return jnp.transpose(h, (0, 3, 1, 2))


# ----------------------------------- main ------------------------------------

if __name__ == "__main__":
    B, Cin, H, W = 2, 4, 16, 16
    Cout = 16

    key = jax.random.PRNGKey(0)
    kp, kx = jax.random.split(key, 2)
    raw = init_double_conv_params(kp, Cin, Cout)
    folded = fold_params(raw)

    x = jax.random.normal(kx, (B, Cin, H, W), dtype=jnp.float32)

    y = double_conv_forward(x, folded)
    y = jax.block_until_ready(y)

    y_ref = reference_forward(x, raw)
    np.testing.assert_allclose(np.asarray(y), np.asarray(y_ref),
                               rtol=1e-4, atol=1e-4)

    print("KERNEL_OK")
</pallas_src>

<mosaic_0001>
module attributes {stable_mosaic.version = 11 : i64} {
  func.func @_double_conv_kernel(%arg0: i32, %arg1: memref<1x18x18x4xf32, #tpu.memory_space<vmem>>, %arg2: memref<36x16xf32, #tpu.memory_space<vmem>>, %arg3: memref<1x16xf32, #tpu.memory_space<vmem>>, %arg4: memref<1x16xf32, #tpu.memory_space<vmem>>, %arg5: memref<144x16xf32, #tpu.memory_space<vmem>>, %arg6: memref<1x16xf32, #tpu.memory_space<vmem>>, %arg7: memref<1x16xf32, #tpu.memory_space<vmem>>, %arg8: memref<1x16x16x16xf32, #tpu.memory_space<vmem>>, %arg9: memref<18x18x16xf32, #tpu.memory_space<vmem>>) attributes {dimension_semantics = [#tpu.dimension_semantics<parallel>], iteration_bounds = array<i64: 2>, scalar_prefetch = 0 : i64, scratch_operands = 1 : i64, tpu.core_type = #tpu.core_type<tc>, window_params = [{transform_indices = @transform_0, window_bounds = array<i64: 1, 18, 18, 4>}, {pipeline_mode = #tpu.pipeline_mode<synchronous>, transform_indices = @transform_1, window_bounds = array<i64: 36, 16>}, {pipeline_mode = #tpu.pipeline_mode<synchronous>, transform_indices = @transform_2, window_bounds = array<i64: 1, 16>}, {pipeline_mode = #tpu.pipeline_mode<synchronous>, transform_indices = @transform_3, window_bounds = array<i64: 1, 16>}, {pipeline_mode = #tpu.pipeline_mode<synchronous>, transform_indices = @transform_4, window_bounds = array<i64: 144, 16>}, {pipeline_mode = #tpu.pipeline_mode<synchronous>, transform_indices = @transform_5, window_bounds = array<i64: 1, 16>}, {pipeline_mode = #tpu.pipeline_mode<synchronous>, transform_indices = @transform_6, window_bounds = array<i64: 1, 16>}, {transform_indices = @transform_7, window_bounds = array<i64: 1, 16, 16, 16>}]} {
    %c0 = arith.constant 0 : index
    %c0_0 = arith.constant 0 : index
    %c0_1 = arith.constant 0 : index
    %c0_2 = arith.constant 0 : index
    %0 = vector.load %arg1[%c0, %c0_0, %c0_1, %c0_2] : memref<1x18x18x4xf32, #tpu.memory_space<vmem>>, vector<1x16x16x4xf32>
    %1 = vector.shape_cast %0 : vector<1x16x16x4xf32> to vector<16x16x4xf32>
    %2 = vector.shape_cast %1 : vector<16x16x4xf32> to vector<256x4xf32>
    %c0_3 = arith.constant 0 : index
    %c0_4 = arith.constant 0 : index
    %c1 = arith.constant 1 : index
    %c0_5 = arith.constant 0 : index
    %3 = vector.load %arg1[%c0_3, %c0_4, %c1, %c0_5] : memref<1x18x18x4xf32, #tpu.memory_space<vmem>>, vector<1x16x16x4xf32>
    %4 = vector.shape_cast %3 : vector<1x16x16x4xf32> to vector<16x16x4xf32>
    %5 = vector.shape_cast %4 : vector<16x16x4xf32> to vector<256x4xf32>
    %c0_6 = arith.constant 0 : index
    %c0_7 = arith.constant 0 : index
    %c2 = arith.constant 2 : index
    %c0_8 = arith.constant 0 : index
    %6 = vector.load %arg1[%c0_6, %c0_7, %c2, %c0_8] : memref<1x18x18x4xf32, #tpu.memory_space<vmem>>, vector<1x16x16x4xf32>
    %7 = vector.shape_cast %6 : vector<1x16x16x4xf32> to vector<16x16x4xf32>
    %8 = vector.shape_cast %7 : vector<16x16x4xf32> to vector<256x4xf32>
    %c0_9 = arith.constant 0 : index
    %c1_10 = arith.constant 1 : index
    %c0_11 = arith.constant 0 : index
    %c0_12 = arith.constant 0 : index
    %9 = vector.load %arg1[%c0_9, %c1_10, %c0_11, %c0_12] : memref<1x18x18x4xf32, #tpu.memory_space<vmem>>, vector<1x16x16x4xf32>
    %10 = vector.shape_cast %9 : vector<1x16x16x4xf32> to vector<16x16x4xf32>
    %11 = vector.shape_cast %10 : vector<16x16x4xf32> to vector<256x4xf32>
    %c0_13 = arith.constant 0 : index
    %c1_14 = arith.constant 1 : index
    %c1_15 = arith.constant 1 : index
    %c0_16 = arith.constant 0 : index
    %12 = vector.load %arg1[%c0_13, %c1_14, %c1_15, %c0_16] : memref<1x18x18x4xf32, #tpu.memory_space<vmem>>, vector<1x16x16x4xf32>
    %13 = vector.shape_cast %12 : vector<1x16x16x4xf32> to vector<16x16x4xf32>
    %14 = vector.shape_cast %13 : vector<16x16x4xf32> to vector<256x4xf32>
    %c0_17 = arith.constant 0 : index
    %c1_18 = arith.constant 1 : index
    %c2_19 = arith.constant 2 : index
    %c0_20 = arith.constant 0 : index
    %15 = vector.load %arg1[%c0_17, %c1_18, %c2_19, %c0_20] : memref<1x18x18x4xf32, #tpu.memory_space<vmem>>, vector<1x16x16x4xf32>
    %16 = vector.shape_cast %15 : vector<1x16x16x4xf32> to vector<16x16x4xf32>
    %17 = vector.shape_cast %16 : vector<16x16x4xf32> to vector<256x4xf32>
    %c0_21 = arith.constant 0 : index
    %c2_22 = arith.constant 2 : index
    %c0_23 = arith.constant 0 : index
    %c0_24 = arith.constant 0 : index
    %18 = vector.load %arg1[%c0_21, %c2_22, %c0_23, %c0_24] : memref<1x18x18x4xf32, #tpu.memory_space<vmem>>, vector<1x16x16x4xf32>
    %19 = vector.shape_cast %18 : vector<1x16x16x4xf32> to vector<16x16x4xf32>
    %20 = vector.shape_cast %19 : vector<16x16x4xf32> to vector<256x4xf32>
    %c0_25 = arith.constant 0 : index
    %c2_26 = arith.constant 2 : index
    %c1_27 = arith.constant 1 : index
    %c0_28 = arith.constant 0 : index
    %21 = vector.load %arg1[%c0_25, %c2_26, %c1_27, %c0_28] : memref<1x18x18x4xf32, #tpu.memory_space<vmem>>, vector<1x16x16x4xf32>
    %22 = vector.shape_cast %21 : vector<1x16x16x4xf32> to vector<16x16x4xf32>
    %23 = vector.shape_cast %22 : vector<16x16x4xf32> to vector<256x4xf32>
    %c0_29 = arith.constant 0 : index
    %c2_30 = arith.constant 2 : index
    %c2_31 = arith.constant 2 : index
    %c0_32 = arith.constant 0 : index
    %24 = vector.load %arg1[%c0_29, %c2_30, %c2_31, %c0_32] : memref<1x18x18x4xf32, #tpu.memory_space<vmem>>, vector<1x16x16x4xf32>
    %25 = vector.shape_cast %24 : vector<1x16x16x4xf32> to vector<16x16x4xf32>
    %26 = vector.shape_cast %25 : vector<16x16x4xf32> to vector<256x4xf32>
    %27 = tpu.concatenate %2, %5, %8, %11, %14, %17, %20, %23, %26 in 1 : vector<256x4xf32>, vector<256x4xf32>, vector<256x4xf32>, vector<256x4xf32>, vector<256x4xf32>, vector<256x4xf32>, vector<256x4xf32>, vector<256x4xf32>, vector<256x4xf32> -> vector<256x36xf32>
    %c0_33 = arith.constant 0 : index
    %c0_34 = arith.constant 0 : index
    %28 = vector.load %arg2[%c0_33, %c0_34] : memref<36x16xf32, #tpu.memory_space<vmem>>, vector<36x16xf32>
    %cst = arith.constant dense<0.000000e+00> : vector<256x16xf32>
    %29 = tpu.matmul %27, %28, %cst {dimension_numbers = #tpu.dot_dimension_numbers<[1], [0], [0], [1], [0, 0, 1, 1], [], []>} : vector<256x36xf32>, vector<36x16xf32>, vector<256x16xf32> -> vector<256x16xf32>
    %c0_35 = arith.constant 0 : index
    %c0_36 = arith.constant 0 : index
    %30 = vector.load %arg3[%c0_35, %c0_36] : memref<1x16xf32, #tpu.memory_space<vmem>>, vector<1x16xf32>
    %31 = vector.broadcast %30 : vector<1x16xf32> to vector<256x16xf32>
    %32 = arith.mulf %29, %31 : vector<256x16xf32>
    %c0_37 = arith.constant 0 : index
    %c0_38 = arith.constant 0 : index
    %33 = vector.load %arg4[%c0_37, %c0_38] : memref<1x16xf32, #tpu.memory_space<vmem>>, vector<1x16xf32>
    %34 = vector.broadcast %33 : vector<1x16xf32> to vector<256x16xf32>
    %35 = arith.addf %32, %34 : vector<256x16xf32>
    %cst_39 = arith.constant 0.000000e+00 : f32
    %36 = vector.broadcast %cst_39 : f32 to vector<256x16xf32>
    %37 = arith.maximumf %35, %36 : vector<256x16xf32>
    %cst_40 = arith.constant 0.000000e+00 : f32
    %38 = vector.broadcast %cst_40 : f32 to vector<18x18x16xf32>
    %c0_41 = arith.constant 0 : index
    %c0_42 = arith.constant 0 : index
    %c0_43 = arith.constant 0 : index
    %39 = vector.load %arg9[%c0_41, %c0_42, %c0_43] : memref<18x18x16xf32, #tpu.memory_space<vmem>>, vector<18x18x16xf32>
    tpu.vector_store %arg9[%c0_41, %c0_42, %c0_43], %38 {strides = array<i32>} : memref<18x18x16xf32, #tpu.memory_space<vmem>>, vector<18x18x16xf32>,
    %40 = vector.shape_cast %37 : vector<256x16xf32> to vector<16x16x16xf32>
    %c1_44 = arith.constant 1 : index
    %c1_45 = arith.constant 1 : index
    %c0_46 = arith.constant 0 : index
    %41 = vector.load %arg9[%c1_44, %c1_45, %c0_46] : memref<18x18x16xf32, #tpu.memory_space<vmem>>, vector<16x16x16xf32>
    tpu.vector_store %arg9[%c1_44, %c1_45, %c0_46], %40 {strides = array<i32>} : memref<18x18x16xf32, #tpu.memory_space<vmem>>, vector<16x16x16xf32>,
    %c0_47 = arith.constant 0 : index
    %c0_48 = arith.constant 0 : index
    %c0_49 = arith.constant 0 : index
    %42 = vector.load %arg9[%c0_47, %c0_48, %c0_49] : memref<18x18x16xf32, #tpu.memory_space<vmem>>, vector<16x16x16xf32>
    %43 = vector.shape_cast %42 : vector<16x16x16xf32> to vector<256x16xf32>
    %c0_50 = arith.constant 0 : index
    %c1_51 = arith.constant 1 : index
    %c0_52 = arith.constant 0 : index
    %44 = vector.load %arg9[%c0_50, %c1_51, %c0_52] : memref<18x18x16xf32, #tpu.memory_space<vmem>>, vector<16x16x16xf32>
    %45 = vector.shape_cast %44 : vector<16x16x16xf32> to vector<256x16xf32>
    %c0_53 = arith.constant 0 : index
    %c2_54 = arith.constant 2 : index
    %c0_55 = arith.constant 0 : index
    %46 = vector.load %arg9[%c0_53, %c2_54, %c0_55] : memref<18x18x16xf32, #tpu.memory_space<vmem>>, vector<16x16x16xf32>
    %47 = vector.shape_cast %46 : vector<16x16x16xf32> to vector<256x16xf32>
    %c1_56 = arith.constant 1 : index
    %c0_57 = arith.constant 0 : index
    %c0_58 = arith.constant 0 : index
    %48 = vector.load %arg9[%c1_56, %c0_57, %c0_58] : memref<18x18x16xf32, #tpu.memory_space<vmem>>, vector<16x16x16xf32>
    %49 = vector.shape_cast %48 : vector<16x16x16xf32> to vector<256x16xf32>
    %c1_59 = arith.constant 1 : index
    %c1_60 = arith.constant 1 : index
    %c0_61 = arith.constant 0 : index
    %50 = vector.load %arg9[%c1_59, %c1_60, %c0_61] : memref<18x18x16xf32, #tpu.memory_space<vmem>>, vector<16x16x16xf32>
    %51 = vector.shape_cast %50 : vector<16x16x16xf32> to vector<256x16xf32>
    %c1_62 = arith.constant 1 : index
    %c2_63 = arith.constant 2 : index
    %c0_64 = arith.constant 0 : index
    %52 = vector.load %arg9[%c1_62, %c2_63, %c0_64] : memref<18x18x16xf32, #tpu.memory_space<vmem>>, vector<16x16x16xf32>
    %53 = vector.shape_cast %52 : vector<16x16x16xf32> to vector<256x16xf32>
    %c2_65 = arith.constant 2 : index
    %c0_66 = arith.constant 0 : index
    %c0_67 = arith.constant 0 : index
    %54 = vector.load %arg9[%c2_65, %c0_66, %c0_67] : memref<18x18x16xf32, #tpu.memory_space<vmem>>, vector<16x16x16xf32>
    %55 = vector.shape_cast %54 : vector<16x16x16xf32> to vector<256x16xf32>
    %c2_68 = arith.constant 2 : index
    %c1_69 = arith.constant 1 : index
    %c0_70 = arith.constant 0 : index
    %56 = vector.load %arg9[%c2_68, %c1_69, %c0_70] : memref<18x18x16xf32, #tpu.memory_space<vmem>>, vector<16x16x16xf32>
    %57 = vector.shape_cast %56 : vector<16x16x16xf32> to vector<256x16xf32>
    %c2_71 = arith.constant 2 : index
    %c2_72 = arith.constant 2 : index
    %c0_73 = arith.constant 0 : index
    %58 = vector.load %arg9[%c2_71, %c2_72, %c0_73] : memref<18x18x16xf32, #tpu.memory_space<vmem>>, vector<16x16x16xf32>
    %59 = vector.shape_cast %58 : vector<16x16x16xf32> to vector<256x16xf32>
    %60 = tpu.concatenate %43, %45, %47, %49, %51, %53, %55, %57, %59 in 1 : vector<256x16xf32>, vector<256x16xf32>, vector<256x16xf32>, vector<256x16xf32>, vector<256x16xf32>, vector<256x16xf32>, vector<256x16xf32>, vector<256x16xf32>, vector<256x16xf32> -> vector<256x144xf32>
    %c0_74 = arith.constant 0 : index
    %c0_75 = arith.constant 0 : index
    %61 = vector.load %arg5[%c0_74, %c0_75] : memref<144x16xf32, #tpu.memory_space<vmem>>, vector<144x16xf32>
    %cst_76 = arith.constant dense<0.000000e+00> : vector<256x16xf32>
    %62 = tpu.matmul %60, %61, %cst_76 {dimension_numbers = #tpu.dot_dimension_numbers<[1], [0], [0], [1], [0, 0, 1, 1], [], []>} : vector<256x144xf32>, vector<144x16xf32>, vector<256x16xf32> -> vector<256x16xf32>
    %c0_77 = arith.constant 0 : index
    %c0_78 = arith.constant 0 : index
    %63 = vector.load %arg6[%c0_77, %c0_78] : memref<1x16xf32, #tpu.memory_space<vmem>>, vector<1x16xf32>
    %64 = vector.broadcast %63 : vector<1x16xf32> to vector<256x16xf32>
    %65 = arith.mulf %62, %64 : vector<256x16xf32>
    %c0_79 = arith.constant 0 : index
    %c0_80 = arith.constant 0 : index
    %66 = vector.load %arg7[%c0_79, %c0_80] : memref<1x16xf32, #tpu.memory_space<vmem>>, vector<1x16xf32>
    %67 = vector.broadcast %66 : vector<1x16xf32> to vector<256x16xf32>
    %68 = arith.addf %65, %67 : vector<256x16xf32>
    %cst_81 = arith.constant 0.000000e+00 : f32
    %69 = vector.broadcast %cst_81 : f32 to vector<256x16xf32>
    %70 = arith.maximumf %68, %69 : vector<256x16xf32>
    %71 = vector.shape_cast %70 : vector<256x16xf32> to vector<16x16x16xf32>
    %c0_82 = arith.constant 0 : index
    %c0_83 = arith.constant 0 : index
    %c0_84 = arith.constant 0 : index
    %c0_85 = arith.constant 0 : index
    %72 = vector.load %arg8[%c0_82, %c0_83, %c0_84, %c0_85] : memref<1x16x16x16xf32, #tpu.memory_space<vmem>>, vector<1x16x16x16xf32>
    %73 = vector.shape_cast %72 : vector<1x16x16x16xf32> to vector<16x16x16xf32>
    %74 = vector.shape_cast %71 : vector<16x16x16xf32> to vector<1x16x16x16xf32>
    tpu.vector_store %arg8[%c0_82, %c0_83, %c0_84, %c0_85], %74 {strides = array<i32>} : memref<1x16x16x16xf32, #tpu.memory_space<vmem>>, vector<1x16x16x16xf32>,
    return
  }
  func.func @transform_0(%arg0: i32) -> (i32, i32, i32, i32) {
    %c0_i32 = arith.constant 0 : i32
    %c0_i32_0 = arith.constant 0 : i32
    %c0_i32_1 = arith.constant 0 : i32
    %c0_i32_2 = arith.constant 0 : i32
    return %arg0, %c0_i32, %c0_i32_0, %c0_i32_1 : i32, i32, i32, i32
  }
  func.func @transform_1(%arg0: i32) -> (i32, i32) {
    %c0_i32 = arith.constant 0 : i32
    %c0_i32_0 = arith.constant 0 : i32
    %c0_i32_1 = arith.constant 0 : i32
    return %c0_i32, %c0_i32_0 : i32, i32
  }
  func.func @transform_2(%arg0: i32) -> (i32, i32) {
    %c0_i32 = arith.constant 0 : i32
    %c0_i32_0 = arith.constant 0 : i32
    %c0_i32_1 = arith.constant 0 : i32
    return %c0_i32, %c0_i32_0 : i32, i32
  }
  func.func @transform_3(%arg0: i32) -> (i32, i32) {
    %c0_i32 = arith.constant 0 : i32
    %c0_i32_0 = arith.constant 0 : i32
    %c0_i32_1 = arith.constant 0 : i32
    return %c0_i32, %c0_i32_0 : i32, i32
  }
  func.func @transform_4(%arg0: i32) -> (i32, i32) {
    %c0_i32 = arith.constant 0 : i32
    %c0_i32_0 = arith.constant 0 : i32
    %c0_i32_1 = arith.constant 0 : i32
    return %c0_i32, %c0_i32_0 : i32, i32
  }
  func.func @transform_5(%arg0: i32) -> (i32, i32) {
    %c0_i32 = arith.constant 0 : i32
    %c0_i32_0 = arith.constant 0 : i32
    %c0_i32_1 = arith.constant 0 : i32
    return %c0_i32, %c0_i32_0 : i32, i32
  }
  func.func @transform_6(%arg0: i32) -> (i32, i32) {
    %c0_i32 = arith.constant 0 : i32
    %c0_i32_0 = arith.constant 0 : i32
    %c0_i32_1 = arith.constant 0 : i32
    return %c0_i32, %c0_i32_0 : i32, i32
  }
  func.func @transform_7(%arg0: i32) -> (i32, i32, i32, i32) {
    %c0_i32 = arith.constant 0 : i32
    %c0_i32_0 = arith.constant 0 : i32
    %c0_i32_1 = arith.constant 0 : i32
    %c0_i32_2 = arith.constant 0 : i32
    return %arg0, %c0_i32, %c0_i32_0, %c0_i32_1 : i32, i32, i32, i32
  }
}

</mosaic_0001>

<bundles_post_ra>
// kernel: double_conv_forward.1
= control target key start
LH: loop header
LB: loop body
LE: loop exit
PB: predicated region body
PF: predicated region fallthrough
CT: control target
= control target key end

     0   :  { %s5417_s24 = smov 0   ;;  %s8192_s0 = inlined_call_operand.vmem [shape: f32[2,18,18,4], index: 0, kind: input, shape index: {}]   ;;  %s8193_s1 = inlined_call_operand.vmem [shape: f32[36,16], index: 1, kind: input, shape index: {}]   ;;  %s8194_s2 = inlined_call_operand.vmem [shape: f32[1,16], index: 2, kind: input, shape index: {}]   ;;  %s8195_s3 = inlined_call_operand.vmem [shape: f32[1,16], index: 3, kind: input, shape index: {}]   ;;  %s8196_s4 = inlined_call_operand.vmem [shape: f32[144,16], index: 4, kind: input, shape index: {}]   ;;  %s8197_s5 = inlined_call_operand.vmem [shape: f32[1,16], index: 5, kind: input, shape index: {}]   ;;  %s8198_s6 = inlined_call_operand.vmem [shape: f32[1,16], index: 6, kind: input, shape index: {}]   ;;  %s8199_s7 = inlined_call_operand.vmem [shape: f32[2,16,16,16], index: 7, kind: output, shape index: {}]  }
   0x1 LB: > { %s4336_s25 = sadd.s32 4294967295, %s5360_s24   ;;  %p4340_p0 = scmp.ge.s32.totalorder %s5360_s24, 1  ;;  %s5360_s24 = sphi %s5417_s24, %s17_s24  }
   0x2   : > { %p237_p1 = scmp.lt.s32.totalorder %s5360_s24, 3 }
   0x4   : > { %p238_p2 = pnand %p4340_p0, %p237_p1 }
   0x6   : > { %241 = sbr.rel (%p238_p2) target bundleno = 1387 (0x56b), region = 48 }
   0xd   : > { %p269_p3 = scmp.lt.s32.totalorder %s4336_s25, 1  ;;  %s5362_s30 = smov 4   ;;  %vm1593_vm0 = vcmask 31744   ;;  %vm1626_vm1 = vcmask 64512   ;;  %vm1659_vm2 = vcmask 97280   ;;  %vm1959_vm3 = vcmask 1043456  }
   0xe   : > { %s5363_s8 = smov 8   ;;  %s5364_s9 = smov 12   ;;  %vm1692_vm4 = vcmask 130048   ;;  %vm1725_vm5 = vcmask 162816   ;;  %vm1758_vm6 = vcmask 195584   ;;  %vm1791_vm7 = vcmask 228352  }
   0xf   : > { %s8451_s25 = smov (!%p269_p3, %s4336_s25), 1  ;;  %s5365_s10 = smov 16   ;;  %vm1824_vm8 = vcmask 261120   ;;  %vm1862_vm9 = vcmask 293888   ;;  %vm2300_vm10 = vcmask 123904   ;;  %vm3635_vm11 = vcmask 392192  }
  0x10   : > { %s4756_s26 = smul.u32 432, %s8451_s25  ;;  %s5366_s11 = smov 20   ;;  %vm3668_vm12 = vcmask 523264   ;;  %vm3701_vm13 = vcmask 654336   ;;  %vm3734_vm14 = vcmask 785408   ;;  %vm3767_vm15 = vcmask 916480  }
  0x11   : > { %s5367_s22 = smov 24   ;;  %s5368_s23 = smov 28  }
  0x12   : > { %s5431_s29 = scalar_lea.vmem %s8192_s0, %s4756_s26  ;;  %s5369_s26 = smov 32  }
  0x13   : > { %v5434_v0 = vld [vmem:[%s5431_s29 + $0x19] sm:$0xff]  ;;  %v311_v1 = vld [vmem:[%s5431_s29 + $0x1] sm:$0xff]  ;;  %v312_v3 = vld [vmem:[%s5431_s29 + $0x9] sm:$0xff]  ;;  %s5372_s14 = smov 48   ;;  %s5373_s18 = smov 80  }
  0x14   : > { %605 = vrot.lane.b32.xlu1 %v5434_v0, %s5362_s30  ;;  %601 = vrot.lane.b32.xlu0 %v311_v1, %s5362_s30  ;;  %v5441_v2 = vld [vmem:[%s5431_s29 + $0x21] sm:$0xff]  ;;  %v5448_v4 = vld [vmem:[%s5431_s29 + $0x39] sm:$0xff] }
  0x15   : > { %v5451_v5 = vld [vmem:[%s5431_s29 + $0x31] sm:$0xff]  ;;  %v5461_v7 = vld [vmem:[%s5431_s29 + $0x49] sm:$0xff]  ;;  %v5471_v9 = vld [vmem:[%s5431_s29 + $0x61] sm:$0xff] }
  0x16   : > { %v5458_v6 = vld [vmem:[%s5431_s29 + $0x51] sm:$0xff]  ;;  %v5468_v8 = vld [vmem:[%s5431_s29 + $0x69] sm:$0xff]  ;;  %v5478_v10 = vld [vmem:[%s5431_s29 + $0x81] sm:$0xff] }
  0x17   : > { %v5481_v11 = vld [vmem:[%s5431_s29 + $0x79] sm:$0xff]  ;;  %v5491_v13 = vld [vmem:[%s5431_s29 + $0x91] sm:$0xff]  ;;  %v5501_v15 = vld [vmem:[%s5431_s29 + $0xa9] sm:$0xff] }
  0x18   : > { %607 = vrot.lane.b32.xlu1 %v5441_v2, %s5362_s30  ;;  %603 = vrot.lane.b32.xlu0 %v312_v3, %s5362_s30  ;;  %v5488_v12 = vld [vmem:[%s5431_s29 + $0x99] sm:$0xff]  ;;  %v5498_v14 = vld [vmem:[%s5431_s29 + $0xb1] sm:$0xff] }
  0x19   : > { %v5508_v16 = vld [vmem:[%s5431_s29 + $0xc9] sm:$0xff]  ;;  %v5511_v17 = vld [vmem:[%s5431_s29 + $0xc1] sm:$0xff]  ;;  %v5521_v19 = vld [vmem:[%s5431_s29 + $0xd9] sm:$0xff] }
  0x1a   : > { %v5518_v18 = vld [vmem:[%s5431_s29 + $0xe1] sm:$0xff]  ;;  %v5528_v20 = vld [vmem:[%s5431_s29 + $0xf9] sm:$0xff]  ;;  %v5531_v21 = vld [vmem:[%s5431_s29 + $0xf1] sm:$0xff] }
  0x1b   : > { %v5538_v22 = vld [vmem:[%s5431_s29 + $0x111] sm:$0xff]  ;;  %v5541_v23 = vld [vmem:[%s5431_s29 + $0x109] sm:$0xff]  ;;  %v5551_v25 = vld [vmem:[%s5431_s29 + $0x121] sm:$0xff] }
  0x1c   : > { %611 = vrot.lane.b32.xlu1 %v5448_v4, %s5362_s30  ;;  %609 = vrot.lane.b32.xlu0 %v5451_v5, %s5362_s30  ;;  %8250 = vst [vmem:[#allocation3_spill] sm:$0xff] %v5538_v22  ;;  %8251 = vst [vmem:[#allocation4_spill] sm:$0xff] %v5541_v23  ;;  %v5548_v24 = vld [vmem:[%s5431_s29 + $0x129] sm:$0xff]  ;;  %v5558_v26 = vld [vmem:[%s5431_s29 + $0x141] sm:$0xff] }
  0x1d   : > { %8252 = vst [vmem:[#allocation5_spill] sm:$0xff] %v5548_v24  ;;  %8253 = vst [vmem:[#allocation6_spill] sm:$0xff] %v5551_v25  ;;  %v5561_v27 = vld [vmem:[%s5431_s29 + $0x139] sm:$0xff]  ;;  %v5571_v29 = vld [vmem:[%s5431_s29 + $0x151] sm:$0xff] }
  0x1e   : > { %8254 = vst [vmem:[#allocation7_spill] sm:$0xff] %v5558_v26  ;;  %8255 = vst [vmem:[#allocation8_spill] sm:$0xff] %v5561_v27  ;;  %v5568_v28 = vld [vmem:[%s5431_s29 + $0x159] sm:$0xff]  ;;  %v5578_v30 = vld [vmem:[%s5431_s29 + $0x171] sm:$0xff] }
  0x1f   : > { %8256 = vst [vmem:[#allocation9_spill] sm:$0xff] %v5568_v28  ;;  %8257 = vst [vmem:[#allocation10_spill] sm:$0xff] %v5571_v29  ;;  %v5581_v31 = vld [vmem:[%s5431_s29 + $0x169] sm:$0xff]  ;;  %v5595_v35 = vld [vmem:[%s5431_s29 + $0x1a] sm:$0xff] }
  0x20   : > { %615 = vrot.lane.b32.xlu1 %v5458_v6, %s5362_s30  ;;  %613 = vrot.lane.b32.xlu0 %v5461_v7, %s5362_s30  ;;  %8258 = vst [vmem:[#allocation11_spill] sm:$0xff] %v5578_v30  ;;  %8259 = vst [vmem:[#allocation12_spill] sm:$0xff] %v5581_v31  ;;  %v344_v32 = vld [vmem:[%s5431_s29 + $0xa] sm:$0xff]  ;;  %v343_v33 = vld [vmem:[%s5431_s29 + $0x2] sm:$0xff] }
  0x21   : > { %v5592_v34 = vld [vmem:[%s5431_s29 + $0x22] sm:$0xff]  ;;  %8261 = vst [vmem:[#allocation14_spill] sm:$0xff] %v5595_v35  ;;  %v5602_v36 = vld [vmem:[%s5431_s29 + $0x3a] sm:$0xff]  ;;  %v5605_v37 = vld [vmem:[%s5431_s29 + $0x32] sm:$0xff] }
  0x22   : > { %8260 = vst [vmem:[#allocation13_spill] sm:$0xff] %v5592_v34  ;;  %8262 = vst [vmem:[#allocation15_spill] sm:$0xff] %v5602_v36  ;;  %v5612_v38 = vld [vmem:[%s5431_s29 + $0x52] sm:$0xff]  ;;  %v5615_v39 = vld [vmem:[%s5431_s29 + $0x4a] sm:$0xff] }
  0x23   : > { %8263 = vst [vmem:[#allocation16_spill] sm:$0xff] %v5605_v37  ;;  %8264 = vst [vmem:[#allocation17_spill] sm:$0xff] %v5612_v38  ;;  %v5622_v40 = vld [vmem:[%s5431_s29 + $0x6a] sm:$0xff]  ;;  %v5625_v41 = vld [vmem:[%s5431_s29 + $0x62] sm:$0xff] }
  0x24   : > { %619 = vrot.lane.b32.xlu1 %v5468_v8, %s5362_s30  ;;  %617 = vrot.lane.b32.xlu0 %v5471_v9, %s5362_s30  ;;  %8265 = vst [vmem:[#allocation18_spill] sm:$0xff] %v5615_v39  ;;  %8266 = vst [vmem:[#allocation19_spill] sm:$0xff] %v5622_v40  ;;  %v5632_v42 = vld [vmem:[%s5431_s29 + $0x82] sm:$0xff]  ;;  %v5635_v43 = vld [vmem:[%s5431_s29 + $0x7a] sm:$0xff] }
  0x25   : > { %8267 = vst [vmem:[#allocation20_spill] sm:$0xff] %v5625_v41  ;;  %8268 = vst [vmem:[#allocation21_spill] sm:$0xff] %v5632_v42  ;;  %v5642_v44 = vld [vmem:[%s5431_s29 + $0x9a] sm:$0xff]  ;;  %v5645_v45 = vld [vmem:[%s5431_s29 + $0x92] sm:$0xff] }
  0x26   : > { %8269 = vst [vmem:[#allocation22_spill] sm:$0xff] %v5635_v43  ;;  %8270 = vst [vmem:[#allocation23_spill] sm:$0xff] %v5642_v44  ;;  %v5652_v46 = vld [vmem:[%s5431_s29 + $0xb2] sm:$0xff]  ;;  %v5655_v47 = vld [vmem:[%s5431_s29 + $0xaa] sm:$0xff] }
  0x27   : > { %8271 = vst [vmem:[#allocation24_spill] sm:$0xff] %v5645_v45  ;;  %8272 = vst [vmem:[#allocation25_spill] sm:$0xff] %v5652_v46  ;;  %v5662_v48 = vld [vmem:[%s5431_s29 + $0xca] sm:$0xff]  ;;  %v5665_v49 = vld [vmem:[%s5431_s29 + $0xc2] sm:$0xff] }
  0x28   : > { %623 = vrot.lane.b32.xlu1 %v5478_v10, %s5362_s30  ;;  %621 = vrot.lane.b32.xlu0 %v5481_v11, %s5362_s30  ;;  %8273 = vst [vmem:[#allocation26_spill] sm:$0xff] %v5655_v47  ;;  %8274 = vst [vmem:[#allocation27_spill] sm:$0xff] %v5662_v48  ;;  %v362_v50 = vld [vmem:[%s5431_s29 + $0xe2] sm:$0xff]  ;;  %v5673_v51 = vld [vmem:[%s5431_s29 + $0xda] sm:$0xff] }
  0x29   : > { %8275 = vst [vmem:[#allocation28_spill] sm:$0xff] %v5665_v49  ;;  %8276 = vst [vmem:[#allocation29_spill] sm:$0xff] %v5673_v51  ;;  %v364_v52 = vld [vmem:[%s5431_s29 + $0xfa] sm:$0xff]  ;;  %v363_v53 = vld [vmem:[%s5431_s29 + $0xf2] sm:$0xff] }
  0x2a   : > { %v366_v54 = vld [vmem:[%s5431_s29 + $0x112] sm:$0xff]  ;;  %v365_v55 = vld [vmem:[%s5431_s29 + $0x10a] sm:$0xff]  ;;  %v367_v57 = vld [vmem:[%s5431_s29 + $0x122] sm:$0xff] }
  0x2b   : > { %v368_v56 = vld [vmem:[%s5431_s29 + $0x12a] sm:$0xff]  ;;  %v370_v58 = vld [vmem:[%s5431_s29 + $0x142] sm:$0xff]  ;;  %v369_v59 = vld [vmem:[%s5431_s29 + $0x13a] sm:$0xff] }
  0x2c   : > { %627 = vrot.lane.b32.xlu1 %v5488_v12, %s5362_s30  ;;  %625 = vrot.lane.b32.xlu0 %v5491_v13, %s5362_s30  ;;  %v372_v62 = vld [vmem:[%s5431_s29 + $0x15a] sm:$0xff]  ;;  %v371_v63 = vld [vmem:[%s5431_s29 + $0x152] sm:$0xff] }
  0x30   : > { %631 = vrot.lane.b32.xlu1 %v5498_v14, %s5362_s30  ;;  %629 = vrot.lane.b32.xlu0 %v5501_v15, %s5362_s30 }
  0x34   : > { %635 = vrot.lane.b32.xlu1 %v5508_v16, %s5362_s30  ;;  %633 = vrot.lane.b32.xlu0 %v5511_v17, %s5362_s30 }
  0x38   : > { %639 = vrot.lane.b32.xlu1 %v5518_v18, %s5362_s30  ;;  %637 = vrot.lane.b32.xlu0 %v5521_v19, %s5362_s30 }
  0x3c   : > { %643 = vrot.lane.b32.xlu1 %v5528_v20, %s5362_s30  ;;  %641 = vrot.lane.b32.xlu0 %v5531_v21, %s5362_s30 }
  0x40   : > { %647 = vrot.lane.b32.xlu1 %v5538_v22, %s5362_s30  ;;  %645 = vrot.lane.b32.xlu0 %v5541_v23, %s5362_s30 }
  0x44   : > { %651 = vrot.lane.b32.xlu1 %v5548_v24, %s5362_s30  ;;  %649 = vrot.lane.b32.xlu0 %v5551_v25, %s5362_s30 }
  0x48   : > { %655 = vrot.lane.b32.xlu1 %v5558_v26, %s5362_s30  ;;  %653 = vrot.lane.b32.xlu0 %v5561_v27, %s5362_s30 }
  0x4c   : > { %659 = vrot.lane.b32.xlu1 %v5568_v28, %s5362_s30  ;;  %657 = vrot.lane.b32.xlu0 %v5571_v29, %s5362_s30  ;;  %v308_v29 = vld [vmem:[%s5431_s29 + $0x158] sm:$0xff]  ;;  %v307_v28 = vld [vmem:[%s5431_s29 + $0x150] sm:$0xff] }
  0x50   : > { %663 = vrot.lane.b32.xlu1 %v5578_v30, %s5362_s30  ;;  %661 = vrot.lane.b32.xlu0 %v5581_v31, %s5362_s30  ;;  %v5861_v31 = vld [vmem:[%s5431_s29 + $0x110] sm:$0xff]  ;;  %v5864_v30 = vld [vmem:[%s5431_s29 + $0x108] sm:$0xff] }
  0x54   : > { %731 = vrot.lane.b32.xlu1 %v344_v32, %s5363_s8  ;;  %729 = vrot.lane.b32.xlu0 %v343_v33, %s5363_s8  ;;  %v374_v32 = vld [vmem:[%s5431_s29 + $0x172] sm:$0xff]  ;;  %v373_v33 = vld [vmem:[%s5431_s29 + $0x16a] sm:$0xff] }
  0x58   : > { %735 = vrot.lane.b32.xlu1 %v5592_v34, %s5363_s8  ;;  %733 = vrot.lane.b32.xlu0 %v5595_v35, %s5363_s8 }
  0x5c   : > { %739 = vrot.lane.b32.xlu1 %v5602_v36, %s5363_s8  ;;  %737 = vrot.lane.b32.xlu0 %v5605_v37, %s5363_s8  ;;  %v306_v37 = vld [vmem:[%s5431_s29 + $0x140] sm:$0xff]  ;;  %v305_v36 = vld [vmem:[%s5431_s29 + $0x138] sm:$0xff] }
  0x60   : > { %743 = vrot.lane.b32.xlu1 %v5612_v38, %s5363_s8  ;;  %741 = vrot.lane.b32.xlu0 %v5615_v39, %s5363_s8 }
  0x64   : > { %747 = vrot.lane.b32.xlu1 %v5622_v40, %s5363_s8  ;;  %745 = vrot.lane.b32.xlu0 %v5625_v41, %s5363_s8  ;;  %v5843_v41 = vld [vmem:[%s5431_s29 + $0xf8] sm:$0xff]  ;;  %v5846_v40 = vld [vmem:[%s5431_s29 + $0xf0] sm:$0xff] }
  0x68   : > { %751 = vrot.lane.b32.xlu1 %v5632_v42, %s5363_s8  ;;  %749 = vrot.lane.b32.xlu0 %v5635_v43, %s5363_s8 }
  0x6c   : > { %755 = vrot.lane.b32.xlu1 %v5642_v44, %s5363_s8  ;;  %753 = vrot.lane.b32.xlu0 %v5645_v45, %s5363_s8  ;;  %v304_v45 = vld [vmem:[%s5431_s29 + $0x128] sm:$0xff]  ;;  %v303_v44 = vld [vmem:[%s5431_s29 + $0x120] sm:$0xff] }
  0x70   : > { %759 = vrot.lane.b32.xlu1 %v5652_v46, %s5363_s8  ;;  %757 = vrot.lane.b32.xlu0 %v5655_v47, %s5363_s8  ;;  %v5831_v47 = vld [vmem:[%s5431_s29 + $0xe0] sm:$0xff]  ;;  %v5834_v46 = vld [vmem:[%s5431_s29 + $0xd8] sm:$0xff] }
  0x74   : > { %763 = vrot.lane.b32.xlu1 %v5662_v48, %s5363_s8  ;;  %761 = vrot.lane.b32.xlu0 %v5665_v49, %s5363_s8 }
  0x78   : > { %767 = vrot.lane.b32.xlu1 %v362_v50, %s5363_s8  ;;  %765 = vrot.lane.b32.xlu0 %v5673_v51, %s5363_s8  ;;  %v5817_v51 = vld [vmem:[%s5431_s29 + $0xc8] sm:$0xff] }
  0x7c   : > { %771 = vrot.lane.b32.xlu1 %v364_v52, %s5363_s8  ;;  %769 = vrot.lane.b32.xlu0 %v363_v53, %s5363_s8 }
  0x80   : > { %775 = vrot.lane.b32.xlu1 %v366_v54, %s5363_s8  ;;  %773 = vrot.lane.b32.xlu0 %v365_v55, %s5363_s8  ;;  %v5719_v55 = vld [vmem:[%s5431_s29 + $0x18] sm:$0xff] }
  0x81   : > { %8285 = vst [vmem:[#allocation38_spill] sm:$0xff] %v5719_v55 }
  0x84   : > { %779 = vrot.lane.b32.xlu1 %v368_v56, %s5363_s8  ;;  %777 = vrot.lane.b32.xlu0 %v367_v57, %s5363_s8  ;;  %v5722_v56 = vld [vmem:[%s5431_s29 + $0x20] sm:$0xff] }
  0x85   : > { %8286 = vst [vmem:[#allocation39_spill] sm:$0xff] %v5722_v56 }
  0x86   : > { %v5692_v60 = vpop.permute.xlu1 %605  ;;  %v5694_v61 = vpop.permute.xlu0 %601 }
  0x87   : > { %8277 = vst [vmem:[#allocation30_spill] sm:$0xff] %v5692_v60  ;;  %8278 = vst [vmem:[#allocation31_spill] sm:$0xff] %v5694_v61  ;;  %v5792_v61 = vld [vmem:[%s5431_s29 + $0x90] sm:$0xff] }
  0x88   : > { %783 = vrot.lane.b32.xlu1 %v370_v58, %s5363_s8  ;;  %781 = vrot.lane.b32.xlu0 %v369_v59, %s5363_s8  ;;  %v5733_v59 = vld [vmem:[%s5431_s29 + $0x38] sm:$0xff] }
  0x89   : > { %8289 = vst [vmem:[#allocation42_spill] sm:$0xff] %v5733_v59 }
  0x8a   : > { %v5700_v1 = vpop.permute.xlu1 %607  ;;  %v5702_v3 = vpop.permute.xlu0 %603 }
  0x8b   : > { %8279 = vst [vmem:[#allocation32_spill] sm:$0xff] %v5700_v1  ;;  %8280 = vst [vmem:[#allocation33_spill] sm:$0xff] %v5702_v3  ;;  %v5778_v1 = vld [vmem:[%s5431_s29 + $0x78] sm:$0xff] }
  0x8c   : > { %787 = vrot.lane.b32.xlu1 %v372_v62, %s5363_s8  ;;  %785 = vrot.lane.b32.xlu0 %v371_v63, %s5363_s8  ;;  %v5736_v62 = vld [vmem:[%s5431_s29 + $0x30] sm:$0xff]  ;;  %8296 = vst [vmem:[#allocation49_spill] sm:$0xff] %v5778_v1  ;;  %v5789_v3 = vld [vmem:[%s5431_s29 + $0x98] sm:$0xff] }
  0x8d   : > { %8290 = vst [vmem:[#allocation43_spill] sm:$0xff] %v5736_v62 }
  0x8e   : > { %v5708_v50 = vpop.permute.xlu1 %611  ;;  %v5710_v52 = vpop.permute.xlu0 %609 }
  0x8f   : > { %8281 = vst [vmem:[#allocation34_spill] sm:$0xff] %v5708_v50  ;;  %8282 = vst [vmem:[#allocation35_spill] sm:$0xff] %v5710_v52  ;;  %v5764_v50 = vld [vmem:[%s5431_s29 + $0x60] sm:$0xff] }
  0x90   : > { %791 = vrot.lane.b32.xlu1 %v374_v32, %s5363_s8  ;;  %789 = vrot.lane.b32.xlu0 %v373_v33, %s5363_s8  ;;  %v5747_v33 = vld [vmem:[%s5431_s29 + $0x50] sm:$0xff]  ;;  %8295 = vst [vmem:[#allocation48_spill] sm:$0xff] %v5764_v50  ;;  %s5375_s8 = smov 64  }
  0x91   : > { %8292 = vst [vmem:[#allocation45_spill] sm:$0xff] %v5747_v33 }
  0x92   : > { %v5714_v53 = vpop.permute.xlu1 %615  ;;  %v5716_v54 = vpop.permute.xlu0 %613 }
  0x93   : > { %8283 = vst [vmem:[#allocation36_spill] sm:$0xff] %v5714_v53  ;;  %8284 = vst [vmem:[#allocation37_spill] sm:$0xff] %v5716_v54  ;;  %v5761_v54 = vld [vmem:[%s5431_s29 + $0x68] sm:$0xff] }
  0x94   : > { %859 = vrot.lane.b32.xlu1 %v5722_v56, %s5364_s9  ;;  %857 = vrot.lane.b32.xlu0 %v5719_v55, %s5364_s9  ;;  %8294 = vst [vmem:[#allocation47_spill] sm:$0xff] %v5761_v54  ;;  %v5775_v56 = vld [vmem:[%s5431_s29 + $0x80] sm:$0xff] }
  0x96   : > { %v5728_v57 = vpop.permute.xlu1 %619  ;;  %v5730_v58 = vpop.permute.xlu0 %617 }
  0x97   : > { %8287 = vst [vmem:[#allocation40_spill] sm:$0xff] %v5728_v57  ;;  %8288 = vst [vmem:[#allocation41_spill] sm:$0xff] %v5730_v58  ;;  %v5750_v57 = vld [vmem:[%s5431_s29 + $0x48] sm:$0xff] }
  0x98   : > { %863 = vrot.lane.b32.xlu1 %v5733_v59, %s5364_s9  ;;  %861 = vrot.lane.b32.xlu0 %v5736_v62, %s5364_s9  ;;  %8293 = vst [vmem:[#allocation46_spill] sm:$0xff] %v5750_v57  ;;  %v5820_v62 = vld [vmem:[%s5431_s29 + $0xc0] sm:$0xff] }
  0x9a   : > { %v5742_v63 = vpop.permute.xlu1 %623  ;;  %v5744_v32 = vpop.permute.xlu0 %621 }
  0x9b   : > { %8291 = vst [vmem:[#allocation44_spill] sm:$0xff] %v5744_v32 }
  0x9c   : > { %867 = vrot.lane.b32.xlu1 %v5747_v33, %s5364_s9  ;;  %865 = vrot.lane.b32.xlu0 %v5750_v57, %s5364_s9  ;;  %v5806_v33 = vld [vmem:[%s5431_s29 + $0xa8] sm:$0xff] }
  0x9e   : > { %v5756_v58 = vpop.permute.xlu1 %627  ;;  %v5758_v53 = vpop.permute.xlu0 %625 }
  0xa0   : > { %871 = vrot.lane.b32.xlu1 %v5761_v54, %s5364_s9  ;;  %869 = vrot.lane.b32.xlu0 %v5764_v50, %s5364_s9  ;;  %v5803_v50 = vld [vmem:[%s5431_s29 + $0xb0] sm:$0xff] }
  0xa2   : > { %v5770_v32 = vpop.permute.xlu1 %631  ;;  %v5772_v52 = vpop.permute.xlu0 %629 }
  0xa4   : > { %875 = vrot.lane.b32.xlu1 %v5775_v56, %s5364_s9  ;;  %873 = vrot.lane.b32.xlu0 %v5778_v1, %s5364_s9 }
  0xa6   : > { %v5784_v55 = vpop.permute.xlu1 %635  ;;  %v5786_v60 = vpop.permute.xlu0 %633 }
  0xa8   : > { %879 = vrot.lane.b32.xlu1 %v5789_v3, %s5364_s9  ;;  %877 = vrot.lane.b32.xlu0 %v5792_v61, %s5364_s9 }
  0xaa   : > { %v5798_v54 = vpop.permute.xlu1 %639  ;;  %v5800_v1 = vpop.permute.xlu0 %637 }
  0xac   : > { %883 = vrot.lane.b32.xlu1 %v5803_v50, %s5364_s9  ;;  %881 = vrot.lane.b32.xlu0 %v5806_v33, %s5364_s9 }
  0xae   : > { %v5812_v57 = vpop.permute.xlu1 %643  ;;  %v5814_v59 = vpop.permute.xlu0 %641 }
  0xb0   : > { %887 = vrot.lane.b32.xlu1 %v5817_v51, %s5364_s9  ;;  %885 = vrot.lane.b32.xlu0 %v5820_v62, %s5364_s9 }
  0xb2   : > { %v5826_v49 = vpop.permute.xlu1 %647  ;;  %v5828_v48 = vpop.permute.xlu0 %645 }
  0xb4   : > { %891 = vrot.lane.b32.xlu1 %v5831_v47, %s5364_s9  ;;  %889 = vrot.lane.b32.xlu0 %v5834_v46, %s5364_s9 }
  0xb6   : > { %v652_v43 = vpop.permute.xlu1 %651  ;;  %v650_v42 = vpop.permute.xlu0 %649 }
  0xb7   : > { %v5849_v39 = vsel %vm1593_vm0, %v304_v45, %v652_v43  ;;  %v5852_v38 = vsel %vm1593_vm0, %v303_v44, %v650_v42 }
  0xb8   : > { %895 = vrot.lane.b32.xlu1 %v5843_v41, %s5364_s9  ;;  %893 = vrot.lane.b32.xlu0 %v5846_v40, %s5364_s9 }
  0xba   : > { %v656_v35 = vpop.permute.xlu1 %655  ;;  %v654_v34 = vpop.permute.xlu0 %653 }
  0xbb   : > { %v5867_v43 = vsel %vm1593_vm0, %v306_v37, %v656_v35  ;;  %v5870_v42 = vsel %vm1593_vm0, %v305_v36, %v654_v34  ;;  %v310_v34 = vld [vmem:[%s5431_s29 + $0x170] sm:$0xff]  ;;  %v309_v35 = vld [vmem:[%s5431_s29 + $0x168] sm:$0xff] }
  0xbc   : > { %8297 = vst [vmem:[#allocation50_spill] sm:$0xff] %v5867_v43  ;;  %8298 = vst [vmem:[#allocation51_spill] sm:$0xff] %v5870_v42  ;;  %899 = vrot.lane.b32.xlu1 %v5861_v31, %s5364_s9  ;;  %897 = vrot.lane.b32.xlu0 %v5864_v30, %s5364_s9 }
  0xbe   : > { %v660_v27 = vpop.permute.xlu1 %659  ;;  %v658_v26 = vpop.permute.xlu0 %657 }
  0xbf   : > { %v5879_v25 = vsel %vm1593_vm0, %v308_v29, %v660_v27  ;;  %v5882_v24 = vsel %vm1593_vm0, %v307_v28, %v658_v26 }
  0xc0   : > { %903 = vrot.lane.b32.xlu1 %v304_v45, %s5364_s9  ;;  %901 = vrot.lane.b32.xlu0 %v303_v44, %s5364_s9 }
  0xc2   : > { %v664_v23 = vpop.permute.xlu1 %663  ;;  %v662_v22 = vpop.permute.xlu0 %661 }
  0xc3   : > { %v5889_v42 = vsel %vm1593_vm0, %v310_v34, %v664_v23  ;;  %v5892_v43 = vsel %vm1593_vm0, %v309_v35, %v662_v22  ;;  %v4375_v22 = vld [vmem:[%s5431_s29 + $0x188] sm:$0xff]  ;;  %v4374_v23 = vld [vmem:[%s5431_s29 + $0x180] sm:$0xff] }
  0xc4   : > { %907 = vrot.lane.b32.xlu1 %v306_v37, %s5364_s9  ;;  %905 = vrot.lane.b32.xlu0 %v305_v36, %s5364_s9 }
  0xc6   : > { %v5896_v26 = vpop.permute.xlu1 %731  ;;  %v5898_v27 = vpop.permute.xlu0 %729 }
  0xc8   : > { %911 = vrot.lane.b32.xlu1 %v308_v29, %s5364_s9  ;;  %909 = vrot.lane.b32.xlu0 %v307_v28, %s5364_s9 }
  0xca   : > { %v5902_v44 = vpop.permute.xlu1 %735  ;;  %v5904_v45 = vpop.permute.xlu0 %733 }
  0xcc   : > { %915 = vrot.lane.b32.xlu1 %v310_v34, %s5364_s9  ;;  %913 = vrot.lane.b32.xlu0 %v309_v35, %s5364_s9 }
  0xce   : > { %v5910_v37 = vpop.permute.xlu1 %739  ;;  %v5912_v36 = vpop.permute.xlu0 %737 }
  0xd0   : > { %919 = vrot.lane.b32.xlu1 %v4375_v22, %s5364_s9  ;;  %917 = vrot.lane.b32.xlu0 %v4374_v23, %s5364_s9  ;;  %v1605_v22 = vsel %vm1593_vm0, %v5775_v56, %v5742_v63  ;;  %v1606_v63 = vsel %vm1593_vm0, %v5792_v61, %v5758_v53  ;;  %s5376_s9 = smov 112  }
  0xd2   : > { %v5916_v29 = vpop.permute.xlu1 %743  ;;  %v5918_v28 = vpop.permute.xlu0 %741 }
  0xd4   : > { %987 = vrot.lane.b32.xlu1 %v5441_v2, %s5365_s10  ;;  %985 = vrot.lane.b32.xlu0 %v5434_v0, %s5365_s10 }
  0xd6   : > { %v5924_v34 = vpop.permute.xlu1 %747  ;;  %v5926_v35 = vpop.permute.xlu0 %745 }
  0xd7   : > { %8299 = vst [vmem:[#allocation52_spill] sm:$0xff] %v5924_v34  ;;  %8300 = vst [vmem:[#allocation53_spill] sm:$0xff] %v5926_v35 }
  0xd8   : > { %991 = vrot.lane.b32.xlu1 %v5448_v4, %s5365_s10  ;;  %989 = vrot.lane.b32.xlu0 %v5451_v5, %s5365_s10  ;;  %v1607_v4 = vsel %vm1593_vm0, %v5789_v3, %v5756_v58 }
  0xda   : > { %v752_v23 = vpop.permute.xlu1 %751  ;;  %v5935_v2 = vpop.permute.xlu0 %749 }
  0xdb   : > { %8301 = vst [vmem:[#allocation54_spill] sm:$0xff] %v5935_v2  ;;  %v5938_v0 = vsel %vm1626_vm1, %v1605_v22, %v752_v23 }
  0xdc   : > { %995 = vrot.lane.b32.xlu1 %v5458_v6, %s5365_s10  ;;  %993 = vrot.lane.b32.xlu0 %v5461_v7, %s5365_s10  ;;  %v1609_v6 = vsel %vm1593_vm0, %v5803_v50, %v5770_v32  ;;  %v1608_v7 = vsel %vm1593_vm0, %v5806_v33, %v5772_v52 }
  0xde   : > { %v756_v34 = vpop.permute.xlu1 %755  ;;  %v754_v35 = vpop.permute.xlu0 %753 }
  0xdf   : > { %v5951_v2 = vsel %vm1626_vm1, %v1607_v4, %v756_v34  ;;  %v5954_v22 = vsel %vm1626_vm1, %v1606_v63, %v754_v35 }
  0xe0   : > { %999 = vrot.lane.b32.xlu1 %v5468_v8, %s5365_s10  ;;  %997 = vrot.lane.b32.xlu0 %v5471_v9, %s5365_s10  ;;  %v1611_v8 = vsel %vm1593_vm0, %v5817_v51, %v5784_v55  ;;  %v1610_v9 = vsel %vm1593_vm0, %v5820_v62, %v5786_v60 }
  0xe2   : > { %v760_v53 = vpop.permute.xlu1 %759  ;;  %v758_v58 = vpop.permute.xlu0 %757 }
  0xe3   : > { %v5967_v34 = vsel %vm1626_vm1, %v1609_v6, %v760_v53  ;;  %v5970_v35 = vsel %vm1626_vm1, %v1608_v7, %v758_v58 }
  0xe4   : > { %1003 = vrot.lane.b32.xlu1 %v5478_v10, %s5365_s10  ;;  %1001 = vrot.lane.b32.xlu0 %v5481_v11, %s5365_s10  ;;  %v1613_v10 = vsel %vm1593_vm0, %v5831_v47, %v5798_v54  ;;  %v1612_v11 = vsel %vm1593_vm0, %v5834_v46, %v5800_v1 }
  0xe6   : > { %v764_v52 = vpop.permute.xlu1 %763  ;;  %v762_v32 = vpop.permute.xlu0 %761 }
  0xe7   : > { %v5983_v23 = vsel %vm1626_vm1, %v1611_v8, %v764_v52  ;;  %v5986_v4 = vsel %vm1626_vm1, %v1610_v9, %v762_v32  ;;  %v8302_v52 = vld [vmem:[#allocation50_spill] sm:$0xff]  ;;  %v8303_v32 = vld [vmem:[#allocation51_spill] sm:$0xff] }
  0xe8   : > { %1007 = vrot.lane.b32.xlu1 %v5488_v12, %s5365_s10  ;;  %1005 = vrot.lane.b32.xlu0 %v5491_v13, %s5365_s10  ;;  %v1615_v12 = vsel %vm1593_vm0, %v5843_v41, %v5812_v57  ;;  %v1614_v13 = vsel %vm1593_vm0, %v5846_v40, %v5814_v59 }
  0xea   : > { %v768_v60 = vpop.permute.xlu1 %767  ;;  %v766_v55 = vpop.permute.xlu0 %765 }
  0xeb   : > { %v5999_v63 = vsel %vm1626_vm1, %v1613_v10, %v768_v60  ;;  %v6002_v6 = vsel %vm1626_vm1, %v1612_v11, %v766_v55  ;;  %v8304_v10 = vld [vmem:[#allocation3_spill] sm:$0xff]  ;;  %v8306_v55 = vld [vmem:[#allocation5_spill] sm:$0xff] }
  0xec   : > { %1011 = vrot.lane.b32.xlu1 %v5498_v14, %s5365_s10  ;;  %1009 = vrot.lane.b32.xlu0 %v5501_v15, %s5365_s10  ;;  %v1617_v14 = vsel %vm1593_vm0, %v5861_v31, %v5826_v49  ;;  %v1616_v15 = vsel %vm1593_vm0, %v5864_v30, %v5828_v48 }
  0xee   : > { %v772_v1 = vpop.permute.xlu1 %771  ;;  %v770_v54 = vpop.permute.xlu0 %769 }
  0xef   : > { %v6015_v7 = vsel %vm1626_vm1, %v1615_v12, %v772_v1  ;;  %v6018_v53 = vsel %vm1626_vm1, %v1614_v13, %v770_v54  ;;  %v8307_v12 = vld [vmem:[#allocation6_spill] sm:$0xff] }
  0xf0   : > { %1015 = vrot.lane.b32.xlu1 %v5508_v16, %s5365_s10  ;;  %1013 = vrot.lane.b32.xlu0 %v5511_v17, %s5365_s10 }
  0xf2   : > { %v776_v57 = vpop.permute.xlu1 %775  ;;  %v774_v59 = vpop.permute.xlu0 %773 }
  0xf3   : > { %v6031_v58 = vsel %vm1626_vm1, %v1617_v14, %v776_v57  ;;  %v6034_v8 = vsel %vm1626_vm1, %v1616_v15, %v774_v59  ;;  %v8309_v14 = vld [vmem:[#allocation8_spill] sm:$0xff]  ;;  %v8310_v59 = vld [vmem:[#allocation9_spill] sm:$0xff] }
  0xf4   : > { %1019 = vrot.lane.b32.xlu1 %v5518_v18, %s5365_s10  ;;  %1017 = vrot.lane.b32.xlu0 %v5521_v19, %s5365_s10 }
  0xf6   : > { %v780_v16 = vpop.permute.xlu1 %779  ;;  %v778_v17 = vpop.permute.xlu0 %777 }
  0xf7   : > { %v6042_v49 = vsel %vm1626_vm1, %v5849_v39, %v780_v16  ;;  %v6046_v48 = vsel %vm1626_vm1, %v5852_v38, %v778_v17  ;;  %v8305_v38 = vld [vmem:[#allocation4_spill] sm:$0xff]  ;;  %v8312_v17 = vld [vmem:[#allocation11_spill] sm:$0xff] }
  0xf8   : > { %1023 = vrot.lane.b32.xlu1 %v5528_v20, %s5365_s10  ;;  %1021 = vrot.lane.b32.xlu0 %v5531_v21, %s5365_s10 }
  0xfa   : > { %v784_v18 = vpop.permute.xlu1 %783  ;;  %v782_v9 = vpop.permute.xlu0 %781 }
  0xfb   : > { %v6054_v19 = vsel %vm1626_vm1, %v8302_v52, %v784_v18  ;;  %v6058_v39 = vsel %vm1626_vm1, %v8303_v32, %v782_v9  ;;  %v8313_v18 = vld [vmem:[#allocation12_spill] sm:$0xff]  ;;  %v6105_v9 = vld [vmem:[%s5431_s29 + $0x189] sm:$0xff]  ;;  %v6108_v52 = vld [vmem:[%s5431_s29 + $0x181] sm:$0xff] }
  0xfc   : > { %1027 = vrot.lane.b32.xlu1 %v8304_v10, %s5365_s10  ;;  %1025 = vrot.lane.b32.xlu0 %v8305_v38, %s5365_s10  ;;  %8314 = vst [vmem:[#allocation50_spill] sm:$0xff] %v6105_v9  ;;  %8315 = vst [vmem:[#allocation51_spill] sm:$0xff] %v6108_v52 }
  0xfe   : > { %v788_v20 = vpop.permute.xlu1 %787  ;;  %v786_v11 = vpop.permute.xlu0 %785 }
  0xff   : > { %v6066_v21 = vsel %vm1626_vm1, %v5879_v25, %v788_v20  ;;  %v6070_v60 = vsel %vm1626_vm1, %v5882_v24, %v786_v11  ;;  %v8308_v24 = vld [vmem:[#allocation7_spill] sm:$0xff]  ;;  %v8316_v11 = vld [vmem:[#allocation13_spill] sm:$0xff] }
 0x100   : > { %1031 = vrot.lane.b32.xlu1 %v8306_v55, %s5365_s10  ;;  %1029 = vrot.lane.b32.xlu0 %v8307_v12, %s5365_s10  ;;  %v8317_v55 = vld [vmem:[#allocation14_spill] sm:$0xff] }
 0x102   : > { %v792_v13 = vpop.permute.xlu1 %791  ;;  %v790_v1 = vpop.permute.xlu0 %789 }
 0x103   : > { %v6078_v54 = vsel %vm1626_vm1, %v5889_v42, %v792_v13  ;;  %v6082_v25 = vsel %vm1626_vm1, %v5892_v43, %v790_v1  ;;  %v8311_v42 = vld [vmem:[#allocation10_spill] sm:$0xff]  ;;  %v8319_v1 = vld [vmem:[#allocation15_spill] sm:$0xff] }
 0x104   : > { %1035 = vrot.lane.b32.xlu1 %v8308_v24, %s5365_s10  ;;  %1033 = vrot.lane.b32.xlu0 %v8309_v14, %s5365_s10  ;;  %v8320_v24 = vld [vmem:[#allocation16_spill] sm:$0xff] }
 0x106   : > { %v6088_v15 = vpop.permute.xlu1 %859  ;;  %v6090_v57 = vpop.permute.xlu0 %857 }
 0x108   : > { %1039 = vrot.lane.b32.xlu1 %v8310_v59, %s5365_s10  ;;  %1037 = vrot.lane.b32.xlu0 %v8311_v42, %s5365_s10 }
 0x10a   : > { %v6096_v16 = vpop.permute.xlu1 %863  ;;  %v6098_v43 = vpop.permute.xlu0 %861 }
 0x10c   : > { %1043 = vrot.lane.b32.xlu1 %v8312_v17, %s5365_s10  ;;  %1041 = vrot.lane.b32.xlu0 %v8313_v18, %s5365_s10  ;;  %v8323_v17 = vld [vmem:[#allocation17_spill] sm:$0xff]  ;;  %v8324_v18 = vld [vmem:[#allocation18_spill] sm:$0xff] }
 0x10e   : > { %v6110_v32 = vpop.permute.xlu1 %867  ;;  %v6112_v10 = vpop.permute.xlu0 %865 }
 0x110   : > { %1047 = vrot.lane.b32.xlu1 %v6105_v9, %s5365_s10  ;;  %1045 = vrot.lane.b32.xlu0 %v6108_v52, %s5365_s10 }
 0x112   : > { %v6118_v38 = vpop.permute.xlu1 %871  ;;  %v6120_v20 = vpop.permute.xlu0 %869 }
 0x114   : > { %1115 = vrot.lane.b32.xlu1 %v8316_v11, %s5366_s11  ;;  %1113 = vrot.lane.b32.xlu0 %v8317_v55, %s5366_s11 }
 0x116   : > { %v6126_v12 = vpop.permute.xlu1 %875  ;;  %v6128_v13 = vpop.permute.xlu0 %873 }
 0x117   : > { %8318 = vst [vmem:[#allocation3_spill] sm:$0xff] %v6126_v12 }
 0x118   : > { %1119 = vrot.lane.b32.xlu1 %v8319_v1, %s5366_s11  ;;  %1117 = vrot.lane.b32.xlu0 %v8320_v24, %s5366_s11 }
 0x11a   : > { %v880_v14 = vpop.permute.xlu1 %879  ;;  %v6134_v59 = vpop.permute.xlu0 %877 }
 0x11b   : > { %8321 = vst [vmem:[#allocation4_spill] sm:$0xff] %v6134_v59  ;;  %v6138_v42 = vsel %vm1659_vm2, %v5938_v0, %v880_v14  ;;  %v8327_v59 = vld [vmem:[#allocation19_spill] sm:$0xff]  ;;  %v8328_v0 = vld [vmem:[#allocation20_spill] sm:$0xff] }
 0x11c   : > { %8322 = vst [vmem:[#allocation5_spill] sm:$0xff] %v6138_v42  ;;  %1123 = vrot.lane.b32.xlu1 %v8323_v17, %s5366_s11  ;;  %1121 = vrot.lane.b32.xlu0 %v8324_v18, %s5366_s11 }
 0x11e   : > { %v884_v11 = vpop.permute.xlu1 %883  ;;  %v882_v55 = vpop.permute.xlu0 %881 }
 0x11f   : > { %v6146_v52 = vsel %vm1659_vm2, %v5951_v2, %v884_v11  ;;  %v6150_v9 = vsel %vm1659_vm2, %v5954_v22, %v882_v55  ;;  %v8330_v11 = vld [vmem:[#allocation21_spill] sm:$0xff]  ;;  %v8331_v22 = vld [vmem:[#allocation22_spill] sm:$0xff] }
 0x120   : > { %8325 = vst [vmem:[#allocation6_spill] sm:$0xff] %v6146_v52  ;;  %8326 = vst [vmem:[#allocation7_spill] sm:$0xff] %v6150_v9  ;;  %1127 = vrot.lane.b32.xlu1 %v8327_v59, %s5366_s11  ;;  %1125 = vrot.lane.b32.xlu0 %v8328_v0, %s5366_s11 }
 0x122   : > { %v888_v14 = vpop.permute.xlu1 %887  ;;  %v886_v42 = vpop.permute.xlu0 %885 }
 0x123   : > { %v6158_v12 = vsel %vm1659_vm2, %v5967_v34, %v888_v14  ;;  %v6162_v2 = vsel %vm1659_vm2, %v5970_v35, %v886_v42  ;;  %v1857_v35 = vld [vmem:[%s8193_s1] sm:$0xff]  ;;  %v1858_v42 = vld [vmem:[%s8193_s1 + $0x8] sm:$0xff]  ;;  %v8334_v14 = vld [vmem:[#allocation23_spill] sm:$0xff] }
 0x124   : > { %8329 = vst [vmem:[#allocation8_spill] sm:$0xff] %v6158_v12  ;;  %1131 = vrot.lane.b32.xlu1 %v8330_v11, %s5366_s11  ;;  %1129 = vrot.lane.b32.xlu0 %v8331_v22, %s5366_s11  ;;  %v8335_v11 = vld [vmem:[#allocation24_spill] sm:$0xff]  ;;  %v4522_v12 = vld [vmem:[%s5431_s29 + $0x10a] sm:$0xff] }
 0x126   : > { %v892_v55 = vpop.permute.xlu1 %891  ;;  %v890_v52 = vpop.permute.xlu0 %889 }
 0x127   : > { %v6170_v9 = vsel %vm1659_vm2, %v5983_v23, %v892_v55  ;;  %v6174_v34 = vsel %vm1659_vm2, %v5986_v4, %v890_v52  ;;  %v4703_v23 = vpack.c.bf16 %v1858_v42, %v1857_v35  ;;  %v8339_v35 = vld [vmem:[#allocation26_spill] sm:$0xff] }
 0x128   : > { %8332 = vst [vmem:[#allocation9_spill] sm:$0xff] %v6170_v9  ;;  %8333 = vst [vmem:[#allocation10_spill] sm:$0xff] %v6174_v34  ;;  %1135 = vrot.lane.b32.xlu1 %v8334_v14, %s5366_s11  ;;  %1133 = vrot.lane.b32.xlu0 %v8335_v11, %s5366_s11  ;;  %v1859_v14 = vld [vmem:[%s8193_s1 + $0x10] sm:$0xff]  ;;  %v8338_v34 = vld [vmem:[#allocation25_spill] sm:$0xff] }
 0x129   : > { %4704 = vmatprep.subr.bf16.mxu0 %v4703_v23 }
 0x12a   : > { %v896_v55 = vpop.permute.xlu1 %895  ;;  %v894_v9 = vpop.permute.xlu0 %893  ;;  %4706 = vmatpush3.bf16.msra.mxu0 %v4703_v23  ;;  %v8343_v23 = vld [vmem:[#allocation28_spill] sm:$0xff] }
 0x12b   : > { %v6188_v4 = vsel %vm1659_vm2, %v5999_v63, %v896_v55  ;;  %v6192_v52 = vsel %vm1659_vm2, %v6002_v6, %v894_v9  ;;  %v1860_v63 = vld [vmem:[%s8193_s1 + $0x18] sm:$0xff] }
 0x12c   : > { %8336 = vst [vmem:[#allocation11_spill] sm:$0xff] %v6188_v4  ;;  %8337 = vst [vmem:[#allocation12_spill] sm:$0xff] %v6192_v52  ;;  %1139 = vrot.lane.b32.xlu1 %v8338_v34, %s5366_s11  ;;  %1137 = vrot.lane.b32.xlu0 %v8339_v35, %s5366_s11  ;;  %v4707_v42 = vpack.c.bf16 %v1860_v63, %v1859_v14  ;;  %v8342_v34 = vld [vmem:[#allocation27_spill] sm:$0xff]  ;;  %v1861_v14 = vld [vmem:[%s8193_s1 + $0x20] sm:$0xf] }
 0x12d   : > { %v8380_v4 = vld [vmem:[#allocation31_spill] sm:$0xff] }
 0x12e   : > { %v900_v11 = vpop.permute.xlu1 %899  ;;  %v898_v55 = vpop.permute.xlu0 %897  ;;  %4708 = vmatprep.subr.bf16.mxu0 %v4707_v42 }
 0x12f   : > { %v6206_v6 = vsel %vm1659_vm2, %v6015_v7, %v900_v11  ;;  %v6210_v9 = vsel %vm1659_vm2, %v6018_v53, %v898_v55  ;;  %4710 = vmatpush3.bf16.msra.mxu0 %v4707_v42  ;;  %v8346_v42 = vld [vmem:[#allocation43_spill] sm:$0xff]  ;;  %v8347_v11 = vld [vmem:[#allocation29_spill] sm:$0xff] }
 0x130   : > { %8340 = vst [vmem:[#allocation13_spill] sm:$0xff] %v6206_v6  ;;  %8341 = vst [vmem:[#allocation14_spill] sm:$0xff] %v6210_v9  ;;  %1143 = vrot.lane.b32.xlu1 %v8342_v34, %s5366_s11  ;;  %1141 = vrot.lane.b32.xlu0 %v8343_v23, %s5366_s11  ;;  %v4520_v6 = vld [vmem:[%s5431_s29 + $0xf2] sm:$0xff] }
 0x131   : > { %4653 = vmatprep.subr.msk.mxu0 %vm1959_vm3, %v1861_v14 }
 0x132   : > { %v904_v35 = vpop.permute.xlu1 %903  ;;  %v902_v7 = vpop.permute.xlu0 %901 }
 0x133   : > { %v6221_v53 = vsel %vm1659_vm2, %v6031_v58, %v904_v35  ;;  %v6225_v63 = vsel %vm1659_vm2, %v6034_v8, %v902_v7  ;;  %4654 = vmatpush3.msk.msra.mxu0 %vm1959_vm3, %v1861_v14  ;;  %v8350_v8 = vld [vmem:[#allocation42_spill] sm:$0xff]  ;;  %v4473_v35 = vld [vmem:[%s5431_s29 + $0x39] sm:$0xff] }
 0x134   : > { %8344 = vst [vmem:[#allocation15_spill] sm:$0xff] %v6221_v53  ;;  %8345 = vst [vmem:[#allocation16_spill] sm:$0xff] %v6225_v63  ;;  %1241 = vrot.lane.b32.xlu1 %v8346_v42, %s5367_s22  ;;  %1145 = vrot.lane.b32.xlu0 %v8347_v11, %s5366_s11 }
 0x136   : > { %v908_v55 = vpop.permute.xlu1 %907  ;;  %v906_v34 = vpop.permute.xlu0 %905 }
 0x137   : > { %v6233_v23 = vsel %vm1659_vm2, %v6042_v49, %v908_v55  ;;  %v6237_v58 = vsel %vm1659_vm2, %v6046_v48, %v906_v34  ;;  %v4474_v34 = vld [vmem:[%s5431_s29 + $0x49] sm:$0xff] }
 0x138   : > { %8348 = vst [vmem:[#allocation17_spill] sm:$0xff] %v6233_v23  ;;  %8349 = vst [vmem:[#allocation18_spill] sm:$0xff] %v6237_v58  ;;  %1369 = vrot.lane.b32.xlu1 %v5451_v5, %s5368_s23  ;;  %1243 = vrot.lane.b32.xlu0 %v8350_v8, %s5367_s22 }
 0x13a   : > { %v912_v14 = vpop.permute.xlu1 %911  ;;  %v910_v7 = vpop.permute.xlu0 %909 }
 0x13b   : > { %v6246_v11 = vsel %vm1659_vm2, %v6054_v19, %v912_v14  ;;  %v6250_v49 = vsel %vm1659_vm2, %v6058_v39, %v910_v7  ;;  %v8355_v39 = vld [vmem:[#allocation46_spill] sm:$0xff]  ;;  %v4475_v7 = vld [vmem:[%s5431_s29 + $0x51] sm:$0xff] }
 0x13c   : > { %8351 = vst [vmem:[#allocation19_spill] sm:$0xff] %v6246_v11  ;;  %8352 = vst [vmem:[#allocation20_spill] sm:$0xff] %v6250_v49  ;;  %1497 = vrot.lane.b32.xlu1 %v8320_v24, %s5369_s26  ;;  %1371 = vrot.lane.b32.xlu0 %v4473_v35, %s5368_s23 }
 0x13e   : > { %v916_v5 = vpop.permute.xlu1 %915  ;;  %v914_v48 = vpop.permute.xlu0 %913 }
 0x13f   : > { %v6257_v55 = vsel %vm1659_vm2, %v6066_v21, %v916_v5  ;;  %v6261_v19 = vsel %vm1659_vm2, %v6070_v60, %v914_v48  ;;  %v8358_v60 = vld [vmem:[#allocation45_spill] sm:$0xff]  ;;  %v8359_v48 = vld [vmem:[#allocation48_spill] sm:$0xff] }
 0x140   : > { %8353 = vst [vmem:[#allocation21_spill] sm:$0xff] %v6257_v55  ;;  %8354 = vst [vmem:[#allocation22_spill] sm:$0xff] %v6261_v19  ;;  %1245 = vrot.lane.b32.xlu1 %v8355_v39, %s5367_s22  ;;  %1499 = vrot.lane.b32.xlu0 %v8319_v1, %s5369_s26  ;;  %v4476_v39 = vld [vmem:[%s5431_s29 + $0x61] sm:$0xff] }
 0x142   : > { %v920_v24 = vpop.permute.xlu1 %919  ;;  %v918_v35 = vpop.permute.xlu0 %917 }
 0x143   : > { %v6270_v14 = vsel %vm1659_vm2, %v6078_v54, %v920_v24  ;;  %v6274_v21 = vsel %vm1659_vm2, %v6082_v25, %v918_v35  ;;  %v4477_v35 = vld [vmem:[%s5431_s29 + $0x69] sm:$0xff] }
 0x144   : > { %8356 = vst [vmem:[#allocation23_spill] sm:$0xff] %v6270_v14  ;;  %8357 = vst [vmem:[#allocation24_spill] sm:$0xff] %v6274_v21  ;;  %1373 = vrot.lane.b32.xlu1 %v4474_v34, %s5368_s23  ;;  %1247 = vrot.lane.b32.xlu0 %v8358_v60, %s5367_s22 }
 0x146   : > { %v6280_v1 = vpop.permute.xlu1 %987  ;;  %v6282_v5 = vpop.permute.xlu0 %985 }
 0x148   : > { %1501 = vrot.lane.b32.xlu1 %v8324_v18, %s5369_s26  ;;  %1375 = vrot.lane.b32.xlu0 %v4475_v7, %s5368_s23  ;;  %v8360_v18 = vld [vmem:[#allocation47_spill] sm:$0xff] }
 0x14a   : > { %v6287_v54 = vpop.permute.xlu1 %991  ;;  %v6289_v25 = vpop.permute.xlu0 %989 }
 0x14c   : > { %1249 = vrot.lane.b32.xlu1 %v8359_v48, %s5367_s22  ;;  %1503 = vrot.lane.b32.xlu0 %v8323_v17, %s5369_s26 }
 0x14e   : > { %v6296_v34 = vpop.permute.xlu1 %995  ;;  %v6298_v24 = vpop.permute.xlu0 %993 }
 0x150   : > { %1377 = vrot.lane.b32.xlu1 %v4476_v39, %s5368_s23  ;;  %1251 = vrot.lane.b32.xlu0 %v8360_v18, %s5367_s22  ;;  %v8361_v39 = vld [vmem:[#allocation49_spill] sm:$0xff] }
 0x151   : > { %v4478_v18 = vld [vmem:[%s5431_s29 + $0x79] sm:$0xff] }
 0x152   : > { %v6304_v60 = vpop.permute.xlu1 %999  ;;  %v6306_v7 = vpop.permute.xlu0 %997 }
 0x154   : > { %1505 = vrot.lane.b32.xlu1 %v8328_v0, %s5369_s26  ;;  %1379 = vrot.lane.b32.xlu0 %v4477_v35, %s5368_s23  ;;  %v4479_v0 = vld [vmem:[%s5431_s29 + $0x81] sm:$0xff] }
 0x156   : > { %v6311_v17 = vpop.permute.xlu1 %1003  ;;  %v6313_v48 = vpop.permute.xlu0 %1001 }
 0x158   : > { %1253 = vrot.lane.b32.xlu1 %v8361_v39, %s5367_s22  ;;  %1507 = vrot.lane.b32.xlu0 %v8327_v59, %s5369_s26  ;;  %v4511_v59 = vld [vmem:[%s5431_s29 + $0x82] sm:$0xff] }
 0x15a   : > { %v6320_v21 = vpop.permute.xlu1 %1007  ;;  %v6322_v14 = vpop.permute.xlu0 %1005 }
 0x15c   : > { %1381 = vrot.lane.b32.xlu1 %v4478_v18, %s5368_s23  ;;  %1255 = vrot.lane.b32.xlu0 %v5775_v56, %s5367_s22  ;;  %v4480_v56 = vld [vmem:[%s5431_s29 + $0x91] sm:$0xff] }
 0x15e   : > { %v6328_v35 = vpop.permute.xlu1 %1011  ;;  %v6330_v39 = vpop.permute.xlu0 %1009 }
 0x160   : > { %1509 = vrot.lane.b32.xlu1 %v8331_v22, %s5369_s26  ;;  %1383 = vrot.lane.b32.xlu0 %v4479_v0, %s5368_s23  ;;  %v4512_v22 = vld [vmem:[%s5431_s29 + $0x92] sm:$0xff] }
 0x161   : > { %v4481_v0 = vld [vmem:[%s5431_s29 + $0x99] sm:$0xff] }
 0x162   : > { %v6336_v19 = vpop.permute.xlu1 %1015  ;;  %v6338_v18 = vpop.permute.xlu0 %1013 }
 0x164   : > { %1257 = vrot.lane.b32.xlu1 %v5792_v61, %s5367_s22  ;;  %1511 = vrot.lane.b32.xlu0 %v4511_v59, %s5369_s26  ;;  %v4513_v59 = vld [vmem:[%s5431_s29 + $0x9a] sm:$0xff] }
 0x166   : > { %v6344_v55 = vpop.permute.xlu1 %1019  ;;  %v6346_v49 = vpop.permute.xlu0 %1017 }
 0x167   : > { %8362 = vst [vmem:[#allocation25_spill] sm:$0xff] %v6344_v55  ;;  %8363 = vst [vmem:[#allocation26_spill] sm:$0xff] %v6346_v49  ;;  %v280_v49 = vld [vmem:[%s5431_s29 + $0x8] sm:$0xff] }
 0x168   : > { %1385 = vrot.lane.b32.xlu1 %v4480_v56, %s5368_s23  ;;  %1259 = vrot.lane.b32.xlu0 %v5789_v3, %s5367_s22  ;;  %v4482_v3 = vld [vmem:[%s5431_s29 + $0xa9] sm:$0xff] }
 0x169   : > { %v4490_v55 = vld [vmem:[%s5431_s29 + $0x109] sm:$0xff] }
 0x16a   : > { %v6353_v11 = vpop.permute.xlu1 %1023  ;;  %v6355_v61 = vpop.permute.xlu0 %1021 }
 0x16b   : > { %8364 = vst [vmem:[#allocation27_spill] sm:$0xff] %v6353_v11  ;;  %8365 = vst [vmem:[#allocation28_spill] sm:$0xff] %v6355_v61 }
 0x16c   : > { %1513 = vrot.lane.b32.xlu1 %v4512_v22, %s5369_s26  ;;  %1387 = vrot.lane.b32.xlu0 %v4481_v0, %s5368_s23  ;;  %v4514_v22 = vld [vmem:[%s5431_s29 + $0xaa] sm:$0xff] }
 0x16d   : > { %v4483_v0 = vld [vmem:[%s5431_s29 + $0xb1] sm:$0xff] }
 0x16e   : > { %v6360_v58 = vpop.permute.xlu1 %1027  ;;  %v6362_v56 = vpop.permute.xlu0 %1025 }
 0x16f   : > { %8366 = vst [vmem:[#allocation43_spill] sm:$0xff] %v6360_v58  ;;  %8367 = vst [vmem:[#allocation29_spill] sm:$0xff] %v6362_v56 }
 0x170   : > { %1261 = vrot.lane.b32.xlu1 %v5806_v33, %s5367_s22  ;;  %1515 = vrot.lane.b32.xlu0 %v4513_v59, %s5369_s26  ;;  %v4515_v59 = vld [vmem:[%s5431_s29 + $0xb2] sm:$0xff] }
 0x172   : > { %v6368_v23 = vpop.permute.xlu1 %1031  ;;  %v6370_v63 = vpop.permute.xlu0 %1029 }
 0x173   : > { %8368 = vst [vmem:[#allocation42_spill] sm:$0xff] %v6368_v23  ;;  %8369 = vst [vmem:[#allocation46_spill] sm:$0xff] %v6370_v63 }
 0x174   : > { %1389 = vrot.lane.b32.xlu1 %v4482_v3, %s5368_s23  ;;  %1263 = vrot.lane.b32.xlu0 %v5803_v50, %s5367_s22  ;;  %v4484_v50 = vld [vmem:[%s5431_s29 + $0xc1] sm:$0xff] }
 0x176   : > { %v6377_v53 = vpop.permute.xlu1 %1035  ;;  %v6379_v33 = vpop.permute.xlu0 %1033 }
 0x177   : > { %8370 = vst [vmem:[#allocation45_spill] sm:$0xff] %v6377_v53  ;;  %8371 = vst [vmem:[#allocation48_spill] sm:$0xff] %v6379_v33 }
 0x178   : > { %1517 = vrot.lane.b32.xlu1 %v4514_v22, %s5369_s26  ;;  %1391 = vrot.lane.b32.xlu0 %v4483_v0, %s5368_s23  ;;  %v4516_v22 = vld [vmem:[%s5431_s29 + $0xc2] sm:$0xff] }
 0x179   : > { %v4485_v0 = vld [vmem:[%s5431_s29 + $0xc9] sm:$0xff] }
 0x17a   : > { %v6384_v63 = vpop.permute.xlu1 %1039  ;;  %v6386_v3 = vpop.permute.xlu0 %1037 }
 0x17b   : > { %8372 = vst [vmem:[#allocation47_spill] sm:$0xff] %v6384_v63  ;;  %8373 = vst [vmem:[#allocation49_spill] sm:$0xff] %v6386_v3 }
 0x17c   : > { %1265 = vrot.lane.b32.xlu1 %v5820_v62, %s5367_s22  ;;  %1519 = vrot.lane.b32.xlu0 %v4515_v59, %s5369_s26  ;;  %v4517_v59 = vld [vmem:[%s5431_s29 + $0xca] sm:$0xff] }
 0x17e   : > { %v6392_v53 = vpop.permute.xlu1 %1043  ;;  %v6394_v33 = vpop.permute.xlu0 %1041 }
 0x17f   : > { %8374 = vst [vmem:[#allocation55_spill] sm:$0xff] %v6392_v53  ;;  %8375 = vst [vmem:[#allocation56_spill] sm:$0xff] %v6394_v33 }
 0x180   : > { %1393 = vrot.lane.b32.xlu1 %v4484_v50, %s5368_s23  ;;  %1267 = vrot.lane.b32.xlu0 %v5817_v51, %s5367_s22  ;;  %v4486_v51 = vld [vmem:[%s5431_s29 + $0xd9] sm:$0xff] }
 0x182   : > { %v6401_v3 = vpop.permute.xlu1 %1047  ;;  %v6403_v62 = vpop.permute.xlu0 %1045 }
 0x183   : > { %8376 = vst [vmem:[#allocation57_spill] sm:$0xff] %v6401_v3  ;;  %8377 = vst [vmem:[#allocation58_spill] sm:$0xff] %v6403_v62 }
 0x184   : > { %1521 = vrot.lane.b32.xlu1 %v4516_v22, %s5369_s26  ;;  %1395 = vrot.lane.b32.xlu0 %v4485_v0, %s5368_s23  ;;  %v4518_v22 = vld [vmem:[%s5431_s29 + $0xda] sm:$0xff] }
 0x185   : > { %v4487_v0 = vld [vmem:[%s5431_s29 + $0xe1] sm:$0xff] }
 0x186   : > { %v6408_v33 = vpop.permute.xlu1 %1115  ;;  %v1114_v50 = vpop.permute.xlu0 %1113 }
 0x188   : > { %1269 = vrot.lane.b32.xlu1 %v5834_v46, %s5367_s22  ;;  %1523 = vrot.lane.b32.xlu0 %v4517_v59, %s5369_s26  ;;  %v4425_v46 = vld [vmem:[%s5431_s29 + $0xe2] sm:$0xff] }
 0x18a   : > { %v6414_v53 = vpop.permute.xlu1 %1119  ;;  %v6416_v3 = vpop.permute.xlu0 %1117 }
 0x18c   : > { %1397 = vrot.lane.b32.xlu1 %v4486_v51, %s5368_s23  ;;  %1271 = vrot.lane.b32.xlu0 %v5831_v47, %s5367_s22 }
 0x18e   : > { %v6423_v62 = vpop.permute.xlu1 %1123  ;;  %v6425_v63 = vpop.permute.xlu0 %1121 }
 0x190   : > { %1525 = vrot.lane.b32.xlu1 %v4518_v22, %s5369_s26  ;;  %1399 = vrot.lane.b32.xlu0 %v4487_v0, %s5368_s23  ;;  %v4489_v22 = vld [vmem:[%s5431_s29 + $0xf9] sm:$0xff]  ;;  %v4488_v0 = vld [vmem:[%s5431_s29 + $0xf1] sm:$0xff] }
 0x192   : > { %v6430_v59 = vpop.permute.xlu1 %1127  ;;  %v6432_v51 = vpop.permute.xlu0 %1125 }
 0x194   : > { %1147 = vrot.lane.b32.xlu1 %v4425_v46, %s5366_s11  ;;  %1527 = vrot.lane.b32.xlu0 %v4425_v46, %s5369_s26  ;;  %v4521_v46 = vld [vmem:[%s5431_s29 + $0xfa] sm:$0xff] }
 0x196   : > { %v6436_v47 = vpop.permute.xlu1 %1131  ;;  %v6438_v23 = vpop.permute.xlu0 %1129 }
 0x198   : > { %1275 = vrot.lane.b32.xlu1 %v5843_v41, %s5367_s22  ;;  %1273 = vrot.lane.b32.xlu0 %v5846_v40, %s5367_s22 }
 0x19a   : > { %v6446_v9 = vpop.permute.xlu1 %1135  ;;  %v6448_v56 = vpop.permute.xlu0 %1133 }
 0x19c   : > { %1403 = vrot.lane.b32.xlu1 %v4489_v22, %s5368_s23  ;;  %1401 = vrot.lane.b32.xlu0 %v4488_v0, %s5368_s23  ;;  %v279_v22 = vld [vmem:[%s5431_s29] sm:$0xff] }
 0x19d   : > { %v1594_v11 = vsel %vm1593_vm0, %v279_v22, %v8380_v4 }
 0x19e   : > { %v6454_v58 = vpop.permute.xlu1 %1139  ;;  %v6456_v41 = vpop.permute.xlu0 %1137 }
 0x1a0   : > { %1531 = vrot.lane.b32.xlu1 %v4521_v46, %s5369_s26  ;;  %1529 = vrot.lane.b32.xlu0 %v4520_v6, %s5369_s26 }
 0x1a2   : > { %v6460_v40 = vpop.permute.xlu1 %1143  ;;  %v6462_v52 = vpop.permute.xlu0 %1141 }
 0x1a3   : > { %8378 = vst [vmem:[#allocation59_spill] sm:$0xff] %v6460_v40 }
 0x1a4   : > { %1151 = vrot.lane.b32.xlu1 %v4521_v46, %s5366_s11  ;;  %1149 = vrot.lane.b32.xlu0 %v4520_v6, %s5366_s11  ;;  %v1627_v46 = vsel %vm1626_vm1, %v1594_v11, %v5898_v27  ;;  %v4491_v6 = vld [vmem:[%s5431_s29 + $0x111] sm:$0xff] }
 0x1a6   : > { %v1242_v0 = vpop.permute.xlu1 %1241  ;;  %v6467_v61 = vpop.permute.xlu0 %1145 }
 0x1a7   : > { %8379 = vst [vmem:[#allocation60_spill] sm:$0xff] %v6467_v61  ;;  %v1660_v61 = vsel %vm1659_vm2, %v1627_v46, %v6090_v57  ;;  %v4523_v46 = vld [vmem:[%s5431_s29 + $0x112] sm:$0xff] }
 0x1a8   : > { %1279 = vrot.lane.b32.xlu1 %v5861_v31, %s5367_s22  ;;  %1277 = vrot.lane.b32.xlu0 %v5864_v30, %s5367_s22  ;;  %v1693_v31 = vsel %vm1692_vm4, %v1660_v61, %v6282_v5  ;;  %v8381_v30 = vld [vmem:[#allocation33_spill] sm:$0xff] }
 0x1a9   : > { %v1595_v40 = vsel %vm1593_vm0, %v280_v49, %v8381_v30  ;;  %v1726_v27 = vsel %vm1725_vm5, %v1693_v31, %v1114_v50  ;;  %v8383_v31 = vld [vmem:[#allocation38_spill] sm:$0xff] }
 0x1aa   : > { %v1370_v4 = vpop.permute.xlu1 %1369  ;;  %v1244_v22 = vpop.permute.xlu0 %1243  ;;  %v1628_v57 = vsel %vm1626_vm1, %v1595_v40, %v5896_v26  ;;  %v1759_v11 = vsel %vm1758_vm6, %v1726_v27, %v1242_v0 }
 0x1ab   : > { %v1661_v5 = vsel %vm1659_vm2, %v1628_v57, %v6088_v15  ;;  %v1792_v61 = vsel %vm1791_vm7, %v1759_v11, %v1370_v4  ;;  %v8382_v4 = vld [vmem:[#allocation30_spill] sm:$0xff]  ;;  %v4460_v57 = vld [vmem:[%s5431_s29 + $0x120] sm:$0xff] }
 0x1ac   : > { %1407 = vrot.lane.b32.xlu1 %v4491_v6, %s5368_s23  ;;  %1405 = vrot.lane.b32.xlu0 %v4490_v55, %s5368_s23  ;;  %v1694_v50 = vsel %vm1692_vm4, %v1661_v5, %v6280_v1  ;;  %v1596_v27 = vsel %vm1593_vm0, %v8383_v31, %v8382_v4  ;;  %v4524_v4 = vld [vmem:[%s5431_s29 + $0x122] sm:$0xff] }
 0x1ad   : > { %v1727_v26 = vsel %vm1725_vm5, %v1694_v50, %v6408_v33  ;;  %v1629_v33 = vsel %vm1626_vm1, %v1596_v27, %v5904_v45 }
 0x1ae   : > { %v1498_v49 = vpop.permute.xlu1 %1497  ;;  %v1372_v30 = vpop.permute.xlu0 %1371  ;;  %v1760_v15 = vsel %vm1758_vm6, %v1727_v26, %v1244_v22  ;;  %v4461_v22 = vld [vmem:[%s5431_s29 + $0x128] sm:$0xff]  ;;  %v1662_v11 = vsel %vm1659_vm2, %v1629_v33, %v6098_v43 }
 0x1af   : > { %v1825_v55 = vsel %vm1824_vm8, %v1792_v61, %v1498_v49  ;;  %v1793_v40 = vsel %vm1791_vm7, %v1760_v15, %v1372_v30  ;;  %v1695_v49 = vsel %vm1692_vm4, %v1662_v11, %v6289_v25  ;;  %v8385_v30 = vld [vmem:[#allocation39_spill] sm:$0xff]  ;;  %v4492_v25 = vld [vmem:[%s5431_s29 + $0x121] sm:$0xff] }
 0x1b0   : > { %1535 = vrot.lane.b32.xlu1 %v4523_v46, %s5369_s26  ;;  %1533 = vrot.lane.b32.xlu0 %v4522_v12, %s5369_s26  ;;  %v1728_v50 = vsel %vm1725_vm5, %v1695_v49, %v6416_v3 }
 0x1b1   : > { %4655 = vmatprep.mubr.msk.f32.mxu0 %vm1862_vm9, %v1825_v55  ;;  %v4493_v55 = vld [vmem:[%s5431_s29 + $0x129] sm:$0xff] }
 0x1b2   : > { %v1246_v0 = vpop.permute.xlu1 %1245  ;;  %v1500_v6 = vpop.permute.xlu0 %1499 }
 0x1b3   : > { %v1826_v1 = vsel %vm1824_vm8, %v1793_v40, %v1500_v6  ;;  %v1761_v43 = vsel %vm1758_vm6, %v1728_v50, %v1246_v0 }
 0x1b4   : > { %1155 = vrot.lane.b32.xlu1 %v4523_v46, %s5366_s11  ;;  %1153 = vrot.lane.b32.xlu0 %v4522_v12, %s5366_s11  ;;  %v8384_v46 = vld [vmem:[#allocation32_spill] sm:$0xff] }
 0x1b5   : > { %4656 = vmatmul.mubr.msk.f32.vlgmr.msra.gmra.mrb[0].mxu0 %vm1862_vm9, %v1826_v1  ;;  %v1597_v12 = vsel %vm1593_vm0, %v8385_v30, %v8384_v46  ;;  %v8387_v46 = vld [vmem:[#allocation34_spill] sm:$0xff] }
 0x1b6   : > { %v1374_v5 = vpop.permute.xlu1 %1373  ;;  %v1248_v61 = vpop.permute.xlu0 %1247  ;;  %v1630_v45 = vsel %vm1626_vm1, %v1597_v12, %v5902_v44  ;;  %v4463_v12 = vld [vmem:[%s5431_s29 + $0x140] sm:$0xff] }
 0x1b7   : > { %v1663_v26 = vsel %vm1659_vm2, %v1630_v45, %v6096_v16  ;;  %v1794_v15 = vsel %vm1791_vm7, %v1761_v43, %v1374_v5  ;;  %v4525_v16 = vld [vmem:[%s5431_s29 + $0x12a] sm:$0xff] }
 0x1b8   : > { %1283 = vrot.lane.b32.xlu1 %v4461_v22, %s5367_s22  ;;  %1281 = vrot.lane.b32.xlu0 %v4460_v57, %s5367_s22  ;;  %v1696_v6 = vsel %vm1692_vm4, %v1663_v26, %v6287_v54  ;;  %v8386_v22 = vld [vmem:[#allocation35_spill] sm:$0xff]  ;;  %v4494_v26 = vld [vmem:[%s5431_s29 + $0x139] sm:$0xff] }
 0x1b9   : > { %v1729_v44 = vsel %vm1725_vm5, %v1696_v6, %v6414_v53  ;;  %v1598_v53 = vsel %vm1593_vm0, %v8346_v42, %v8386_v22  ;;  %v1599_v42 = vsel %vm1593_vm0, %v8350_v8, %v8387_v46  ;;  %v8388_v6 = vld [vmem:[#allocation37_spill] sm:$0xff]  ;;  %v8389_v22 = vld [vmem:[#allocation36_spill] sm:$0xff] }
 0x1ba   : > { %v1502_v40 = vpop.permute.xlu1 %1501  ;;  %v1376_v3 = vpop.permute.xlu0 %1375  ;;  %v1762_v0 = vsel %vm1758_vm6, %v1729_v44, %v1248_v61  ;;  %v1631_v57 = vsel %vm1626_vm1, %v1598_v53, %v5912_v36  ;;  %v1632_v36 = vsel %vm1626_vm1, %v1599_v42, %v5910_v37  ;;  %v4464_v42 = vld [vmem:[%s5431_s29 + $0x150] sm:$0xff] }
 0x1bb   : > { %v1827_v1 = vsel %vm1824_vm8, %v1794_v15, %v1502_v40  ;;  %v1795_v31 = vsel %vm1791_vm7, %v1762_v0, %v1376_v3  ;;  %v1664_v11 = vsel %vm1659_vm2, %v1631_v57, %v6112_v10  ;;  %v1665_v50 = vsel %vm1659_vm2, %v1632_v36, %v6110_v32  ;;  %v4527_v0 = vld [vmem:[%s5431_s29 + $0x142] sm:$0xff] }
 0x1bc   : > { %1411 = vrot.lane.b32.xlu1 %v4493_v55, %s5368_s23  ;;  %1409 = vrot.lane.b32.xlu0 %v4492_v25, %s5368_s23  ;;  %v1697_v49 = vsel %vm1692_vm4, %v1664_v11, %v6298_v24  ;;  %v4462_v24 = vld [vmem:[%s5431_s29 + $0x138] sm:$0xff]  ;;  %v1698_v43 = vsel %vm1692_vm4, %v1665_v50, %v6296_v34  ;;  %v4495_v25 = vld [vmem:[%s5431_s29 + $0x141] sm:$0xff] }
 0x1bd   : > { %4658 = vmatprep.mubr.msk.f32.mxu0 %vm1862_vm9, %v1827_v1  ;;  %v1730_v30 = vsel %vm1725_vm5, %v1697_v49, %v6425_v63  ;;  %v1731_v37 = vsel %vm1725_vm5, %v1698_v43, %v6423_v62  ;;  %v5340_v62 = vld [vmem:[%s5431_s29 + $0x48] sm:$0xff]  ;;  %v8391_v50 = vld [vmem:[#allocation53_spill] sm:$0xff] }
 0x1be   : > { %v1250_v27 = vpop.permute.xlu1 %1249  ;;  %v1504_v33 = vpop.permute.xlu0 %1503  ;;  %v1600_v1 = vsel %vm1593_vm0, %v5340_v62, %v8388_v6  ;;  %v4529_v62 = vld [vmem:[%s5431_s29 + $0x15a] sm:$0xff]  ;;  %v4528_v6 = vld [vmem:[%s5431_s29 + $0x152] sm:$0xff] }
 0x1bf   : > { %v1828_v54 = vsel %vm1824_vm8, %v1795_v31, %v1504_v33  ;;  %v1763_v10 = vsel %vm1758_vm6, %v1730_v30, %v1250_v27  ;;  %v1633_v44 = vsel %vm1626_vm1, %v1600_v1, %v5918_v28  ;;  %v8394_v1 = vld [vmem:[#allocation3_spill] sm:$0xff] }
 0x1c0   : > { %1539 = vrot.lane.b32.xlu1 %v4525_v16, %s5369_s26  ;;  %1537 = vrot.lane.b32.xlu0 %v4524_v4, %s5369_s26 }
 0x1c1   : > { %4659 = vmatmul.mubr.msk.f32.gmra.mrb[2].mxu0 %vm1862_vm9, %v1828_v54  ;;  %v5341_v54 = vld [vmem:[%s5431_s29 + $0x50] sm:$0xff] }
 0x1c2   : > { %v1378_v5 = vpop.permute.xlu1 %1377  ;;  %v1252_v61 = vpop.permute.xlu0 %1251  ;;  %v1601_v53 = vsel %vm1593_vm0, %v5341_v54, %v8389_v22 }
 0x1c3   : > { %v1796_v8 = vsel %vm1791_vm7, %v1763_v10, %v1378_v5  ;;  %v1764_v32 = vsel %vm1758_vm6, %v1731_v37, %v1252_v61  ;;  %v1634_v28 = vsel %vm1626_vm1, %v1601_v53, %v5916_v29  ;;  %v5344_v53 = vld [vmem:[%s5431_s29 + $0x78] sm:$0xff] }
 0x1c4   : > { %1159 = vrot.lane.b32.xlu1 %v4525_v16, %s5366_s11  ;;  %1157 = vrot.lane.b32.xlu0 %v4524_v4, %s5366_s11  ;;  %v4526_v16 = vld [vmem:[%s5431_s29 + $0x13a] sm:$0xff]  ;;  %v1666_v4 = vsel %vm1659_vm2, %v1633_v44, %v6120_v20 }
 0x1c5   : > { %v1699_v33 = vsel %vm1692_vm4, %v1666_v4, %v6306_v7  ;;  %v1667_v7 = vsel %vm1659_vm2, %v1634_v28, %v6118_v38  ;;  %v4465_v38 = vld [vmem:[%s5431_s29 + $0x158] sm:$0xff]  ;;  %v8396_v28 = vld [vmem:[#allocation54_spill] sm:$0xff] }
 0x1c6   : > { %v1506_v63 = vpop.permute.xlu1 %1505  ;;  %v1380_v45 = vpop.permute.xlu0 %1379  ;;  %v1732_v57 = vsel %vm1725_vm5, %v1699_v33, %v6432_v51  ;;  %v1700_v51 = vsel %vm1692_vm4, %v1667_v7, %v6304_v60  ;;  %v4467_v7 = vld [vmem:[%s5431_s29 + $0x170] sm:$0xff] }
 0x1c7   : > { %v1829_v55 = vsel %vm1824_vm8, %v1796_v8, %v1506_v63  ;;  %v1797_v15 = vsel %vm1791_vm7, %v1764_v32, %v1380_v45  ;;  %v1733_v46 = vsel %vm1725_vm5, %v1700_v51, %v6430_v59  ;;  %v5342_v59 = vld [vmem:[%s5431_s29 + $0x60] sm:$0xff]  ;;  %v4496_v45 = vld [vmem:[%s5431_s29 + $0x151] sm:$0xff] }
 0x1c8   : > { %1287 = vrot.lane.b32.xlu1 %v4463_v12, %s5367_s22  ;;  %1285 = vrot.lane.b32.xlu0 %v4462_v24, %s5367_s22  ;;  %v8390_v12 = vld [vmem:[#allocation41_spill] sm:$0xff] }
 0x1c9   : > { %4661 = vmatprep.mubr.msk.f32.mxu0 %vm1862_vm9, %v1829_v55  ;;  %v1602_v24 = vsel %vm1593_vm0, %v5342_v59, %v8390_v12  ;;  %v4497_v63 = vld [vmem:[%s5431_s29 + $0x159] sm:$0xff] }
 0x1ca   : > { %v1254_v34 = vpop.permute.xlu1 %1253  ;;  %v1508_v40 = vpop.permute.xlu0 %1507  ;;  %v1635_v8 = vsel %vm1626_vm1, %v1602_v24, %v8391_v50  ;;  %v8398_v59 = vld [vmem:[#allocation5_spill] sm:$0xff]  ;;  %v4531_v50 = vld [vmem:[%s5431_s29 + $0x172] sm:$0xff] }
 0x1cb   : > { %v1830_v3 = vsel %vm1824_vm8, %v1797_v15, %v1508_v40  ;;  %v1765_v20 = vsel %vm1758_vm6, %v1732_v57, %v1254_v34  ;;  %v1668_v43 = vsel %vm1659_vm2, %v1635_v8, %v6128_v13  ;;  %v8393_v40 = vld [vmem:[#allocation52_spill] sm:$0xff]  ;;  %v4530_v8 = vld [vmem:[%s5431_s29 + $0x16a] sm:$0xff] }
 0x1cc   : > { %1415 = vrot.lane.b32.xlu1 %v4495_v25, %s5368_s23  ;;  %1413 = vrot.lane.b32.xlu0 %v4494_v26, %s5368_s23  ;;  %v1701_v32 = vsel %vm1692_vm4, %v1668_v43, %v6313_v48  ;;  %v5343_v25 = vld [vmem:[%s5431_s29 + $0x68] sm:$0xff]  ;;  %v8392_v26 = vld [vmem:[#allocation40_spill] sm:$0xff] }
 0x1cd   : > { %4662 = vmatmul.mubr.msk.f32.gmra.mrb[4].mxu0 %vm1862_vm9, %v1830_v3  ;;  %v1603_v15 = vsel %vm1593_vm0, %v5343_v25, %v8392_v26  ;;  %v1734_v34 = vsel %vm1725_vm5, %v1701_v32, %v6438_v23  ;;  %v8395_v57 = vld [vmem:[#allocation44_spill] sm:$0xff] }
 0x1ce   : > { %v1382_v31 = vpop.permute.xlu1 %1381  ;;  %v1256_v27 = vpop.permute.xlu0 %1255  ;;  %v1636_v3 = vsel %vm1626_vm1, %v1603_v15, %v8393_v40  ;;  %v4469_v15 = vld [vmem:[%s5431_s29 + $0x188] sm:$0xff] }
 0x1cf   : > { %v1798_v11 = vsel %vm1791_vm7, %v1765_v20, %v1382_v31  ;;  %v1766_v29 = vsel %vm1758_vm6, %v1733_v46, %v1256_v27  ;;  %v1669_v48 = vsel %vm1659_vm2, %v1636_v3, %v8394_v1 }
 0x1d0   : > { %1543 = vrot.lane.b32.xlu1 %v4527_v0, %s5369_s26  ;;  %1541 = vrot.lane.b32.xlu0 %v4526_v16, %s5369_s26  ;;  %v1702_v23 = vsel %vm1692_vm4, %v1669_v48, %v6311_v17 }
 0x1d1   : > { %v1735_v31 = vsel %vm1725_vm5, %v1702_v23, %v6436_v47  ;;  %v1604_v47 = vsel %vm1593_vm0, %v5344_v53, %v8395_v57  ;;  %v8402_v23 = vld [vmem:[#allocation51_spill] sm:$0xff] }
 0x1d2   : > { %v1510_v5 = vpop.permute.xlu1 %1509  ;;  %v1384_v61 = vpop.permute.xlu0 %1383  ;;  %v1637_v20 = vsel %vm1626_vm1, %v1604_v47, %v8396_v28  ;;  %v8403_v47 = vld [vmem:[#allocation8_spill] sm:$0xff] }
 0x1d3   : > { %v1831_v49 = vsel %vm1824_vm8, %v1798_v11, %v1510_v5  ;;  %v1799_v30 = vsel %vm1791_vm7, %v1766_v29, %v1384_v61  ;;  %v4466_v11 = vld [vmem:[%s5431_s29 + $0x168] sm:$0xff]  ;;  %v8397_v5 = vld [vmem:[#allocation4_spill] sm:$0xff]  ;;  %v1708_v28 = vsel %vm1692_vm4, %v8403_v47, %v6336_v19 }
 0x1d4   : > { %1163 = vrot.lane.b32.xlu1 %v4527_v0, %s5366_s11  ;;  %1161 = vrot.lane.b32.xlu0 %v4526_v16, %s5366_s11  ;;  %v1670_v61 = vsel %vm1659_vm2, %v1637_v20, %v8397_v5 }
 0x1d5   : > { %4664 = vmatprep.mubr.msk.f32.mxu0 %vm1862_vm9, %v1831_v49  ;;  %v1703_v46 = vsel %vm1692_vm4, %v1670_v61, %v6322_v14  ;;  %v1704_v14 = vsel %vm1692_vm4, %v8398_v59, %v6320_v21  ;;  %v8405_v59 = vld [vmem:[#allocation25_spill] sm:$0xff] }
 0x1d6   : > { %v1258_v60 = vpop.permute.xlu1 %1257  ;;  %v1512_v36 = vpop.permute.xlu0 %1511  ;;  %v1736_v29 = vsel %vm1725_vm5, %v1703_v46, %v6448_v56  ;;  %v1737_v12 = vsel %vm1725_vm5, %v1704_v14, %v6446_v9  ;;  %v4502_v46 = vld [vmem:[%s5431_s29 + $0x199] sm:$0xff] }
 0x1d7   : > { %v1832_v10 = vsel %vm1824_vm8, %v1799_v30, %v1512_v36  ;;  %v1767_v13 = vsel %vm1758_vm6, %v1734_v34, %v1258_v60  ;;  %v4498_v30 = vld [vmem:[%s5431_s29 + $0x169] sm:$0xff]  ;;  %v4468_v34 = vld [vmem:[%s5431_s29 + $0x180] sm:$0xff] }
 0x1d8   : > { %1291 = vrot.lane.b32.xlu1 %v4465_v38, %s5367_s22  ;;  %1289 = vrot.lane.b32.xlu0 %v4464_v42, %s5367_s22  ;;  %v4499_v42 = vld [vmem:[%s5431_s29 + $0x171] sm:$0xff]  ;;  %v8406_v14 = vld [vmem:[#allocation9_spill] sm:$0xff] }
 0x1d9   : > { %4665 = vmatmul.mubr.msk.f32.gmra.mrb[6].mxu0 %vm1862_vm9, %v1832_v10 }
 0x1da   : > { %v1386_v55 = vpop.permute.xlu1 %1385  ;;  %v1260_v37 = vpop.permute.xlu0 %1259 }
 0x1db   : > { %v1800_v44 = vsel %vm1791_vm7, %v1767_v13, %v1386_v55  ;;  %v1768_v27 = vsel %vm1758_vm6, %v1735_v31, %v1260_v37  ;;  %v8399_v37 = vld [vmem:[#allocation7_spill] sm:$0xff] }
 0x1dc   : > { %1419 = vrot.lane.b32.xlu1 %v4497_v63, %s5368_s23  ;;  %1417 = vrot.lane.b32.xlu0 %v4496_v45, %s5368_s23  ;;  %v1705_v32 = vsel %vm1692_vm4, %v8399_v37, %v6330_v39 }
 0x1dd   : > { %v1738_v25 = vsel %vm1725_vm5, %v1705_v32, %v6456_v41 }
 0x1de   : > { %v1514_v0 = vpop.permute.xlu1 %1513  ;;  %v1388_v16 = vpop.permute.xlu0 %1387 }
 0x1df   : > { %v1833_v4 = vsel %vm1824_vm8, %v1800_v44, %v1514_v0  ;;  %v1801_v33 = vsel %vm1791_vm7, %v1768_v27, %v1388_v16 }
 0x1e0   : > { %1547 = vrot.lane.b32.xlu1 %v4529_v62, %s5369_s26  ;;  %1545 = vrot.lane.b32.xlu0 %v4528_v6, %s5369_s26 }
 0x1e1   : > { %4667 = vmatprep.mubr.msk.f32.mxu0 %vm1862_vm9, %v1833_v4  ;;  %v4532_v4 = vld [vmem:[%s5431_s29 + $0x182] sm:$0xff] }
 0x1e2   : > { %v1262_v54 = vpop.permute.xlu1 %1261  ;;  %v1516_v22 = vpop.permute.xlu0 %1515 }
 0x1e3   : > { %v1834_v17 = vsel %vm1824_vm8, %v1801_v33, %v1516_v22  ;;  %v1769_v38 = vsel %vm1758_vm6, %v1736_v29, %v1262_v54  ;;  %v1707_v33 = vsel %vm1692_vm4, %v6162_v2, %v6338_v18  ;;  %v8404_v18 = vld [vmem:[#allocation59_spill] sm:$0xff] }
 0x1e4   : > { %1167 = vrot.lane.b32.xlu1 %v4529_v62, %s5366_s11  ;;  %1165 = vrot.lane.b32.xlu0 %v4528_v6, %s5366_s11  ;;  %v8400_v62 = vld [vmem:[#allocation6_spill] sm:$0xff]  ;;  %v1740_v54 = vsel %vm1725_vm5, %v1707_v33, %v6462_v52  ;;  %v1741_v52 = vsel %vm1725_vm5, %v1708_v28, %v8404_v18 }
 0x1e5   : > { %4668 = vmatmul.mubr.msk.f32.gmra.mrb[8].mxu0 %vm1862_vm9, %v1834_v17  ;;  %v1706_v39 = vsel %vm1692_vm4, %v8400_v62, %v6328_v35  ;;  %v8401_v35 = vld [vmem:[#allocation50_spill] sm:$0xff] }
 0x1e6   : > { %v1390_v51 = vpop.permute.xlu1 %1389  ;;  %v1264_v49 = vpop.permute.xlu0 %1263  ;;  %v1739_v6 = vsel %vm1725_vm5, %v1706_v39, %v6454_v58  ;;  %v4533_v58 = vld [vmem:[%s5431_s29 + $0x18a] sm:$0xff] }
 0x1e7   : > { %v1802_v60 = vsel %vm1791_vm7, %v1769_v38, %v1390_v51  ;;  %v1770_v24 = vsel %vm1758_vm6, %v1737_v12, %v1264_v49  ;;  %v4503_v49 = vld [vmem:[%s5431_s29 + $0x1a1] sm:$0xff]  ;;  %v8410_v39 = vld [vmem:[#allocation27_spill] sm:$0xff] }
 0x1e8   : > { %1295 = vrot.lane.b32.xlu1 %v4467_v7, %s5367_s22  ;;  %1293 = vrot.lane.b32.xlu0 %v4466_v11, %s5367_s22  ;;  %v4471_v7 = vld [vmem:[%s5431_s29 + $0x1a0] sm:$0xff]  ;;  %v4470_v11 = vld [vmem:[%s5431_s29 + $0x198] sm:$0xff]  ;;  %v8407_v12 = vld [vmem:[#allocation26_spill] sm:$0xff] }
 0x1ea   : > { %v1518_v36 = vpop.permute.xlu1 %1517  ;;  %v1392_v10 = vpop.permute.xlu0 %1391 }
 0x1eb   : > { %v1835_v56 = vsel %vm1824_vm8, %v1802_v60, %v1518_v36  ;;  %v1803_v63 = vsel %vm1791_vm7, %v1770_v24, %v1392_v10  ;;  %v5370_v10 = vmov 0.0   ;;  %v8408_v24 = vld [vmem:[#allocation10_spill] sm:$0xff] }
 0x1ec   : > { %1423 = vrot.lane.b32.xlu1 %v4499_v42, %s5368_s23  ;;  %1421 = vrot.lane.b32.xlu0 %v4498_v30, %s5368_s23  ;;  %v6776_v42 = vld [vmem:[%s5431_s29 + $0x1a2] sm:$0xff]  ;;  %v6779_v30 = vld [vmem:[%s5431_s29 + $0x19a] sm:$0xff]  ;;  %2303 = vst.msk [vmem:[#allocation2 + $0x20] sm:$0xff] %vm1692_vm4, %v5370_v10  ;;  %2298 = vst.msk [vmem:[#allocation2] sm:$0xff] %vm1692_vm4, %v5370_v10 }
 0x1ed   : > { %4670 = vmatprep.mubr.msk.f32.mxu0 %vm1862_vm9, %v1835_v56  ;;  %2304 = vst.msk [vmem:[#allocation2 + $0x28] sm:$0x3] %vm2300_vm10, %v5370_v10  ;;  %2301 = vst.msk [vmem:[#allocation2 + $0x10] sm:$0x3] %vm2300_vm10, %v5370_v10  ;;  %v1710_v56 = vsel %vm1692_vm4, %v8406_v14, %v8405_v59 }
 0x1ee   : > { %v1266_v21 = vpop.permute.xlu1 %1265  ;;  %v1520_v45 = vpop.permute.xlu0 %1519  ;;  %2299 = vst.msk [vmem:[#allocation2 + $0x8] sm:$0xff] %vm1692_vm4, %v5370_v10  ;;  %2302 = vst.msk [vmem:[#allocation2 + $0x18] sm:$0xff] %vm1692_vm4, %v5370_v10 }
 0x1ef   : > { %v1836_v43 = vsel %vm1824_vm8, %v1803_v63, %v1520_v45  ;;  %v1771_v26 = vsel %vm1758_vm6, %v1738_v25, %v1266_v21  ;;  %2305 = vst.msk [vmem:[#allocation2 + $0x30] sm:$0xff] %vm1692_vm4, %v5370_v10  ;;  %2306 = vst.msk [vmem:[#allocation2 + $0x38] sm:$0xff] %vm1692_vm4, %v5370_v10 }
 0x1f0   : > { %1551 = vrot.lane.b32.xlu1 %v4531_v50, %s5369_s26  ;;  %1549 = vrot.lane.b32.xlu0 %v4530_v8, %s5369_s26  ;;  %2307 = vst.msk [vmem:[#allocation2 + $0x40] sm:$0x3] %vm2300_vm10, %v5370_v10  ;;  %2310 = vst.msk [vmem:[#allocation2 + $0x58] sm:$0x3] %vm2300_vm10, %v5370_v10 }
 0x1f1   : > { %4671 = vmatmul.mubr.msk.f32.gmra.mrb[10].mxu0 %vm1862_vm9, %v1836_v43  ;;  %2308 = vst.msk [vmem:[#allocation2 + $0x48] sm:$0xff] %vm1692_vm4, %v5370_v10  ;;  %2309 = vst.msk [vmem:[#allocation2 + $0x50] sm:$0xff] %vm1692_vm4, %v5370_v10 }
 0x1f2   : > { %v1394_v9 = vpop.permute.xlu1 %1393  ;;  %v1268_v55 = vpop.permute.xlu0 %1267  ;;  %2311 = vst.msk [vmem:[#allocation2 + $0x60] sm:$0xff] %vm1692_vm4, %v5370_v10  ;;  %2312 = vst.msk [vmem:[#allocation2 + $0x68] sm:$0xff] %vm1692_vm4, %v5370_v10 }
 0x1f3   : > { %v1804_v40 = vsel %vm1791_vm7, %v1771_v26, %v1394_v9  ;;  %v1772_v1 = vsel %vm1758_vm6, %v1739_v6, %v1268_v55  ;;  %2313 = vst.msk [vmem:[#allocation2 + $0x70] sm:$0x3] %vm2300_vm10, %v5370_v10  ;;  %2316 = vst.msk [vmem:[#allocation2 + $0x88] sm:$0x3] %vm2300_vm10, %v5370_v10 }
 0x1f4   : > { %1171 = vrot.lane.b32.xlu1 %v4531_v50, %s5366_s11  ;;  %1169 = vrot.lane.b32.xlu0 %v4530_v8, %s5366_s11  ;;  %2314 = vst.msk [vmem:[#allocation2 + $0x78] sm:$0xff] %vm1692_vm4, %v5370_v10  ;;  %2315 = vst.msk [vmem:[#allocation2 + $0x80] sm:$0xff] %vm1692_vm4, %v5370_v10  ;;  %v1709_v50 = vsel %vm1692_vm4, %v8408_v24, %v8407_v12  ;;  %v8409_v8 = vld [vmem:[#allocation60_spill] sm:$0xff] }
 0x1f5   : > { %2317 = vst.msk [vmem:[#allocation2 + $0x90] sm:$0xff] %vm1692_vm4, %v5370_v10  ;;  %2318 = vst.msk [vmem:[#allocation2 + $0x98] sm:$0xff] %vm1692_vm4, %v5370_v10  ;;  %v1742_v63 = vsel %vm1725_vm5, %v1709_v50, %v8409_v8  ;;  %v8418_v8 = vld [vmem:[#allocation42_spill] sm:$0xff] }
 0x1f6   : > { %v1522_v3 = vpop.permute.xlu1 %1521  ;;  %v1396_v13 = vpop.permute.xlu0 %1395  ;;  %2319 = vst.msk [vmem:[#allocation2 + $0xa0] sm:$0x3] %vm2300_vm10, %v5370_v10  ;;  %2322 = vst.msk [vmem:[#allocation2 + $0xb8] sm:$0x3] %vm2300_vm10, %v5370_v10 }
 0x1f7   : > { %v1837_v41 = vsel %vm1824_vm8, %v1804_v40, %v1522_v3  ;;  %v1805_v48 = vsel %vm1791_vm7, %v1772_v1, %v1396_v13  ;;  %2320 = vst.msk [vmem:[#allocation2 + $0xa8] sm:$0xff] %vm1692_vm4, %v5370_v10  ;;  %2321 = vst.msk [vmem:[#allocation2 + $0xb0] sm:$0xff] %vm1692_vm4, %v5370_v10  ;;  %v8412_v1 = vld [vmem:[#allocation28_spill] sm:$0xff] }
 0x1f8   : > { %1299 = vrot.lane.b32.xlu1 %v4469_v15, %s5367_s22  ;;  %1297 = vrot.lane.b32.xlu0 %v4468_v34, %s5367_s22  ;;  %2323 = vst.msk [vmem:[#allocation2 + $0xc0] sm:$0xff] %vm1692_vm4, %v5370_v10  ;;  %2324 = vst.msk [vmem:[#allocation2 + $0xc8] sm:$0xff] %vm1692_vm4, %v5370_v10 }
 0x1f9   : > { %4673 = vmatprep.mubr.msk.f32.mxu0 %vm1862_vm9, %v1837_v41  ;;  %2325 = vst.msk [vmem:[#allocation2 + $0xd0] sm:$0x3] %vm2300_vm10, %v5370_v10  ;;  %2328 = vst.msk [vmem:[#allocation2 + $0xe8] sm:$0x3] %vm2300_vm10, %v5370_v10  ;;  %v8411_v41 = vld [vmem:[#allocation11_spill] sm:$0xff] }
 0x1fa   : > { %v1270_v44 = vpop.permute.xlu1 %1269  ;;  %v1524_v0 = vpop.permute.xlu0 %1523  ;;  %2326 = vst.msk [vmem:[#allocation2 + $0xd8] sm:$0xff] %vm1692_vm4, %v5370_v10  ;;  %2327 = vst.msk [vmem:[#allocation2 + $0xe0] sm:$0xff] %vm1692_vm4, %v5370_v10  ;;  %v1712_v6 = vsel %vm1692_vm4, %v8411_v41, %v8410_v39 }
 0x1fb   : > { %v1838_v16 = vsel %vm1824_vm8, %v1805_v48, %v1524_v0  ;;  %v1773_v22 = vsel %vm1758_vm6, %v1740_v54, %v1270_v44  ;;  %2329 = vst.msk [vmem:[#allocation2 + $0xf0] sm:$0xff] %vm1692_vm4, %v5370_v10  ;;  %2330 = vst.msk [vmem:[#allocation2 + $0xf8] sm:$0xff] %vm1692_vm4, %v5370_v10  ;;  %v8413_v48 = vld [vmem:[#allocation12_spill] sm:$0xff]  ;;  %v2418_v0 = vld [vmem:[#allocation2 + $0x1] sm:$0xff] }
 0x1fc   : > { %1427 = vrot.lane.b32.xlu1 %v8401_v35, %s5368_s23  ;;  %1425 = vrot.lane.b32.xlu0 %v8402_v23, %s5368_s23  ;;  %2331 = vst.msk [vmem:[#allocation2 + $0x100] sm:$0x3] %vm2300_vm10, %v5370_v10  ;;  %2334 = vst.msk [vmem:[#allocation2 + $0x118] sm:$0x3] %vm2300_vm10, %v5370_v10  ;;  %v1711_v44 = vsel %vm1692_vm4, %v8413_v48, %v8412_v1 }
 0x1fd   : > { %4674 = vmatmul.mubr.msk.f32.gmra.mrb[12].mxu0 %vm1862_vm9, %v1838_v16  ;;  %2332 = vst.msk [vmem:[#allocation2 + $0x108] sm:$0xff] %vm1692_vm4, %v5370_v10  ;;  %2333 = vst.msk [vmem:[#allocation2 + $0x110] sm:$0xff] %vm1692_vm4, %v5370_v10  ;;  %v2419_v16 = vld [vmem:[#allocation2 + $0x9] sm:$0xff] }
 0x1fe   : > { %v1398_v31 = vpop.permute.xlu1 %1397  ;;  %v1272_v27 = vpop.permute.xlu0 %1271  ;;  %2335 = vst.msk [vmem:[#allocation2 + $0x120] sm:$0xff] %vm1692_vm4, %v5370_v10  ;;  %2336 = vst.msk [vmem:[#allocation2 + $0x128] sm:$0xff] %vm1692_vm4, %v5370_v10 }
 0x1ff   : > { %v1806_v17 = vsel %vm1791_vm7, %v1773_v22, %v1398_v31  ;;  %v1774_v20 = vsel %vm1758_vm6, %v1741_v52, %v1272_v27  ;;  %2337 = vst.msk [vmem:[#allocation2 + $0x130] sm:$0x3] %vm2300_vm10, %v5370_v10  ;;  %2340 = vst.msk [vmem:[#allocation2 + $0x148] sm:$0x3] %vm2300_vm10, %v5370_v10 }
 0x200   : > { %1555 = vrot.lane.b32.xlu1 %v4533_v58, %s5369_s26  ;;  %1553 = vrot.lane.b32.xlu0 %v4532_v4, %s5369_s26  ;;  %2338 = vst.msk [vmem:[#allocation2 + $0x138] sm:$0xff] %vm1692_vm4, %v5370_v10  ;;  %2339 = vst.msk [vmem:[#allocation2 + $0x140] sm:$0xff] %vm1692_vm4, %v5370_v10 }
 0x201   : > { %2341 = vst.msk [vmem:[#allocation2 + $0x150] sm:$0xff] %vm1692_vm4, %v5370_v10  ;;  %2342 = vst.msk [vmem:[#allocation2 + $0x158] sm:$0xff] %vm1692_vm4, %v5370_v10 }
 0x202   : > { %v1526_v53 = vpop.permute.xlu1 %1525  ;;  %v1400_v57 = vpop.permute.xlu0 %1399  ;;  %2343 = vst.msk [vmem:[#allocation2 + $0x160] sm:$0x3] %vm2300_vm10, %v5370_v10  ;;  %2346 = vst.msk [vmem:[#allocation2 + $0x178] sm:$0x3] %vm2300_vm10, %v5370_v10 }
 0x203   : > { %v1839_v2 = vsel %vm1824_vm8, %v1806_v17, %v1526_v53  ;;  %v1807_v19 = vsel %vm1791_vm7, %v1774_v20, %v1400_v57  ;;  %2344 = vst.msk [vmem:[#allocation2 + $0x168] sm:$0xff] %vm1692_vm4, %v5370_v10  ;;  %2345 = vst.msk [vmem:[#allocation2 + $0x170] sm:$0xff] %vm1692_vm4, %v5370_v10  ;;  %v8414_v20 = vld [vmem:[#allocation43_spill] sm:$0xff] }
 0x204   : > { %1175 = vrot.lane.b32.xlu1 %v4533_v58, %s5366_s11  ;;  %1173 = vrot.lane.b32.xlu0 %v4532_v4, %s5366_s11  ;;  %2347 = vst.msk [vmem:[#allocation2 + $0x180] sm:$0xff] %vm1692_vm4, %v5370_v10  ;;  %2348 = vst.msk [vmem:[#allocation2 + $0x188] sm:$0xff] %vm1692_vm4, %v5370_v10  ;;  %v4780_v58 = vpack.i.bf16 %v2419_v16, %v2418_v0  ;;  %v8423_v0 = vld [vmem:[#allocation17_spill] sm:$0xff] }
 0x205   : > { %4676 = vmatprep.mubr.msk.f32.mxu0 %vm1862_vm9, %v1839_v2  ;;  %2349 = vst.msk [vmem:[#allocation2 + $0x190] sm:$0x3] %vm2300_vm10, %v5370_v10  ;;  %2352 = vst.msk [vmem:[#allocation2 + $0x1a8] sm:$0x3] %vm2300_vm10, %v5370_v10 }
 0x206   : > { %v6761_v5 = vpop.permute.xlu1 %1147  ;;  %v1528_v61 = vpop.permute.xlu0 %1527  ;;  %2350 = vst.msk [vmem:[#allocation2 + $0x198] sm:$0xff] %vm1692_vm4, %v5370_v10  ;;  %2351 = vst.msk [vmem:[#allocation2 + $0x1a0] sm:$0xff] %vm1692_vm4, %v5370_v10 }
 0x207   : > { %v1840_v51 = vsel %vm1824_vm8, %v1807_v19, %v1528_v61  ;;  %v1743_v21 = vsel %vm1725_vm5, %v1710_v56, %v6761_v5  ;;  %v8416_v19 = vld [vmem:[#allocation29_spill] sm:$0xff]  ;;  %v8417_v5 = vld [vmem:[#allocation14_spill] sm:$0xff] }
 0x208   : > { %1303 = vrot.lane.b32.xlu1 %v4471_v7, %s5367_s22  ;;  %1301 = vrot.lane.b32.xlu0 %v4470_v11, %s5367_s22  ;;  %v8415_v7 = vld [vmem:[#allocation13_spill] sm:$0xff]  ;;  %v1713_v61 = vsel %vm1692_vm4, %v8417_v5, %v8416_v19  ;;  %v8427_v19 = vld [vmem:[#allocation19_spill] sm:$0xff] }
 0x209   : > { %4677 = vmatmul.mubr.msk.f32.gmra.mrb[14].mxu0 %vm1862_vm9, %v1840_v51  ;;  %v1714_v11 = vsel %vm1692_vm4, %v8415_v7, %v8414_v20 }
 0x20a   : > { %v6769_v29 = vpop.permute.xlu1 %1275  ;;  %v6771_v38 = vpop.permute.xlu0 %1273 }
 0x20b   : > { %v1776_v45 = vsel %vm1758_vm6, %v1743_v21, %v6769_v29  ;;  %v1775_v43 = vsel %vm1758_vm6, %v1742_v63, %v6771_v38  ;;  %v8419_v63 = vld [vmem:[#allocation15_spill] sm:$0xff] }
 0x20c   : > { %1431 = vrot.lane.b32.xlu1 %v4503_v49, %s5368_s23  ;;  %1429 = vrot.lane.b32.xlu0 %v4502_v46, %s5368_s23  ;;  %v1716_v21 = vsel %vm1692_vm4, %v8419_v63, %v8418_v8  ;;  %s5374_s23 = smov 96  }
 0x20e   : > { %v6781_v60 = vpop.permute.xlu1 %1403  ;;  %v6783_v36 = vpop.permute.xlu0 %1401 }
 0x20f   : > { %v1809_v9 = vsel %vm1791_vm7, %v1776_v45, %v6781_v60  ;;  %v1808_v55 = vsel %vm1791_vm7, %v1775_v43, %v6783_v36  ;;  %v8420_v45 = vld [vmem:[#allocation46_spill] sm:$0xff]  ;;  %v8421_v43 = vld [vmem:[#allocation16_spill] sm:$0xff] }
 0x210   : > { %1559 = vrot.lane.b32.xlu1 %v6776_v42, %s5369_s26  ;;  %1557 = vrot.lane.b32.xlu0 %v6779_v30, %s5369_s26 }
 0x212   : > { %v1532_v37 = vpop.permute.xlu1 %1531  ;;  %v1530_v32 = vpop.permute.xlu0 %1529 }
 0x213   : > { %v1842_v25 = vsel %vm1824_vm8, %v1809_v9, %v1532_v37  ;;  %v1841_v26 = vsel %vm1824_vm8, %v1808_v55, %v1530_v32  ;;  %v1715_v9 = vsel %vm1692_vm4, %v8421_v43, %v8420_v45  ;;  %v8431_v45 = vld [vmem:[#allocation21_spill] sm:$0xff] }
 0x214   : > { %4679 = vmatprep.mubr.msk.f32.mxu0 %vm1862_vm9, %v1841_v26  ;;  %4781 = vrot.lane.b32.xlu0 %v4780_v58, %s5365_s10 }
 0x215   : > { %4680 = vmatmul.mubr.msk.f32.gmra.mrb[16].mxu0 %vm1862_vm9, %v1842_v25 }
 0x216   : > { %v1152_v15 = vpop.permute.xlu1 %1151  ;;  %v1150_v34 = vpop.permute.xlu0 %1149 }
 0x217   : > { %v1745_v35 = vsel %vm1725_vm5, %v1712_v6, %v1152_v15  ;;  %v1744_v23 = vsel %vm1725_vm5, %v1711_v44, %v1150_v34  ;;  %v8422_v44 = vld [vmem:[#allocation45_spill] sm:$0xff] }
 0x218   : > { %v1718_v16 = vsel %vm1692_vm4, %v8423_v0, %v8422_v44 }
 0x21a   : > { %v1280_v40 = vpop.permute.xlu1 %1279  ;;  %v1278_v3 = vpop.permute.xlu0 %1277 }
 0x21b   : > { %v1778_v4 = vsel %vm1758_vm6, %v1745_v35, %v1280_v40  ;;  %v1777_v31 = vsel %vm1758_vm6, %v1744_v23, %v1278_v3  ;;  %v8424_v35 = vld [vmem:[#allocation48_spill] sm:$0xff]  ;;  %v8425_v23 = vld [vmem:[#allocation18_spill] sm:$0xff] }
 0x21c   : > { %v1717_v58 = vsel %vm1692_vm4, %v8425_v23, %v8424_v35  ;;  %v8435_v35 = vld [vmem:[#allocation23_spill] sm:$0xff] }
 0x21e   : > { %v1408_v13 = vpop.permute.xlu1 %1407  ;;  %v1406_v62 = vpop.permute.xlu0 %1405 }
 0x21f   : > { %v1811_v27 = vsel %vm1791_vm7, %v1778_v4, %v1408_v13  ;;  %v1810_v33 = vsel %vm1791_vm7, %v1777_v31, %v1406_v62 }
 0x222   : > { %v1536_v54 = vpop.permute.xlu1 %1535  ;;  %v1534_v22 = vpop.permute.xlu0 %1533 }
 0x223   : > { %v1844_v17 = vsel %vm1824_vm8, %v1811_v27, %v1536_v54  ;;  %v1843_v53 = vsel %vm1824_vm8, %v1810_v33, %v1534_v22 }
 0x224   : > { %4682 = vmatprep.mubr.msk.f32.mxu0 %vm1862_vm9, %v1843_v53 }
 0x225   : > { %4683 = vmatmul.mubr.msk.f32.gmra.mrb[18].mxu0 %vm1862_vm9, %v1844_v17 }
 0x226   : > { %v1156_v57 = vpop.permute.xlu1 %1155  ;;  %v1154_v47 = vpop.permute.xlu0 %1153 }
 0x227   : > { %v1747_v51 = vsel %vm1725_vm5, %v1714_v11, %v1156_v57  ;;  %v1746_v49 = vsel %vm1725_vm5, %v1713_v61, %v1154_v47  ;;  %v8426_v11 = vld [vmem:[#allocation47_spill] sm:$0xff]  ;;  %v8428_v61 = vld [vmem:[#allocation49_spill] sm:$0xff] }
 0x228   : > { %v1720_v5 = vsel %vm1692_vm4, %v8427_v19, %v8426_v11 }
 0x22a   : > { %v1284_v28 = vpop.permute.xlu1 %1283  ;;  %v1282_v2 = vpop.permute.xlu0 %1281 }
 0x22b   : > { %v1780_v46 = vsel %vm1758_vm6, %v1747_v51, %v1284_v28  ;;  %v1779_v29 = vsel %vm1758_vm6, %v1746_v49, %v1282_v2  ;;  %v8429_v51 = vld [vmem:[#allocation20_spill] sm:$0xff] }
 0x22c   : > { %v1719_v49 = vsel %vm1692_vm4, %v8429_v51, %v8428_v61 }
 0x22e   : > { %v1412_v18 = vpop.permute.xlu1 %1411  ;;  %v1410_v52 = vpop.permute.xlu0 %1409 }
 0x22f   : > { %v1813_v38 = vsel %vm1791_vm7, %v1780_v46, %v1412_v18  ;;  %v1812_v42 = vsel %vm1791_vm7, %v1779_v29, %v1410_v52 }
 0x232   : > { %v1540_v30 = vpop.permute.xlu1 %1539  ;;  %v1538_v60 = vpop.permute.xlu0 %1537 }
 0x233   : > { %v1846_v36 = vsel %vm1824_vm8, %v1813_v38, %v1540_v30  ;;  %v1845_v10 = vsel %vm1824_vm8, %v1812_v42, %v1538_v60 }
 0x234   : > { %4685 = vmatprep.mubr.msk.f32.mxu0 %vm1862_vm9, %v1845_v10 }
 0x235   : > { %4686 = vmatmul.mubr.msk.f32.gmra.mrb[20].mxu0 %vm1862_vm9, %v1846_v36 }
 0x236   : > { %v1160_v59 = vpop.permute.xlu1 %1159  ;;  %v1158_v14 = vpop.permute.xlu0 %1157 }
 0x237   : > { %v1749_v55 = vsel %vm1725_vm5, %v1716_v21, %v1160_v59  ;;  %v1748_v37 = vsel %vm1725_vm5, %v1715_v9, %v1158_v14  ;;  %v8430_v21 = vld [vmem:[#allocation55_spill] sm:$0xff]  ;;  %v8432_v9 = vld [vmem:[#allocation56_spill] sm:$0xff] }
 0x238   : > { %v1722_v43 = vsel %vm1692_vm4, %v8431_v45, %v8430_v21 }
 0x23a   : > { %v1288_v56 = vpop.permute.xlu1 %1287  ;;  %v1286_v12 = vpop.permute.xlu0 %1285 }
 0x23b   : > { %v1782_v32 = vsel %vm1758_vm6, %v1749_v55, %v1288_v56  ;;  %v1781_v25 = vsel %vm1758_vm6, %v1748_v37, %v1286_v12  ;;  %v8433_v55 = vld [vmem:[#allocation22_spill] sm:$0xff] }
 0x23c   : > { %v1721_v37 = vsel %vm1692_vm4, %v8433_v55, %v8432_v9 }
 0x23e   : > { %v1416_v24 = vpop.permute.xlu1 %1415  ;;  %v1414_v50 = vpop.permute.xlu0 %1413 }
 0x23f   : > { %v1815_v26 = vsel %vm1791_vm7, %v1782_v32, %v1416_v24  ;;  %v1814_v15 = vsel %vm1791_vm7, %v1781_v25, %v1414_v50 }
 0x242   : > { %v1544_v34 = vpop.permute.xlu1 %1543  ;;  %v1542_v40 = vpop.permute.xlu0 %1541 }
 0x243   : > { %v1848_v3 = vsel %vm1824_vm8, %v1815_v26, %v1544_v34  ;;  %v1847_v13 = vsel %vm1824_vm8, %v1814_v15, %v1542_v40 }
 0x244   : > { %4688 = vmatprep.mubr.msk.f32.mxu0 %vm1862_vm9, %v1847_v13 }
 0x245   : > { %4689 = vmatmul.mubr.msk.f32.gmra.mrb[22].mxu0 %vm1862_vm9, %v1848_v3 }
 0x246   : > { %v1164_v62 = vpop.permute.xlu1 %1163  ;;  %v1162_v39 = vpop.permute.xlu0 %1161 }
 0x247   : > { %v1751_v4 = vsel %vm1725_vm5, %v1718_v16, %v1164_v62  ;;  %v1750_v31 = vsel %vm1725_vm5, %v1717_v58, %v1162_v39  ;;  %v8434_v16 = vld [vmem:[#allocation57_spill] sm:$0xff]  ;;  %v8436_v58 = vld [vmem:[#allocation58_spill] sm:$0xff] }
 0x248   : > { %v1724_v23 = vsel %vm1692_vm4, %v8435_v35, %v8434_v16 }
 0x24a   : > { %v1292_v41 = vpop.permute.xlu1 %1291  ;;  %v1290_v6 = vpop.permute.xlu0 %1289 }
 0x24b   : > { %v1784_v27 = vsel %vm1758_vm6, %v1751_v4, %v1292_v41  ;;  %v1783_v33 = vsel %vm1758_vm6, %v1750_v31, %v1290_v6  ;;  %v8437_v4 = vld [vmem:[#allocation24_spill] sm:$0xff] }
 0x24c   : > { %v1723_v31 = vsel %vm1692_vm4, %v8437_v4, %v8436_v58 }
 0x24e   : > { %v1420_v1 = vpop.permute.xlu1 %1419  ;;  %v1418_v48 = vpop.permute.xlu0 %1417 }
 0x24f   : > { %v1817_v54 = vsel %vm1791_vm7, %v1784_v27, %v1420_v1  ;;  %v1816_v22 = vsel %vm1791_vm7, %v1783_v33, %v1418_v48 }
 0x252   : > { %v1548_v17 = vpop.permute.xlu1 %1547  ;;  %v1546_v53 = vpop.permute.xlu0 %1545 }
 0x253   : > { %v1850_v57 = vsel %vm1824_vm8, %v1817_v54, %v1548_v17  ;;  %v1849_v47 = vsel %vm1824_vm8, %v1816_v22, %v1546_v53 }
 0x254   : > { %4691 = vmatprep.mubr.msk.f32.mxu0 %vm1862_vm9, %v1849_v47 }
 0x255   : > { %4692 = vmatmul.mubr.msk.f32.gmra.mrb[24].mxu0 %vm1862_vm9, %v1850_v57 }
 0x256   : > { %v1168_v28 = vpop.permute.xlu1 %1167  ;;  %v1166_v2 = vpop.permute.xlu0 %1165 }
 0x257   : > { %v1753_v46 = vsel %vm1725_vm5, %v1720_v5, %v1168_v28  ;;  %v1752_v29 = vsel %vm1725_vm5, %v1719_v49, %v1166_v2 }
 0x25a   : > { %v1296_v18 = vpop.permute.xlu1 %1295  ;;  %v1294_v52 = vpop.permute.xlu0 %1293 }
 0x25b   : > { %v1786_v38 = vsel %vm1758_vm6, %v1753_v46, %v1296_v18  ;;  %v1785_v42 = vsel %vm1758_vm6, %v1752_v29, %v1294_v52  ;;  %v6981_v18 = vld [vmem:[%s8194_s2] ss:$0 sm:$0xff] }
 0x25e   : > { %v1424_v20 = vpop.permute.xlu1 %1423  ;;  %v1422_v7 = vpop.permute.xlu0 %1421 }
 0x25f   : > { %v1819_v30 = vsel %vm1791_vm7, %v1786_v38, %v1424_v20  ;;  %v1818_v60 = vsel %vm1791_vm7, %v1785_v42, %v1422_v7  ;;  %v6986_v20 = vld [vmem:[%s8195_s3] ss:$0 sm:$0xff] }
 0x262   : > { %v1552_v36 = vpop.permute.xlu1 %1551  ;;  %v1550_v10 = vpop.permute.xlu0 %1549 }
 0x263   : > { %v1852_v59 = vsel %vm1824_vm8, %v1819_v30, %v1552_v36  ;;  %v1851_v14 = vsel %vm1824_vm8, %v1818_v60, %v1550_v10 }
 0x264   : > { %4694 = vmatprep.mubr.msk.f32.mxu0 %vm1862_vm9, %v1851_v14 }
 0x265   : > { %4695 = vmatmul.mubr.msk.f32.gmra.mrb[26].mxu0 %vm1862_vm9, %v1852_v59 }
 0x266   : > { %v1172_v56 = vpop.permute.xlu1 %1171  ;;  %v1170_v12 = vpop.permute.xlu0 %1169 }
 0x267   : > { %v1755_v32 = vsel %vm1725_vm5, %v1722_v43, %v1172_v56  ;;  %v1754_v25 = vsel %vm1725_vm5, %v1721_v37, %v1170_v12 }
 0x26a   : > { %v1300_v24 = vpop.permute.xlu1 %1299  ;;  %v1298_v50 = vpop.permute.xlu0 %1297 }
 0x26b   : > { %v1788_v26 = vsel %vm1758_vm6, %v1755_v32, %v1300_v24  ;;  %v1787_v15 = vsel %vm1758_vm6, %v1754_v25, %v1298_v50 }
 0x26e   : > { %v1428_v8 = vpop.permute.xlu1 %1427  ;;  %v1426_v63 = vpop.permute.xlu0 %1425 }
 0x26f   : > { %v1821_v34 = vsel %vm1791_vm7, %v1788_v26, %v1428_v8  ;;  %v1820_v40 = vsel %vm1791_vm7, %v1787_v15, %v1426_v63 }
 0x272   : > { %v1556_v3 = vpop.permute.xlu1 %1555  ;;  %v1554_v13 = vpop.permute.xlu0 %1553 }
 0x273   : > { %v1854_v62 = vsel %vm1824_vm8, %v1821_v34, %v1556_v3  ;;  %v1853_v39 = vsel %vm1824_vm8, %v1820_v40, %v1554_v13 }
 0x274   : > { %4697 = vmatprep.mubr.msk.f32.mxu0 %vm1862_vm9, %v1853_v39 }
 0x275   : > { %4698 = vmatmul.mubr.msk.f32.gmra.mrb[28].mxu0 %vm1862_vm9, %v1854_v62 }
 0x276   : > { %v1176_v41 = vpop.permute.xlu1 %1175  ;;  %v1174_v6 = vpop.permute.xlu0 %1173 }
 0x277   : > { %v1757_v27 = vsel %vm1725_vm5, %v1724_v23, %v1176_v41  ;;  %v1756_v33 = vsel %vm1725_vm5, %v1723_v31, %v1174_v6 }
 0x27a   : > { %v1304_v1 = vpop.permute.xlu1 %1303  ;;  %v1302_v48 = vpop.permute.xlu0 %1301 }
 0x27b   : > { %v1790_v54 = vsel %vm1758_vm6, %v1757_v27, %v1304_v1  ;;  %v1789_v22 = vsel %vm1758_vm6, %v1756_v33, %v1302_v48 }
 0x27e   : > { %v1432_v44 = vpop.permute.xlu1 %1431  ;;  %v1430_v0 = vpop.permute.xlu0 %1429 }
 0x27f   : > { %v1823_v17 = vsel %vm1791_vm7, %v1790_v54, %v1432_v44  ;;  %v1822_v53 = vsel %vm1791_vm7, %v1789_v22, %v1430_v0 }
 0x282   : > { %v1560_v57 = vpop.permute.xlu1 %1559  ;;  %v1558_v47 = vpop.permute.xlu0 %1557 }
 0x283   : > { %v1856_v28 = vsel %vm1824_vm8, %v1823_v17, %v1560_v57  ;;  %v1855_v2 = vsel %vm1824_vm8, %v1822_v53, %v1558_v47 }
 0x284   : > { %4700 = vmatprep.mubr.msk.f32.mxu0 %vm1862_vm9, %v1855_v2 }
 0x285   : > { %4701 = vmatmul.mubr.msk.f32.gmra.mrb[30].mxu0 %vm1862_vm9, %v1856_v28 }
 0x288   : > { %v4657_v52 = vpop.f32.mrb[0].mxu0 }
 0x289   : > { %v2196_v7 = vmul.f32 %v4657_v52, %v6981_v18  ;;  %v2029_v11 = vpop.f32.mrb[1].mxu0 }
 0x28a   : > { %v2195_v19 = vmul.f32 %v6981_v18, %v2029_v11 }
 0x28b   : > { %v2235_v5 = vadd.f32 %v6986_v20, %v2196_v7 }
 0x28c   : > { %v2234_v61 = vadd.f32 %v6986_v20, %v2195_v19 }
 0x28d   : > { %v2267_v51 = vmax.f32 %v2235_v5, 0.0 }
 0x28e   : > { %v2266_v49 = vmax.f32 %v2234_v61, 0.0 }
 0x28f   : > { %2355 = vst.msk [vmem:[#allocation2 + $0x21] sm:$0xff] %vm1692_vm4, %v2267_v51 }
 0x290   : > { %2354 = vst.msk [vmem:[#allocation2 + $0x19] sm:$0xff] %vm1692_vm4, %v2266_v49 }
 0x294   : > { %v4660_v46 = vpop.f32.mrb[2].mxu0 }
 0x295   : > { %v2198_v29 = vmul.f32 %v4660_v46, %v6981_v18  ;;  %v2039_v38 = vpop.f32.mrb[3].mxu0 }
 0x296   : > { %v2197_v42 = vmul.f32 %v6981_v18, %v2039_v38  ;;  %v6996_v30 = vld [vmem:[#allocation2 + $0x21] sm:$0xff] }
 0x297   : > { %v2237_v60 = vadd.f32 %v6986_v20, %v2198_v29  ;;  %v6999_v36 = vld [vmem:[#allocation2 + $0x19] sm:$0xff] }
 0x298   : > { %v2236_v10 = vadd.f32 %v6986_v20, %v2197_v42  ;;  %v4785_v59 = vpack.i.bf16 %v6996_v30, %v6999_v36 }
 0x299   : > { %v2269_v14 = vmax.f32 %v2237_v60, 0.0 }
 0x29a   : > { %v2268_v56 = vmax.f32 %v2236_v10, 0.0  ;;  %4786 = vrot.lane.b32.xlu1 %v4785_v59, %s5365_s10 }
 0x29b   : > { %2357 = vst.msk [vmem:[#allocation2 + $0x39] sm:$0xff] %vm1692_vm4, %v2269_v14 }
 0x29c   : > { %2356 = vst.msk [vmem:[#allocation2 + $0x31] sm:$0xff] %vm1692_vm4, %v2268_v56 }
 0x2a0   : > { %v4663_v12 = vpop.f32.mrb[4].mxu0 }
 0x2a1   : > { %v2200_v24 = vmul.f32 %v4663_v12, %v6981_v18  ;;  %v2049_v50 = vpop.f32.mrb[5].mxu0 }
 0x2a2   : > { %v2199_v8 = vmul.f32 %v6981_v18, %v2049_v50  ;;  %v7009_v63 = vld [vmem:[#allocation2 + $0x39] sm:$0xff] }
 0x2a3   : > { %v2239_v21 = vadd.f32 %v6986_v20, %v2200_v24  ;;  %v7012_v45 = vld [vmem:[#allocation2 + $0x32] sm:$0xff] }
 0x2a4   : > { %v7014_v43 = vld [vmem:[#allocation2 + $0x31] sm:$0xff]  ;;  %v2238_v9 = vadd.f32 %v6986_v20, %v2199_v8  ;;  %4571 = vmatprep.mubr.msk.f32.mxu0 %vm1692_vm4, %v7012_v45 }
 0x2a5   : > { %v4790_v55 = vpack.i.bf16 %v7009_v63, %v7014_v43  ;;  %v2271_v37 = vmax.f32 %v2239_v21, 0.0 }
 0x2a6   : > { %v2270_v32 = vmax.f32 %v2238_v9, 0.0 }
 0x2a7   : > { %4791 = vrot.lane.b32.xlu0 %v4790_v55, %s5365_s10  ;;  %2359 = vst.msk [vmem:[#allocation2 + $0x51] sm:$0xff] %vm1692_vm4, %v2271_v37 }
 0x2a8   : > { %2358 = vst.msk [vmem:[#allocation2 + $0x49] sm:$0xff] %vm1692_vm4, %v2270_v32 }
 0x2ac   : > { %v4666_v25 = vpop.f32.mrb[6].mxu0 }
 0x2ad   : > { %v2202_v26 = vmul.f32 %v4666_v25, %v6981_v18  ;;  %v2059_v15 = vpop.f32.mrb[7].mxu0 }
 0x2ae   : > { %v2201_v34 = vmul.f32 %v6981_v18, %v2059_v15  ;;  %v7026_v40 = vld [vmem:[#allocation2 + $0x51] sm:$0xff] }
 0x2af   : > { %v2241_v3 = vadd.f32 %v6986_v20, %v2202_v26  ;;  %v2424_v13 = vld [vmem:[#allocation2 + $0x49] sm:$0xff] }
 0x2b0   : > { %v2240_v62 = vadd.f32 %v6986_v20, %v2201_v34  ;;  %v4795_v39 = vpack.i.bf16 %v7026_v40, %v2424_v13 }
 0x2b1   : > { %v2273_v41 = vmax.f32 %v2241_v3, 0.0 }
 0x2b2   : > { %v2272_v6 = vmax.f32 %v2240_v62, 0.0  ;;  %4796 = vrot.lane.b32.xlu1 %v4795_v39, %s5365_s10 }
 0x2b3   : > { %2361 = vst.msk [vmem:[#allocation2 + $0x69] sm:$0xff] %vm1692_vm4, %v2273_v41 }
 0x2b4   : > { %2360 = vst.msk [vmem:[#allocation2 + $0x61] sm:$0xff] %vm1692_vm4, %v2272_v6 }
 0x2b8   : > { %v4669_v1 = vpop.f32.mrb[8].mxu0 }
 0x2b9   : > { %v2204_v48 = vmul.f32 %v4669_v1, %v6981_v18  ;;  %v2069_v44 = vpop.f32.mrb[9].mxu0 }
 0x2ba   : > { %v2203_v0 = vmul.f32 %v6981_v18, %v2069_v44  ;;  %v2427_v16 = vld [vmem:[#allocation2 + $0x69] sm:$0xff] }
 0x2bb   : > { %v2243_v35 = vadd.f32 %v6986_v20, %v2204_v48  ;;  %v2426_v23 = vld [vmem:[#allocation2 + $0x61] sm:$0xff] }
 0x2bc   : > { %v2242_v58 = vadd.f32 %v6986_v20, %v2203_v0  ;;  %v4800_v4 = vpack.i.bf16 %v2427_v16, %v2426_v23 }
 0x2bd   : > { %v2275_v31 = vmax.f32 %v2243_v35, 0.0 }
 0x2be   : > { %v2274_v27 = vmax.f32 %v2242_v58, 0.0  ;;  %4801 = vrot.lane.b32.xlu0 %v4800_v4, %s5365_s10 }
 0x2bf   : > { %2363 = vst.msk [vmem:[#allocation2 + $0x81] sm:$0xff] %vm1692_vm4, %v2275_v31 }
 0x2c0   : > { %2362 = vst.msk [vmem:[#allocation2 + $0x79] sm:$0xff] %vm1692_vm4, %v2274_v27 }
 0x2c4   : > { %v4672_v33 = vpop.f32.mrb[10].mxu0 }
 0x2c5   : > { %v2206_v54 = vmul.f32 %v4672_v33, %v6981_v18  ;;  %v2079_v22 = vpop.f32.mrb[11].mxu0 }
 0x2c6   : > { %v2205_v17 = vmul.f32 %v6981_v18, %v2079_v22  ;;  %v2429_v53 = vld [vmem:[#allocation2 + $0x81] sm:$0xff] }
 0x2c7   : > { %v2245_v57 = vadd.f32 %v6986_v20, %v2206_v54  ;;  %v2428_v47 = vld [vmem:[#allocation2 + $0x79] sm:$0xff] }
 0x2c8   : > { %v2244_v28 = vadd.f32 %v6986_v20, %v2205_v17  ;;  %v4805_v2 = vpack.i.bf16 %v2429_v53, %v2428_v47 }
 0x2c9   : > { %v2277_v52 = vmax.f32 %v2245_v57, 0.0 }
 0x2ca   : > { %v2276_v7 = vmax.f32 %v2244_v28, 0.0  ;;  %4806 = vrot.lane.b32.xlu1 %v4805_v2, %s5365_s10 }
 0x2cb   : > { %2365 = vst.msk [vmem:[#allocation2 + $0x99] sm:$0xff] %vm1692_vm4, %v2277_v52 }
 0x2cc   : > { %2364 = vst.msk [vmem:[#allocation2 + $0x91] sm:$0xff] %vm1692_vm4, %v2276_v7 }
 0x2d0   : > { %v4675_v11 = vpop.f32.mrb[12].mxu0 }
 0x2d1   : > { %v2208_v19 = vmul.f32 %v4675_v11, %v6981_v18  ;;  %v2089_v5 = vpop.f32.mrb[13].mxu0 }
 0x2d2   : > { %v2207_v61 = vmul.f32 %v6981_v18, %v2089_v5  ;;  %v7050_v51 = vld [vmem:[#allocation2 + $0x99] sm:$0xff] }
 0x2d3   : > { %v2247_v49 = vadd.f32 %v6986_v20, %v2208_v19  ;;  %v2430_v46 = vld [vmem:[#allocation2 + $0x91] sm:$0xff] }
 0x2d4   : > { %v2246_v29 = vadd.f32 %v6986_v20, %v2207_v61  ;;  %v4810_v38 = vpack.i.bf16 %v7050_v51, %v2430_v46 }
 0x2d5   : > { %v2279_v42 = vmax.f32 %v2247_v49, 0.0 }
 0x2d6   : > { %v2278_v60 = vmax.f32 %v2246_v29, 0.0  ;;  %4811 = vrot.lane.b32.xlu0 %v4810_v38, %s5365_s10 }
 0x2d7   : > { %2367 = vst.msk [vmem:[#allocation2 + $0xb1] sm:$0xff] %vm1692_vm4, %v2279_v42 }
 0x2d8   : > { %2366 = vst.msk [vmem:[#allocation2 + $0xa9] sm:$0xff] %vm1692_vm4, %v2278_v60 }
 0x2dc   : > { %v4678_v10 = vpop.f32.mrb[14].mxu0 }
 0x2dd   : > { %v2210_v59 = vmul.f32 %v4678_v10, %v6981_v18  ;;  %v2099_v14 = vpop.f32.mrb[15].mxu0 }
 0x2de   : > { %v2209_v56 = vmul.f32 %v6981_v18, %v2099_v14  ;;  %v7060_v12 = vld [vmem:[#allocation2 + $0xb2] sm:$0xff] }
 0x2df   : > { %v2433_v24 = vld [vmem:[#allocation2 + $0xb1] sm:$0xff]  ;;  %v2249_v50 = vadd.f32 %v6986_v20, %v2210_v59  ;;  %4582 = vmatprep.mubr.msk.f32.mxu1 %vm1692_vm4, %v7060_v12  ;;  %v7065_v8 = vld [vmem:[#allocation2 + $0xa9] sm:$0xff] }
 0x2e0   : > { %v2248_v21 = vadd.f32 %v6986_v20, %v2209_v56  ;;  %v4815_v9 = vpack.i.bf16 %v2433_v24, %v7065_v8  ;;  %v4895_v55 = vpack.i.bf16 %v7065_v8, %v7050_v51 }
 0x2e1   : > { %v2281_v37 = vmax.f32 %v2249_v50, 0.0 }
 0x2e2   : > { %v2280_v32 = vmax.f32 %v2248_v21, 0.0  ;;  %4816 = vrot.lane.b32.xlu1 %v4815_v9, %s5365_s10 }
 0x2e3   : > { %2369 = vst.msk [vmem:[#allocation2 + $0xc9] sm:$0xff] %vm1692_vm4, %v2281_v37 }
 0x2e4   : > { %2368 = vst.msk [vmem:[#allocation2 + $0xc1] sm:$0xff] %vm1692_vm4, %v2280_v32 }
 0x2e8   : > { %v4681_v25 = vpop.f32.mrb[16].mxu0 }
 0x2e9   : > { %v2212_v26 = vmul.f32 %v4681_v25, %v6981_v18  ;;  %v2109_v15 = vpop.f32.mrb[17].mxu0 }
 0x2ea   : > { %v2211_v34 = vmul.f32 %v6981_v18, %v2109_v15  ;;  %v2435_v3 = vld [vmem:[#allocation2 + $0xc9] sm:$0xff] }
 0x2eb   : > { %v2251_v13 = vadd.f32 %v6986_v20, %v2212_v26  ;;  %v2434_v62 = vld [vmem:[#allocation2 + $0xc1] sm:$0xff]  ;;  %v7308_v51 = vld [vmem:[#allocation2 + $0xca] sm:$0xff] }
 0x2ec   : > { %v2250_v39 = vadd.f32 %v6986_v20, %v2211_v34  ;;  %v4820_v41 = vpack.i.bf16 %v2435_v3, %v2434_v62  ;;  %v7078_v6 = vpack.i.bf16 %v2434_v62, %v2433_v24 }
 0x2ed   : > { %v2283_v1 = vmax.f32 %v2251_v13, 0.0 }
 0x2ee   : > { %v2282_v48 = vmax.f32 %v2250_v39, 0.0  ;;  %4821 = vrot.lane.b32.xlu0 %v4820_v41, %s5365_s10 }
 0x2ef   : > { %2371 = vst.msk [vmem:[#allocation2 + $0xe1] sm:$0xff] %vm1692_vm4, %v2283_v1 }
 0x2f0   : > { %2370 = vst.msk [vmem:[#allocation2 + $0xd9] sm:$0xff] %vm1692_vm4, %v2282_v48 }
 0x2f6   : > { %v2437_v44 = vld [vmem:[#allocation2 + $0xe1] sm:$0xff] }
 0x2f7   : > { %v2436_v0 = vld [vmem:[#allocation2 + $0xd9] sm:$0xff] }
 0x2f8   : > { %v4684_v16 = vpop.f32.mrb[18].mxu0  ;;  %v4825_v35 = vpack.i.bf16 %v2437_v44, %v2436_v0  ;;  %v7083_v23 = vpack.i.bf16 %v2436_v0, %v2435_v3 }
 0x2f9   : > { %v2214_v58 = vmul.f32 %v4684_v16, %v6981_v18  ;;  %v2119_v4 = vpop.f32.mrb[19].mxu0 }
 0x2fa   : > { %v2213_v31 = vmul.f32 %v6981_v18, %v2119_v4  ;;  %4826 = vrot.lane.b32.xlu1 %v4825_v35, %s5365_s10 }
 0x2fb   : > { %v2253_v27 = vadd.f32 %v6986_v20, %v2214_v58 }
 0x2fc   : > { %v2252_v33 = vadd.f32 %v6986_v20, %v2213_v31 }
 0x2fd   : > { %v2285_v54 = vmax.f32 %v2253_v27, 0.0 }
 0x2fe   : > { %v2284_v22 = vmax.f32 %v2252_v33, 0.0  ;;  %v5371_v33 = vmov 0.0|0.0  }
 0x2ff   : > { %2373 = vst.msk [vmem:[#allocation2 + $0xf9] sm:$0xff] %vm1692_vm4, %v2285_v54  ;;  %4738 = vmatprep.subr.bf16.mxu1 %v5371_v33  ;;  %v3800_v54 = vld [vmem:[%s8196_s4] sm:$0xff]  ;;  %4711 = vmatprep.subr.bf16.mxu0 %v5371_v33 }
 0x300   : > { %2372 = vst.msk [vmem:[#allocation2 + $0xf1] sm:$0xff] %vm1692_vm4, %v2284_v22  ;;  %v3801_v22 = vld [vmem:[%s8196_s4 + $0x8] sm:$0xff] }
 0x306   : > { %v2439_v17 = vld [vmem:[#allocation2 + $0xf9] sm:$0xff] }
 0x307   : > { %v2438_v53 = vld [vmem:[#allocation2 + $0xf1] sm:$0xff] }
 0x308   : > { %v4687_v57 = vpop.f32.mrb[20].mxu0  ;;  %v4830_v47 = vpack.i.bf16 %v2439_v17, %v2438_v53  ;;  %v7092_v28 = vpack.i.bf16 %v2438_v53, %v2437_v44 }
 0x309   : > { %v2216_v2 = vmul.f32 %v4687_v57, %v6981_v18  ;;  %v2129_v52 = vpop.f32.mrb[21].mxu0 }
 0x30a   : > { %v2215_v7 = vmul.f32 %v6981_v18, %v2129_v52  ;;  %4831 = vrot.lane.b32.xlu0 %v4830_v47, %s5365_s10  ;;  %v2450_v47 = vld [vmem:[#allocation2 + $0x2] sm:$0xff] }
 0x30b   : > { %v2255_v11 = vadd.f32 %v6986_v20, %v2216_v2  ;;  %v2451_v2 = vld [vmem:[#allocation2 + $0xa] sm:$0xff] }
 0x30c   : > { %v2254_v19 = vadd.f32 %v6986_v20, %v2215_v7 }
 0x30d   : > { %v2287_v5 = vmax.f32 %v2255_v11, 0.0  ;;  %v3802_v11 = vld [vmem:[%s8196_s4 + $0x10] sm:$0xff] }
 0x30e   : > { %v2286_v61 = vmax.f32 %v2254_v19, 0.0  ;;  %v3803_v19 = vld [vmem:[%s8196_s4 + $0x18] sm:$0xff] }
 0x30f   : > { %2375 = vst.msk [vmem:[#allocation2 + $0x111] sm:$0xff] %vm1692_vm4, %v2287_v5 }
 0x310   : > { %2374 = vst.msk [vmem:[#allocation2 + $0x109] sm:$0xff] %vm1692_vm4, %v2286_v61 }
 0x316   : > { %v7101_v49 = vld [vmem:[#allocation2 + $0x111] sm:$0xff] }
 0x317   : > { %v2440_v46 = vld [vmem:[#allocation2 + $0x109] sm:$0xff] }
 0x318   : > { %v4690_v29 = vpop.f32.mrb[22].mxu0  ;;  %v4835_v38 = vpack.i.bf16 %v7101_v49, %v2440_v46  ;;  %v7104_v42 = vpack.i.bf16 %v2440_v46, %v2439_v17  ;;  %v4712_v17 = vpack.c.bf16 %v3801_v22, %v3800_v54  ;;  %v4715_v46 = vpack.c.bf16 %v3803_v19, %v3802_v11  ;;  %v3810_v54 = vld [vmem:[%s8196_s4 + $0x50] sm:$0xff]  ;;  %v3811_v22 = vld [vmem:[%s8196_s4 + $0x58] sm:$0xff] }
 0x319   : > { %v2218_v60 = vmul.f32 %v4690_v29, %v6981_v18  ;;  %v2139_v10 = vpop.f32.mrb[23].mxu0  ;;  %v4727_v11 = vpack.c.bf16 %v3811_v22, %v3810_v54  ;;  %v7290_v22 = vld [vmem:[#allocation2 + $0xd8] sm:$0xff] }
 0x31a   : > { %v2217_v59 = vmul.f32 %v6981_v18, %v2139_v10  ;;  %4836 = vrot.lane.b32.xlu1 %v4835_v38, %s5365_s10  ;;  %4747 = vmatpush1.bf16.msra.mxu1 %v4712_v17  ;;  %v4860_v38 = vpack.i.bf16 %v2451_v2, %v2450_v47  ;;  %v7224_v2 = vld [vmem:[#allocation2 + $0xaa] sm:$0xff] }
 0x31b   : > { %v2257_v14 = vadd.f32 %v6986_v20, %v2218_v60  ;;  %4713 = vmatpush1.bf16.msra.mxu0 %v4712_v17  ;;  %4739 = vmatprep.subr.bf16.mxu1 %v5371_v33 }
 0x31c   : > { %v2256_v56 = vadd.f32 %v6986_v20, %v2217_v59  ;;  %4714 = vmatprep.subr.bf16.mxu0 %v5371_v33  ;;  %v3804_v59 = vld [vmem:[%s8196_s4 + $0x20] sm:$0xff] }
 0x31d   : > { %v2289_v24 = vmax.f32 %v2257_v14, 0.0  ;;  %v3805_v14 = vld [vmem:[%s8196_s4 + $0x28] sm:$0xff] }
 0x31e   : > { %v2288_v50 = vmax.f32 %v2256_v56, 0.0  ;;  %4748 = vmatpush1.bf16.msra.mxu1 %v4715_v46 }
 0x31f   : > { %2377 = vst.msk [vmem:[#allocation2 + $0x129] sm:$0xff] %vm1692_vm4, %v2289_v24  ;;  %4716 = vmatpush1.bf16.msra.mxu0 %v4715_v46  ;;  %4740 = vmatprep.subr.bf16.mxu1 %v5371_v33  ;;  %v7176_v24 = vld [vmem:[#allocation2 + $0x3a] sm:$0xff] }
 0x320   : > { %2376 = vst.msk [vmem:[#allocation2 + $0x121] sm:$0xff] %vm1692_vm4, %v2288_v50  ;;  %4717 = vmatprep.subr.bf16.mxu0 %v5371_v33  ;;  %v4718_v50 = vpack.c.bf16 %v3805_v14, %v3804_v59  ;;  %v7246_v59 = vld [vmem:[#allocation2 + $0xc0] sm:$0xff]  ;;  %v7248_v14 = vld [vmem:[#allocation2 + $0x4a] sm:$0xff] }
 0x322   : > { %4749 = vmatpush1.bf16.msra.mxu1 %v4718_v50 }
 0x323   : > { %4719 = vmatpush1.bf16.msra.mxu0 %v4718_v50  ;;  %4741 = vmatprep.subr.bf16.mxu1 %v5371_v33 }
 0x324   : > { %4720 = vmatprep.subr.bf16.mxu0 %v5371_v33 }
 0x326   : > { %v7113_v21 = vld [vmem:[#allocation2 + $0x129] sm:$0xff] }
 0x327   : > { %v7115_v9 = vld [vmem:[#allocation2 + $0x121] sm:$0xff] }
 0x328   : > { %v4693_v37 = vpop.f32.mrb[24].mxu0  ;;  %v4840_v32 = vpack.i.bf16 %v7113_v21, %v7115_v9  ;;  %v5035_v25 = vpack.i.bf16 %v7115_v9, %v7101_v49 }
 0x329   : > { %v2220_v26 = vmul.f32 %v4693_v37, %v6981_v18  ;;  %v2149_v15 = vpop.f32.mrb[25].mxu0 }
 0x32a   : > { %v2219_v34 = vmul.f32 %v6981_v18, %v2149_v15  ;;  %4841 = vrot.lane.b32.xlu0 %v4840_v32, %s5365_s10  ;;  %v4870_v32 = vpack.i.bf16 %v7176_v24, %v7012_v45  ;;  %v3807_v15 = vld [vmem:[%s8196_s4 + $0x38] sm:$0xff] }
 0x32b   : > { %v2259_v3 = vadd.f32 %v6986_v20, %v2220_v26  ;;  %v3806_v26 = vld [vmem:[%s8196_s4 + $0x30] sm:$0xff] }
 0x32c   : > { %v2258_v13 = vadd.f32 %v6986_v20, %v2219_v34  ;;  %v7191_v34 = vld [vmem:[#allocation2 + $0x62] sm:$0xff] }
 0x32d   : > { %v2291_v62 = vmax.f32 %v2259_v3, 0.0  ;;  %v2459_v3 = vld [vmem:[#allocation2 + $0x6a] sm:$0xff] }
 0x32e   : > { %v2290_v39 = vmax.f32 %v2258_v13, 0.0  ;;  %v4721_v13 = vpack.c.bf16 %v3807_v15, %v3806_v26  ;;  %v3814_v15 = vld [vmem:[%s8196_s4 + $0x70] sm:$0xff] }
 0x32f   : > { %2379 = vst.msk [vmem:[#allocation2 + $0x141] sm:$0xff] %vm1692_vm4, %v2291_v62  ;;  %v4880_v62 = vpack.i.bf16 %v2459_v3, %v7191_v34  ;;  %v3815_v3 = vld [vmem:[%s8196_s4 + $0x78] sm:$0xff] }
 0x330   : > { %2378 = vst.msk [vmem:[#allocation2 + $0x139] sm:$0xff] %vm1692_vm4, %v2290_v39  ;;  %4750 = vmatpush1.bf16.msra.mxu1 %v4721_v13  ;;  %4722 = vmatpush1.bf16.msra.mxu0 %v4721_v13  ;;  %v3808_v39 = vld [vmem:[%s8196_s4 + $0x40] sm:$0xff] }
 0x331   : > { %4742 = vmatprep.subr.bf16.mxu1 %v5371_v33  ;;  %4723 = vmatprep.subr.bf16.mxu0 %v5371_v33  ;;  %v7270_v13 = vld [vmem:[#allocation2 + $0x7a] sm:$0xff] }
 0x336   : > { %v7128_v41 = vld [vmem:[#allocation2 + $0x141] sm:$0xff] }
 0x337   : > { %v7130_v1 = vld [vmem:[#allocation2 + $0x139] sm:$0xff] }
 0x338   : > { %v4696_v48 = vpop.f32.mrb[26].mxu0  ;;  %v4845_v44 = vpack.i.bf16 %v7128_v41, %v7130_v1 }
 0x339   : > { %v2222_v0 = vmul.f32 %v4696_v48, %v6981_v18  ;;  %v2159_v16 = vpop.f32.mrb[27].mxu0  ;;  %v3809_v48 = vld [vmem:[%s8196_s4 + $0x48] sm:$0xff] }
 0x33a   : > { %v2221_v35 = vmul.f32 %v6981_v18, %v2159_v16  ;;  %4846 = vrot.lane.b32.xlu1 %v4845_v44, %s5365_s10  ;;  %v7203_v44 = vld [vmem:[#allocation2 + $0xa8] sm:$0xff] }
 0x33b   : > { %v2261_v58 = vadd.f32 %v6986_v20, %v2222_v0  ;;  %v4724_v0 = vpack.c.bf16 %v3809_v48, %v3808_v39  ;;  %v4733_v39 = vpack.c.bf16 %v3815_v3, %v3814_v15  ;;  %v7360_v3 = vld [vmem:[#allocation2 + $0x18] sm:$0xff] }
 0x33c   : > { %v2260_v4 = vadd.f32 %v6986_v20, %v2221_v35  ;;  %v7208_v35 = vld [vmem:[#allocation2 + $0x98] sm:$0xff] }
 0x33d   : > { %v2293_v31 = vmax.f32 %v2261_v58, 0.0  ;;  %4751 = vmatpush1.bf16.msra.mxu1 %v4724_v0  ;;  %4725 = vmatpush1.bf16.msra.mxu0 %v4724_v0  ;;  %v3816_v0 = vld [vmem:[%s8196_s4 + $0x80] sm:$0xff] }
 0x33e   : > { %v2292_v27 = vmax.f32 %v2260_v4, 0.0  ;;  %4743 = vmatprep.subr.bf16.mxu1 %v5371_v33  ;;  %4726 = vmatprep.subr.bf16.mxu0 %v5371_v33 }
 0x33f   : > { %2381 = vst.msk [vmem:[#allocation2 + $0x159] sm:$0xff] %vm1692_vm4, %v2293_v31  ;;  %v4890_v31 = vpack.i.bf16 %v7203_v44, %v7208_v35 }
 0x340   : > { %2380 = vst.msk [vmem:[#allocation2 + $0x151] sm:$0xff] %vm1692_vm4, %v2292_v27 }
 0x341   : > { %4752 = vmatpush1.bf16.msra.mxu1 %v4727_v11  ;;  %4728 = vmatpush1.bf16.msra.mxu0 %v4727_v11 }
 0x342   : > { %4744 = vmatprep.subr.bf16.mxu1 %v5371_v33  ;;  %4729 = vmatprep.subr.bf16.mxu0 %v5371_v33 }
 0x346   : > { %v7149_v53 = vld [vmem:[#allocation2 + $0x159] sm:$0xff] }
 0x347   : > { %v7151_v57 = vld [vmem:[#allocation2 + $0x151] sm:$0xff] }
 0x348   : > { %v4699_v52 = vpop.f32.mrb[28].mxu0  ;;  %v4850_v7 = vpack.i.bf16 %v7149_v53, %v7151_v57 }
 0x349   : > { %v2224_v5 = vmul.f32 %v4699_v52, %v6981_v18  ;;  %v2169_v61 = vpop.f32.mrb[29].mxu0  ;;  %v7226_v52 = vld [vmem:[#allocation2 + $0x1a] sm:$0xff] }
 0x34a   : > { %v2223_v29 = vmul.f32 %v6981_v18, %v2169_v61  ;;  %4851 = vrot.lane.b32.xlu0 %v4850_v7, %s5365_s10  ;;  %v7228_v7 = vld [vmem:[#allocation2 + $0x22] sm:$0xff]  ;;  %v2557_v61 = vld [vmem:[#allocation2 + $0x9a] sm:$0xff] }
 0x34b   : > { %v2263_v60 = vadd.f32 %v6986_v20, %v2224_v5 }
 0x34c   : > { %v2262_v10 = vadd.f32 %v6986_v20, %v2223_v29  ;;  %v4900_v29 = vpack.i.bf16 %v7224_v2, %v2557_v61 }
 0x34d   : > { %v2295_v56 = vmax.f32 %v2263_v60, 0.0  ;;  %v3813_v60 = vld [vmem:[%s8196_s4 + $0x68] sm:$0xff] }
 0x34e   : > { %v2294_v37 = vmax.f32 %v2262_v10, 0.0  ;;  %4861 = vrot.lane.b32.xlu0 %v4860_v38, %s5369_s26  ;;  %v4865_v38 = vpack.i.bf16 %v7228_v7, %v7226_v52 }
 0x34f   : > { %2383 = vst.msk [vmem:[#allocation2 + $0x171] sm:$0xff] %vm1692_vm4, %v2295_v56 }
 0x350   : > { %2382 = vst.msk [vmem:[#allocation2 + $0x169] sm:$0xff] %vm1692_vm4, %v2294_v37  ;;  %v7254_v37 = vld [vmem:[#allocation2 + $0xb0] sm:$0xff] }
 0x352   : > { %4871 = vrot.lane.b32.xlu0 %v4870_v32, %s5369_s26  ;;  %v4910_v32 = vpack.i.bf16 %v7246_v59, %v7254_v37 }
 0x356   : > { %4881 = vrot.lane.b32.xlu0 %v4880_v62, %s5369_s26  ;;  %v7206_v16 = vld [vmem:[#allocation2 + $0x171] sm:$0xff]  ;;  %v2461_v62 = vld [vmem:[#allocation2 + $0x82] sm:$0xff] }
 0x357   : > { %v7210_v58 = vld [vmem:[#allocation2 + $0x169] sm:$0xff]  ;;  %v4885_v48 = vpack.i.bf16 %v2461_v62, %v7270_v13 }
 0x358   : > { %v4702_v4 = vpop.f32.mrb[30].mxu0  ;;  %v4855_v27 = vpack.i.bf16 %v7206_v16, %v7210_v58 }
 0x359   : > { %v2226_v17 = vmul.f32 %v4702_v4, %v6981_v18  ;;  %v2179_v47 = vpop.f32.mrb[31].mxu0  ;;  %v3817_v4 = vld [vmem:[%s8196_s4 + $0x88] sm:$0xff] }
 0x35a   : > { %v2225_v19 = vmul.f32 %v6981_v18, %v2179_v47  ;;  %4891 = vrot.lane.b32.xlu0 %v4890_v31, %s5372_s14  ;;  %4856 = vrot.lane.b32.xlu1 %v4855_v27, %s5365_s10  ;;  %v3812_v18 = vld [vmem:[%s8196_s4 + $0x60] sm:$0xff]  ;;  %v4736_v27 = vpack.c.bf16 %v3817_v4, %v3816_v0  ;;  %v7297_v47 = vld [vmem:[#allocation2 + $0xc8] sm:$0xff]  ;;  %v7370_v0 = vld [vmem:[#allocation2 + $0x30] sm:$0xff] }
 0x35b   : > { %v2265_v5 = vadd.f32 %v6986_v20, %v2226_v17  ;;  %v4730_v56 = vpack.c.bf16 %v3813_v60, %v3812_v18  ;;  %v7283_v31 = vld [vmem:[#allocation2 + $0xc2] sm:$0xff]  ;;  %v2462_v17 = vld [vmem:[#allocation2 + $0x92] sm:$0xff] }
 0x35c   : > { %v2264_v46 = vadd.f32 %v6986_v20, %v2225_v19  ;;  %v7250_v20 = vld [vmem:[#allocation2 + $0x52] sm:$0xff]  ;;  %v4930_v54 = vpack.i.bf16 %v7283_v31, %v7060_v12  ;;  %v4905_v11 = vpack.i.bf16 %v2557_v61, %v2462_v17  ;;  %v7303_v19 = vld [vmem:[#allocation2 + $0xda] sm:$0xff]  ;;  %v7334_v18 = vld [vmem:[#allocation2 + $0x108] sm:$0xff]  ;;  %v4965_v60 = vpack.i.bf16 %v7308_v51, %v7283_v31 }
 0x35d   : > { %v2297_v10 = vmax.f32 %v2265_v5, 0.0  ;;  %4753 = vmatpush1.bf16.msra.mxu1 %v4730_v56  ;;  %v4875_v26 = vpack.i.bf16 %v7250_v20, %v7248_v14  ;;  %4731 = vmatpush1.bf16.msra.mxu0 %v4730_v56  ;;  %v4960_v8 = vpack.i.bf16 %v7303_v19, %v7308_v51  ;;  %v7317_v5 = vld [vmem:[#allocation2 + $0xe0] sm:$0xff] }
 0x35e   : > { %v2296_v50 = vmax.f32 %v2264_v46, 0.0  ;;  %4901 = vrot.lane.b32.xlu0 %v4900_v29, %s5373_s18  ;;  %4866 = vrot.lane.b32.xlu1 %v4865_v38, %s5369_s26  ;;  %v4935_v46 = vpack.i.bf16 %v7060_v12, %v7224_v2  ;;  %v7325_v29 = vld [vmem:[#allocation2 + $0xf2] sm:$0xff]  ;;  %v7350_v56 = vld [vmem:[#allocation2 + $0xfa] sm:$0xff]  ;;  %v2568_v17 = vld [vmem:[#allocation2 + $0x122] sm:$0xff] }
 0x35f   : > { %2385 = vst.msk [vmem:[#allocation2 + $0x189] sm:$0xff] %vm1692_vm4, %v2297_v10  ;;  %4745 = vmatprep.subr.bf16.mxu1 %v5371_v33  ;;  %4732 = vmatprep.subr.bf16.mxu0 %v5371_v33  ;;  %v7339_v12 = vld [vmem:[#allocation2 + $0xf8] sm:$0xff]  ;;  %v2566_v10 = vld [vmem:[#allocation2 + $0x10a] sm:$0xff] }
 0x360   : > { %2384 = vst.msk [vmem:[#allocation2 + $0x181] sm:$0xff] %vm1692_vm4, %v2296_v50  ;;  %v5000_v2 = vpack.i.bf16 %v7334_v18, %v7339_v12  ;;  %v2599_v50 = vld [vmem:[#allocation2 + $0x120] sm:$0xff] }
 0x361   : > { %4754 = vmatpush1.bf16.msra.mxu1 %v4733_v39  ;;  %4734 = vmatpush1.bf16.msra.mxu0 %v4733_v39  ;;  %v2567_v39 = vld [vmem:[#allocation2 + $0x112] sm:$0xff] }
 0x362   : > { %4911 = vrot.lane.b32.xlu0 %v4910_v32, %s5374_s23  ;;  %4876 = vrot.lane.b32.xlu1 %v4875_v26, %s5369_s26 }
 0x363   : > { %4746 = vmatprep.subr.bf16.mxu1 %v5371_v33  ;;  %4735 = vmatprep.subr.bf16.mxu0 %v5371_v33  ;;  %v4940_v33 = vpack.i.bf16 %v7290_v22, %v7297_v47 }
 0x365   : > { %4755 = vmatpush1.bf16.msra.mxu1 %v4736_v27  ;;  %4737 = vmatpush1.bf16.msra.mxu0 %v4736_v27  ;;  %v5025_v27 = vpack.i.bf16 %v7350_v56, %v7325_v29 }
 0x366   : > { %4921 = vrot.lane.b32.xlu0 %v4910_v32, %s5372_s14  ;;  %4886 = vrot.lane.b32.xlu1 %v4885_v48, %s5369_s26  ;;  %v2409_v32 = vld [vmem:[#allocation2 + $0x110] sm:$0xff]  ;;  %v2411_v48 = vld [vmem:[#allocation2 + $0x128] sm:$0xff] }
 0x367   : > { %v5030_v26 = vpack.i.bf16 %v2599_v50, %v2409_v32  ;;  %v5040_v62 = vpack.i.bf16 %v2409_v32, %v7360_v3  ;;  %v5060_v4 = vpack.i.bf16 %v2411_v48, %v7370_v0 }
 0x36a   : > { %4931 = vrot.lane.b32.xlu0 %v4930_v54, %s5373_s18  ;;  %4896 = vrot.lane.b32.xlu1 %v4895_v55, %s5375_s8  ;;  %v7312_v55 = vld [vmem:[#allocation2 + $0xf0] sm:$0xff]  ;;  %v7375_v54 = vpop.permute.xlu0 %4781 }
 0x36b   : > { %v4970_v61 = vpack.i.bf16 %v7312_v55, %v7317_v5 }
 0x36e   : > { %4941 = vrot.lane.b32.xlu0 %v4940_v33, %s5374_s23  ;;  %4906 = vrot.lane.b32.xlu1 %v4905_v11, %s5369_s26  ;;  %v5045_v11 = vpack.i.bf16 %v7101_v49, %v6999_v36  ;;  %v7404_v36 = vpop.permute.xlu1 %4786 }
 0x372   : > { %4951 = vrot.lane.b32.xlu0 %v4940_v33, %s5372_s14  ;;  %4916 = vrot.lane.b32.xlu1 %v7078_v6, %s5376_s9  ;;  %v5080_v33 = vpack.i.bf16 %v2568_v17, %v7228_v7 }
 0x376   : > { %4961 = vrot.lane.b32.xlu0 %v4960_v8, %s5373_s18  ;;  %4926 = vrot.lane.b32.xlu1 %v7078_v6, %s5375_s8  ;;  %v7330_v6 = vld [vmem:[#allocation2 + $0xe2] sm:$0xff] }
 0x377   : > { %v4990_v38 = vpack.i.bf16 %v7325_v29, %v7330_v6  ;;  %v4995_v15 = vpack.i.bf16 %v7330_v6, %v7303_v19  ;;  %v7397_v8 = vld [vmem:[#allocation2 + $0x20] sm:$0xff] }
 0x378   : > { %v5065_v7 = vpack.i.bf16 %v2599_v50, %v7397_v8 }
 0x37a   : > { %4971 = vrot.lane.b32.xlu0 %v4970_v61, %s5374_s23  ;;  %4936 = vrot.lane.b32.xlu1 %v4935_v46, %s5369_s26 }
 0x37e   : > { %4981 = vrot.lane.b32.xlu0 %v4970_v61, %s5372_s14  ;;  %4946 = vrot.lane.b32.xlu1 %v7083_v23, %s5376_s9  ;;  %v2475_v61 = vld [vmem:[#allocation2 + $0x12a] sm:$0xff] }
 0x37f   : > { %v5110_v46 = vpack.i.bf16 %v2475_v61, %v2568_v17  ;;  %v5105_v48 = vpack.i.bf16 %v2475_v61, %v7012_v45 }
 0x382   : > { %4991 = vrot.lane.b32.xlu0 %v4990_v38, %s5373_s18  ;;  %4956 = vrot.lane.b32.xlu1 %v7083_v23, %s5375_s8  ;;  %v5020_v23 = vpack.i.bf16 %v2566_v10, %v7350_v56  ;;  %v5075_v38 = vpack.i.bf16 %v7115_v9, %v6996_v30  ;;  %v5130_v30 = vpack.i.bf16 %v7130_v1, %v7009_v63  ;;  %v2414_v9 = vld [vmem:[#allocation2 + $0x150] sm:$0xff]  ;;  %v7439_v63 = vld [vmem:[#allocation2 + $0x48] sm:$0xff] }
 0x386   : > { %5001 = vrot.lane.b32.xlu0 %v5000_v2, %s5374_s23  ;;  %4966 = vrot.lane.b32.xlu1 %v4965_v60, %s5369_s26  ;;  %v2391_v60 = vld [vmem:[#allocation2 + $0x38] sm:$0xff] }
 0x38a   : > { %5011 = vrot.lane.b32.xlu0 %v5000_v2, %s5372_s14  ;;  %4976 = vrot.lane.b32.xlu1 %v7092_v28, %s5376_s9  ;;  %v2412_v2 = vld [vmem:[#allocation2 + $0x138] sm:$0xff] }
 0x38b   : > { %v5120_v50 = vpack.i.bf16 %v2412_v2, %v2391_v60 }
 0x38e   : > { %5021 = vrot.lane.b32.xlu0 %v5020_v23, %s5373_s18  ;;  %4986 = vrot.lane.b32.xlu1 %v7092_v28, %s5375_s8  ;;  %v5050_v28 = vpack.i.bf16 %v2567_v39, %v7226_v52  ;;  %v5070_v52 = vpack.i.bf16 %v7113_v21, %v7014_v43  ;;  %v5055_v21 = vpack.i.bf16 %v2567_v39, %v2566_v10  ;;  %v7412_v10 = vpop.permute.xlu1 %4796 }
 0x392   : > { %5031 = vrot.lane.b32.xlu0 %v5030_v26, %s5374_s23  ;;  %4996 = vrot.lane.b32.xlu1 %v4995_v15, %s5369_s26  ;;  %v7418_v32 = vpop.permute.xlu1 %4806  ;;  %v7426_v15 = vld [vmem:[#allocation2 + $0x50] sm:$0xff] }
 0x393   : > { %8438 = vst [vmem:[#allocation31_spill] sm:$0xff] %v7418_v32 }
 0x396   : > { %5041 = vrot.lane.b32.xlu0 %v5040_v62, %s5372_s14  ;;  %5006 = vrot.lane.b32.xlu1 %v7104_v42, %s5376_s9  ;;  %v7428_v62 = vpop.permute.xlu1 %4816 }
 0x39a   : > { %5051 = vrot.lane.b32.xlu0 %v5050_v28, %s5373_s18  ;;  %5016 = vrot.lane.b32.xlu1 %v7104_v42, %s5375_s8  ;;  %v7386_v42 = vpop.permute.xlu0 %4791  ;;  %v7433_v28 = vpack.i.bf16 %v2414_v9, %v7426_v15  ;;  %v7441_v1 = vpop.permute.xlu1 %4826 }
 0x39b   : > { %v4794_v45 = vunpack.i.h.bf16 %v7386_v42 }
 0x39d   : > { %v3576_v9 = vsel %vm1692_vm4, %v2391_v60, %v4794_v45  ;;  %v7478_v45 = vld [vmem:[#allocation2 + $0x68] sm:$0xff] }
 0x39e   : > { %5061 = vrot.lane.b32.xlu0 %v5060_v4, %s5374_s23  ;;  %5026 = vrot.lane.b32.xlu1 %v5025_v27, %s5369_s26  ;;  %v7393_v43 = vpop.permute.xlu0 %4801 }
 0x3a2   : > { %5071 = vrot.lane.b32.xlu0 %v5070_v52, %s5376_s9  ;;  %5036 = vrot.lane.b32.xlu1 %v5035_v25, %s5376_s9  ;;  %v7399_v25 = vpop.permute.xlu0 %4811 }
 0x3a6   : > { %5081 = vrot.lane.b32.xlu0 %v5080_v33, %s5373_s18  ;;  %5046 = vrot.lane.b32.xlu1 %v5045_v11, %s5375_s8  ;;  %v7406_v49 = vpop.permute.xlu0 %4821  ;;  %v7448_v33 = vld [vmem:[#allocation2 + $0x142] sm:$0xff]  ;;  %v4793_v11 = vunpack.i.l.bf16 %v7386_v42 }
 0x3a8   : > { %v3575_v42 = vsel %vm1692_vm4, %v7370_v0, %v4793_v11 }
 0x3aa   : > { %5091 = vrot.lane.b32.xlu0 %v5060_v4, %s5372_s14  ;;  %5056 = vrot.lane.b32.xlu1 %v5055_v21, %s5369_s26  ;;  %v7414_v23 = vpop.permute.xlu0 %4831  ;;  %v2413_v4 = vld [vmem:[#allocation2 + $0x140] sm:$0xff]  ;;  %v2613_v21 = vld [vmem:[#allocation2 + $0x49] sm:$0xff] }
 0x3ab   : > { %v5115_v17 = vpack.i.bf16 %v2413_v4, %v7439_v63  ;;  %v4803_v4 = vunpack.i.l.bf16 %v7393_v43 }
 0x3ae   : > { %5101 = vrot.lane.b32.xlu0 %v5070_v52, %s5375_s8  ;;  %5066 = vrot.lane.b32.xlu1 %v5065_v7, %s5372_s14  ;;  %v7420_v26 = vpop.permute.xlu0 %4841  ;;  %v5150_v52 = vpack.i.bf16 %v7151_v57, %v7026_v40  ;;  %v7454_v7 = vpop.permute.xlu1 %4836  ;;  %v5125_v40 = vpack.i.bf16 %v7128_v41, %v2613_v21 }
 0x3b2   : > { %5111 = vrot.lane.b32.xlu0 %v5110_v46, %s5369_s26  ;;  %5076 = vrot.lane.b32.xlu1 %v5075_v38, %s5375_s8  ;;  %v5160_v46 = vpack.i.bf16 %v7448_v33, %v7248_v14  ;;  %v2415_v38 = vld [vmem:[#allocation2 + $0x158] sm:$0xff]  ;;  %v2394_v14 = vld [vmem:[#allocation2 + $0x60] sm:$0xff]  ;;  %v7474_v21 = vpop.permute.xlu1 %4846 }
 0x3b3   : > { %v5170_v11 = vpack.i.bf16 %v2415_v38, %v2394_v14 }
 0x3b6   : > { %5121 = vrot.lane.b32.xlu0 %v5120_v50, %s5372_s14  ;;  %5086 = vrot.lane.b32.xlu1 %v5120_v50, %s5374_s23 }
 0x3ba   : > { %5131 = vrot.lane.b32.xlu0 %v5130_v30, %s5375_s8  ;;  %5096 = vrot.lane.b32.xlu1 %v5130_v30, %s5376_s9  ;;  %v7459_v30 = vld [vmem:[#allocation2 + $0x13a] sm:$0xff] }
 0x3bb   : > { %v5135_v60 = vpack.i.bf16 %v7459_v30, %v7176_v24  ;;  %v2615_v24 = vld [vmem:[#allocation2 + $0x61] sm:$0xff] }
 0x3bc   : > { %v7430_v39 = vpop.permute.xlu0 %4851 }
 0x3be   : > { %5141 = vrot.lane.b32.xlu0 %v7433_v28, %s5374_s23  ;;  %5106 = vrot.lane.b32.xlu1 %v5105_v48, %s5373_s18  ;;  %v4804_v48 = vunpack.i.h.bf16 %v7393_v43 }
 0x3c0   : > { %v7443_v27 = vpop.permute.xlu0 %4861 }
 0x3c2   : > { %5151 = vrot.lane.b32.xlu0 %v5150_v52, %s5376_s9  ;;  %5116 = vrot.lane.b32.xlu1 %v5115_v17, %s5374_s23 }
 0x3c4   : > { %v4872_v61 = vpop.permute.xlu0 %4871 }
 0x3c5   : > { %v4874_v2 = vunpack.i.h.bf16 %v4872_v61  ;;  %v4873_v50 = vunpack.i.l.bf16 %v4872_v61 }
 0x3c6   : > { %5161 = vrot.lane.b32.xlu0 %v5160_v46, %s5373_s18  ;;  %5126 = vrot.lane.b32.xlu1 %v5125_v40, %s5376_s9  ;;  %v3579_v46 = vsel %vm1692_vm4, %v2394_v14, %v4803_v4  ;;  %v5180_v4 = vpack.i.bf16 %v7149_v53, %v2615_v24  ;;  %v7496_v14 = vld [vmem:[#allocation2 + $0x152] sm:$0xff] }
 0x3c7   : > { %v7469_v41 = vsel %vm1824_vm8, %v3576_v9, %v4874_v2  ;;  %v7472_v52 = vsel %vm1824_vm8, %v3575_v42, %v4873_v50  ;;  %v3580_v2 = vsel %vm1692_vm4, %v7478_v45, %v4804_v48  ;;  %v4789_v48 = vunpack.i.h.bf16 %v7404_v36 }
 0x3c8   : > { %v4882_v0 = vpop.permute.xlu0 %4881 }
 0x3c9   : > { %v4884_v43 = vunpack.i.h.bf16 %v4882_v0  ;;  %v4883_v61 = vunpack.i.l.bf16 %v4882_v0  ;;  %v4788_v0 = vunpack.i.l.bf16 %v7404_v36  ;;  %v3574_v24 = vsel %vm1692_vm4, %v7397_v8, %v4789_v48 }
 0x3ca   : > { %5171 = vrot.lane.b32.xlu0 %v5170_v11, %s5374_s23  ;;  %5136 = vrot.lane.b32.xlu1 %v5135_v60, %s5373_s18  ;;  %v4799_v36 = vunpack.i.h.bf16 %v7412_v10  ;;  %v5165_v8 = vpack.i.bf16 %v7448_v33, %v7459_v30 }
 0x3cb   : > { %v7486_v50 = vsel %vm1824_vm8, %v3580_v2, %v4884_v43  ;;  %v7489_v38 = vsel %vm1824_vm8, %v3579_v46, %v4883_v61  ;;  %v5190_v61 = vpack.i.bf16 %v7496_v14, %v7250_v20  ;;  %v3573_v53 = vsel %vm1692_vm4, %v7360_v3, %v4788_v0 }
 0x3cc   : > { %8439 = vst [vmem:[#allocation33_spill] sm:$0xff] %v7486_v50  ;;  %8440 = vst [vmem:[#allocation30_spill] sm:$0xff] %v7489_v38  ;;  %v7491_v42 = vpop.permute.xlu0 %4891  ;;  %v7493_v9 = vpop.permute.xlu1 %4856  ;;  %v4798_v50 = vunpack.i.l.bf16 %v7412_v10 }
 0x3cd   : > { %8441 = vst [vmem:[#allocation38_spill] sm:$0xff] %v7493_v9 }
 0x3ce   : > { %5181 = vrot.lane.b32.xlu0 %v5180_v4, %s5376_s9  ;;  %5146 = vrot.lane.b32.xlu1 %v5115_v17, %s5372_s14  ;;  %v3577_v10 = vsel %vm1692_vm4, %v7439_v63, %v4798_v50  ;;  %v7542_v50 = vld [vmem:[#allocation2 + $0x15a] sm:$0xff] }
 0x3d0   : > { %v7502_v60 = vpop.permute.xlu0 %4901  ;;  %v4867_v43 = vpop.permute.xlu1 %4866 }
 0x3d1   : > { %v4869_v46 = vunpack.i.h.bf16 %v4867_v43  ;;  %v4868_v2 = vunpack.i.l.bf16 %v4867_v43  ;;  %v4903_v9 = vunpack.i.l.bf16 %v7502_v60 }
 0x3d2   : > { %5191 = vrot.lane.b32.xlu0 %v5190_v61, %s5373_s18  ;;  %5156 = vrot.lane.b32.xlu1 %v5125_v40, %s5375_s8  ;;  %v3578_v40 = vsel %vm1692_vm4, %v7426_v15, %v4799_v36  ;;  %v4809_v61 = vunpack.i.h.bf16 %v7418_v32  ;;  %v2397_v15 = vld [vmem:[#allocation2 + $0x80] sm:$0xff]  ;;  %v2398_v32 = vld [vmem:[#allocation2 + $0x90] sm:$0xff] }
 0x3d3   : > { %v7515_v17 = vsel %vm1824_vm8, %v3574_v24, %v4869_v46  ;;  %v7518_v20 = vsel %vm1824_vm8, %v3573_v53, %v4868_v2  ;;  %v2519_v24 = vld [vmem:[#allocation2 + $0x51] sm:$0xff] }
 0x3d4   : > { %v7520_v43 = vpop.permute.xlu0 %4911  ;;  %v4877_v3 = vpop.permute.xlu1 %4876 }
 0x3d5   : > { %v4879_v48 = vunpack.i.h.bf16 %v4877_v3  ;;  %v4878_v0 = vunpack.i.l.bf16 %v4877_v3 }
 0x3d6   : > { %5201 = vrot.lane.b32.xlu0 %v5170_v11, %s5372_s14  ;;  %5166 = vrot.lane.b32.xlu1 %v5165_v8, %s5369_s26  ;;  %v3582_v11 = vsel %vm1692_vm4, %v2397_v15, %v4809_v61 }
 0x3d7   : > { %v7532_v46 = vsel %vm1824_vm8, %v3578_v40, %v4879_v48  ;;  %v7535_v2 = vsel %vm1824_vm8, %v3577_v10, %v4878_v0  ;;  %v5220_v48 = vpack.i.bf16 %v7542_v50, %v7496_v14  ;;  %v5185_v0 = vpack.i.bf16 %v7151_v57, %v2519_v24 }
 0x3d8   : > { %8442 = vst [vmem:[#allocation32_spill] sm:$0xff] %v7532_v46  ;;  %v7537_v33 = vpop.permute.xlu0 %4921  ;;  %v7539_v53 = vpop.permute.xlu1 %4886  ;;  %v4893_v10 = vunpack.i.l.bf16 %v7491_v42  ;;  %v2521_v46 = vld [vmem:[#allocation2 + $0x69] sm:$0xff] }
 0x3d9   : > { %8443 = vst [vmem:[#allocation39_spill] sm:$0xff] %v7539_v53  ;;  %v4889_v63 = vunpack.i.h.bf16 %v7539_v53 }
 0x3da   : > { %5211 = vrot.lane.b32.xlu0 %v5180_v4, %s5375_s8  ;;  %5176 = vrot.lane.b32.xlu1 %v7433_v28, %s5372_s14  ;;  %v2416_v4 = vld [vmem:[#allocation2 + $0x168] sm:$0xff]  ;;  %v4813_v28 = vunpack.i.l.bf16 %v7399_v25 }
 0x3db   : > { %v3614_v36 = vsel %vm1824_vm8, %v3582_v11, %v4889_v63  ;;  %v2584_v63 = vld [vmem:[#allocation2 + $0x68] sm:$0xff]  ;;  %v5230_v57 = vpack.i.bf16 %v2416_v4, %v7478_v45 }
 0x3dc   : > { %v7549_v3 = vpop.permute.xlu0 %4931  ;;  %v4897_v8 = vpop.permute.xlu1 %4896  ;;  %v3647_v61 = vsel %vm3635_vm11, %v3614_v36, %v4893_v10  ;;  %v5195_v24 = vpack.i.bf16 %v2416_v4, %v2584_v63  ;;  %v4894_v36 = vunpack.i.h.bf16 %v7491_v42  ;;  %v5240_v10 = vpack.i.bf16 %v7210_v58, %v2521_v46 }
 0x3dd   : > { %v4898_v40 = vunpack.i.l.bf16 %v4897_v8  ;;  %v4904_v63 = vunpack.i.h.bf16 %v7502_v60  ;;  %v4914_v58 = vunpack.i.h.bf16 %v7520_v43 }
 0x3de   : > { %5221 = vrot.lane.b32.xlu0 %v5220_v48, %s5369_s26  ;;  %5186 = vrot.lane.b32.xlu1 %v5185_v0, %s5375_s8  ;;  %v4814_v48 = vunpack.i.h.bf16 %v7399_v25  ;;  %v3583_v0 = vsel %vm1692_vm4, %v2398_v32, %v4813_v28 }
 0x3df   : > { %v3680_v15 = vsel %vm3668_vm12, %v3647_v61, %v4898_v40  ;;  %v4913_v40 = vunpack.i.l.bf16 %v7520_v43  ;;  %v4899_v61 = vunpack.i.h.bf16 %v4897_v8 }
 0x3e0   : > { %v7560_v11 = vpop.permute.xlu0 %4941  ;;  %v4907_v53 = vpop.permute.xlu1 %4906  ;;  %v3713_v4 = vsel %vm3701_vm13, %v3680_v15, %v4903_v9  ;;  %v3584_v46 = vsel %vm1692_vm4, %v7208_v35, %v4814_v48  ;;  %v2586_v15 = vld [vmem:[#allocation2 + $0x80] sm:$0xff]  ;;  %v2417_v35 = vld [vmem:[#allocation2 + $0x170] sm:$0xff]  ;;  %v4923_v48 = vunpack.i.l.bf16 %v7537_v33 }
 0x3e1   : > { %v4908_v38 = vunpack.i.l.bf16 %v4907_v53  ;;  %v4909_v25 = vunpack.i.h.bf16 %v4907_v53 }
 0x3e2   : > { %5231 = vrot.lane.b32.xlu0 %v5230_v57, %s5372_s14  ;;  %5196 = vrot.lane.b32.xlu1 %v5195_v24, %s5374_s23  ;;  %v2607_v24 = vld [vmem:[#allocation2 + $0x180] sm:$0xff] }
 0x3e3   : > { %v3615_v45 = vsel %vm1824_vm8, %v3583_v0, %v4908_v38  ;;  %v3746_v38 = vsel %vm3734_vm14, %v3713_v4, %v4913_v40  ;;  %v3616_v0 = vsel %vm1824_vm8, %v3584_v46, %v4909_v25  ;;  %v4818_v25 = vunpack.i.l.bf16 %v7428_v62 }
 0x3e4   : > { %v3648_v32 = vsel %vm3635_vm11, %v3615_v45, %v4894_v36  ;;  %v7574_v28 = vpop.permute.xlu0 %4951  ;;  %v4917_v42 = vpop.permute.xlu1 %4916  ;;  %v7591_v45 = vpack.i.bf16 %v2607_v24, %v2586_v15  ;;  %v4933_v46 = vunpack.i.l.bf16 %v7549_v3 }
 0x3e5   : > { %v4918_v57 = vunpack.i.l.bf16 %v4917_v42  ;;  %v3681_v9 = vsel %vm3668_vm12, %v3648_v32, %v4899_v61  ;;  %v4919_v53 = vunpack.i.h.bf16 %v4917_v42  ;;  %v2639_v61 = vld [vmem:[#allocation2 + $0x181] sm:$0xff]  ;;  %v2585_v42 = vld [vmem:[#allocation2 + $0x78] sm:$0xff]  ;;  %v3585_v15 = vsel %vm1692_vm4, %v7203_v44, %v4818_v25 }
 0x3e6   : > { %5241 = vrot.lane.b32.xlu0 %v5240_v10, %s5375_s8  ;;  %5206 = vrot.lane.b32.xlu1 %v5240_v10, %s5376_s9  ;;  %v3714_v60 = vsel %vm3701_vm13, %v3681_v9, %v4904_v63  ;;  %v5215_v10 = vpack.i.bf16 %v7542_v50, %v7191_v34  ;;  %v3649_v34 = vsel %vm3635_vm11, %v3616_v0, %v4923_v48  ;;  %v2618_v63 = vld [vmem:[#allocation2 + $0x81] sm:$0xff]  ;;  %v7610_v9 = vld [vmem:[#allocation2 + $0x172] sm:$0xff]  ;;  %v4934_v25 = vunpack.i.h.bf16 %v7549_v3 }
 0x3e7   : > { %v3779_v8 = vsel %vm3767_vm15, %v3746_v38, %v4918_v57  ;;  %v3747_v4 = vsel %vm3734_vm14, %v3714_v60, %v4914_v58  ;;  %v7608_v38 = vpack.i.bf16 %v2639_v61, %v2618_v63  ;;  %v4924_v60 = vunpack.i.h.bf16 %v7537_v33  ;;  %v7623_v0 = vld [vmem:[#allocation2 + $0x79] sm:$0xff] }
 0x3e8   : > { %v7587_v43 = vpop.permute.xlu0 %4961  ;;  %v4927_v36 = vpop.permute.xlu1 %4926  ;;  %4034 = vmatmul.mubr.f32.vlgmr.msra.gmra.mrb[0].mxu1 %v3779_v8  ;;  %v3780_v32 = vsel %vm3767_vm15, %v3747_v4, %v4919_v53  ;;  %v4819_v53 = vunpack.i.h.bf16 %v7428_v62  ;;  %v5270_v62 = vpack.i.bf16 %v7610_v9, %v7270_v13  ;;  %v4943_v33 = vunpack.i.l.bf16 %v7560_v11 }
 0x3e9   : > { %v4928_v40 = vunpack.i.l.bf16 %v4927_v36  ;;  %4583 = vmatprep.mubr.msk.f32.mxu1 %vm1692_vm4, %v7283_v31  ;;  %v7606_v31 = vpack.i.bf16 %v2417_v35, %v2585_v42  ;;  %v4929_v4 = vunpack.i.h.bf16 %v4927_v36  ;;  %v4944_v42 = vunpack.i.h.bf16 %v7560_v11 }
 0x3ea   : > { %5216 = vrot.lane.b32.xlu1 %v5215_v10, %s5373_s18  ;;  %5251 = vrot.lane.b32.xlu0 %v7591_v45, %s5374_s23  ;;  %v3586_v63 = vsel %vm1692_vm4, %v7254_v37, %v4819_v53  ;;  %v4953_v53 = vunpack.i.l.bf16 %v7574_v28 }
 0x3eb   : > { %v3682_v57 = vsel %vm3668_vm12, %v3649_v34, %v4928_v40 }
 0x3ec   : > { %v7604_v24 = vpop.permute.xlu0 %4971  ;;  %v4937_v58 = vpop.permute.xlu1 %4936  ;;  %4039 = vmatmul.mubr.f32.gmra.mrb[2].mxu1 %v3780_v32  ;;  %v3715_v44 = vsel %vm3701_vm13, %v3682_v57, %v4933_v46  ;;  %v7636_v32 = vld [vmem:[#allocation2 + $0x16a] sm:$0xff] }
 0x3ed   : > { %v4938_v8 = vunpack.i.l.bf16 %v4937_v58  ;;  %4584 = vmatprep.mubr.msk.f32.mxu1 %vm1692_vm4, %v7308_v51  ;;  %v5235_v51 = vpack.i.bf16 %v7206_v16, %v7623_v0  ;;  %v4939_v35 = vunpack.i.h.bf16 %v4937_v58  ;;  %v2608_v16 = vld [vmem:[#allocation2 + $0x188] sm:$0xff]  ;;  %v3748_v13 = vsel %vm3734_vm14, %v3715_v44, %v4943_v33  ;;  %v2587_v46 = vld [vmem:[#allocation2 + $0x90] sm:$0xff] }
 0x3ee   : > { %5226 = vrot.lane.b32.xlu1 %v7606_v31, %s5374_s23  ;;  %5261 = vrot.lane.b32.xlu0 %v7608_v38, %s5376_s9  ;;  %v7646_v58 = vld [vmem:[#allocation2 + $0x6a] sm:$0xff]  ;;  %v4823_v33 = vunpack.i.l.bf16 %v7406_v49 }
 0x3ef   : > { %v3617_v10 = vsel %vm1824_vm8, %v3585_v15, %v4938_v8  ;;  %v3618_v11 = vsel %vm1824_vm8, %v3586_v63, %v4939_v35  ;;  %v2640_v44 = vld [vmem:[#allocation2 + $0x189] sm:$0xff] }
 0x3f0   : > { %v3650_v48 = vsel %vm3635_vm11, %v3617_v10, %v4924_v60  ;;  %v7633_v40 = vpop.permute.xlu0 %4981  ;;  %v4947_v61 = vpop.permute.xlu1 %4946  ;;  %v5245_v10 = vpack.i.bf16 %v7636_v32, %v7646_v58  ;;  %v3587_v63 = vsel %vm1692_vm4, %v7246_v59, %v4823_v33 }
 0x3f1   : > { %v4948_v34 = vunpack.i.l.bf16 %v4947_v61  ;;  %v3683_v36 = vsel %vm3668_vm12, %v3650_v48, %v4929_v4  ;;  %v4949_v57 = vunpack.i.h.bf16 %v4947_v61  ;;  %v3651_v4 = vsel %vm3635_vm11, %v3618_v11, %v4953_v53  ;;  %v2619_v48 = vld [vmem:[#allocation2 + $0x91] sm:$0xff] }
 0x3f2   : > { %5236 = vrot.lane.b32.xlu1 %v5235_v51, %s5376_s9  ;;  %5271 = vrot.lane.b32.xlu0 %v5270_v62, %s5373_s18  ;;  %v3716_v8 = vsel %vm3701_vm13, %v3683_v36, %v4934_v25  ;;  %v5280_v51 = vpack.i.bf16 %v2608_v16, %v2587_v46  ;;  %v2543_v61 = vld [vmem:[#allocation2 + $0x171] sm:$0xff]  ;;  %v7678_v46 = vld [vmem:[#allocation2 + $0x82] sm:$0xff] }
 0x3f3   : > { %v3781_v3 = vsel %vm3767_vm15, %v3748_v13, %v4948_v34  ;;  %v3749_v37 = vsel %vm3734_vm14, %v3716_v8, %v4944_v42  ;;  %v7666_v42 = vld [vmem:[#allocation2 + $0x182] sm:$0xff]  ;;  %v4963_v13 = vunpack.i.l.bf16 %v7587_v43  ;;  %v4824_v8 = vunpack.i.h.bf16 %v7406_v49 }
 0x3f4   : > { %v7650_v15 = vpop.permute.xlu0 %4991  ;;  %v4957_v60 = vpop.permute.xlu1 %4956  ;;  %4044 = vmatmul.mubr.f32.gmra.mrb[4].mxu1 %v3781_v3  ;;  %v3782_v35 = vsel %vm3767_vm15, %v3749_v37, %v4949_v57  ;;  %v4954_v57 = vunpack.i.h.bf16 %v7574_v28  ;;  %v5265_v3 = vpack.i.bf16 %v2543_v61, %v7623_v0  ;;  %v4973_v28 = vunpack.i.l.bf16 %v7604_v24 }
 0x3f5   : > { %v4958_v62 = vunpack.i.l.bf16 %v4957_v60  ;;  %4585 = vmatprep.mubr.msk.f32.mxu1 %vm1692_vm4, %v7303_v19  ;;  %v5290_v19 = vpack.i.bf16 %v2640_v44, %v2619_v48  ;;  %v4974_v49 = vunpack.i.h.bf16 %v7604_v24 }
 0x3f6   : > { %5246 = vrot.lane.b32.xlu1 %v5245_v10, %s5373_s18  ;;  %5281 = vrot.lane.b32.xlu0 %v5280_v51, %s5374_s23  ;;  %v4959_v10 = vunpack.i.h.bf16 %v4957_v60  ;;  %v3588_v60 = vsel %vm1692_vm4, %v7297_v47, %v4824_v8  ;;  %v4828_v47 = vunpack.i.l.bf16 %v7441_v1 }
 0x3f7   : > { %v3684_v25 = vsel %vm3668_vm12, %v3651_v4, %v4958_v62  ;;  %v4964_v62 = vunpack.i.h.bf16 %v7587_v43 }
 0x3f8   : > { %v7664_v34 = vpop.permute.xlu0 %5001  ;;  %v4967_v16 = vpop.permute.xlu1 %4966  ;;  %4049 = vmatmul.mubr.f32.gmra.mrb[6].mxu1 %v3782_v35  ;;  %v3717_v59 = vsel %vm3701_vm13, %v3684_v25, %v4963_v13 }
 0x3f9   : > { %v4968_v36 = vunpack.i.l.bf16 %v4967_v16  ;;  %4586 = vmatprep.mubr.msk.f32.mxu1 %vm1692_vm4, %v7330_v6  ;;  %v5300_v6 = vpack.i.bf16 %v7666_v42, %v7678_v46  ;;  %v4969_v37 = vunpack.i.h.bf16 %v4967_v16  ;;  %v3750_v33 = vsel %vm3734_vm14, %v3717_v59, %v4973_v28  ;;  %v2589_v59 = vld [vmem:[#allocation2 + $0xa8] sm:$0xff]  ;;  %v2610_v28 = vld [vmem:[#allocation2 + $0x1a0] sm:$0xff] }
 0x3fa   : > { %5256 = vrot.lane.b32.xlu1 %v7606_v31, %s5372_s14  ;;  %5291 = vrot.lane.b32.xlu0 %v5290_v19, %s5376_s9  ;;  %v5275_v16 = vpack.i.bf16 %v7610_v9, %v7636_v32 }
 0x3fb   : > { %v3619_v11 = vsel %vm1824_vm8, %v3587_v63, %v4968_v36  ;;  %v3620_v43 = vsel %vm1824_vm8, %v3588_v60, %v4969_v37  ;;  %v4983_v36 = vunpack.i.l.bf16 %v7633_v40  ;;  %v4984_v37 = vunpack.i.h.bf16 %v7633_v40 }
 0x3fc   : > { %v3652_v31 = vsel %vm3635_vm11, %v3619_v11, %v4954_v57  ;;  %v7687_v53 = vpop.permute.xlu0 %5011  ;;  %v4977_v0 = vpop.permute.xlu1 %4976 }
 0x3fd   : > { %v4978_v44 = vunpack.i.l.bf16 %v4977_v0  ;;  %v3685_v4 = vsel %vm3668_vm12, %v3652_v31, %v4959_v10  ;;  %v4979_v35 = vunpack.i.h.bf16 %v4977_v0  ;;  %v3653_v57 = vsel %vm3635_vm11, %v3620_v43, %v4983_v36 }
 0x3fe   : > { %5266 = vrot.lane.b32.xlu1 %v5265_v3, %s5375_s8  ;;  %5301 = vrot.lane.b32.xlu0 %v5300_v6, %s5373_s18  ;;  %v3718_v61 = vsel %vm3701_vm13, %v3685_v4, %v4964_v62  ;;  %v4829_v31 = vunpack.i.h.bf16 %v7441_v1  ;;  %v5330_v62 = vpack.i.bf16 %v2610_v28, %v2589_v59  ;;  %v5004_v1 = vunpack.i.h.bf16 %v7664_v34 }
 0x3ff   : > { %v3783_v48 = vsel %vm3767_vm15, %v3750_v33, %v4978_v44  ;;  %v3751_v13 = vsel %vm3734_vm14, %v3718_v61, %v4974_v49  ;;  %v5003_v49 = vunpack.i.l.bf16 %v7664_v34 }
 0x400   : > { %v7700_v25 = vpop.permute.xlu0 %5021  ;;  %v4987_v24 = vpop.permute.xlu1 %4986  ;;  %4054 = vmatmul.mubr.f32.gmra.mrb[8].mxu1 %v3783_v48  ;;  %v3784_v3 = vsel %vm3767_vm15, %v3751_v13, %v4979_v35  ;;  %v2609_v35 = vld [vmem:[#allocation2 + $0x198] sm:$0xff]  ;;  %v3590_v43 = vsel %vm1692_vm4, %v7317_v5, %v4829_v31 }
 0x401   : > { %v4988_v63 = vunpack.i.l.bf16 %v4987_v24  ;;  %4587 = vmatprep.mubr.msk.f32.mxu1 %vm1692_vm4, %v7325_v29  ;;  %v4993_v29 = vunpack.i.l.bf16 %v7650_v15  ;;  %v2620_v5 = vld [vmem:[#allocation2 + $0x99] sm:$0xff] }
 0x402   : > { %5276 = vrot.lane.b32.xlu1 %v5275_v16, %s5369_s26  ;;  %5311 = vrot.lane.b32.xlu0 %v5280_v51, %s5372_s14  ;;  %v3589_v51 = vsel %vm1692_vm4, %v7290_v22, %v4828_v47 }
 0x403   : > { %v3686_v8 = vsel %vm3668_vm12, %v3653_v57, %v4988_v63  ;;  %v2661_v63 = vld [vmem:[#allocation2 + $0x10a] sm:$0xff]  ;;  %v5013_v57 = vunpack.i.l.bf16 %v7687_v53 }
 0x404   : > { %v7714_v11 = vpop.permute.xlu0 %5031  ;;  %v4997_v6 = vpop.permute.xlu1 %4996  ;;  %4059 = vmatmul.mubr.f32.gmra.mrb[10].mxu1 %v3784_v3  ;;  %v3719_v44 = vsel %vm3701_vm13, %v3686_v8, %v4993_v29  ;;  %v2641_v8 = vld [vmem:[#allocation2 + $0x199] sm:$0xff] }
 0x405   : > { %v4998_v10 = vunpack.i.l.bf16 %v4997_v6  ;;  %4588 = vmatprep.mubr.msk.f32.mxu1 %vm1692_vm4, %v7350_v56  ;;  %v4989_v56 = vunpack.i.h.bf16 %v4987_v24  ;;  %v4999_v33 = vunpack.i.h.bf16 %v4997_v6  ;;  %v3752_v48 = vsel %vm3734_vm14, %v3719_v44, %v5003_v49  ;;  %v7759_v49 = vld [vmem:[#allocation2 + $0x18a] sm:$0xff] }
 0x406   : > { %5321 = vrot.lane.b32.xlu0 %v5290_v19, %s5375_s8  ;;  %5286 = vrot.lane.b32.xlu1 %v7591_v45, %s5372_s14  ;;  %v4994_v19 = vunpack.i.h.bf16 %v7650_v15  ;;  %v2588_v45 = vld [vmem:[#allocation2 + $0x98] sm:$0xff]  ;;  %v4833_v6 = vunpack.i.l.bf16 %v7414_v23  ;;  %v5315_v31 = vpack.i.bf16 %v2641_v8, %v2620_v5  ;;  %s4607_s14 = sshll.u32 %s8451_s25, 8 }
 0x407   : > { %v3621_v0 = vsel %vm1824_vm8, %v3589_v51, %v4998_v10  ;;  %v3622_v13 = vsel %vm1824_vm8, %v3590_v43, %v4999_v33  ;;  %v5014_v33 = vunpack.i.h.bf16 %v7687_v53  ;;  %s8061_s10 = scalar_lea.vmem %s8199_s7, %s4607_s14 }
 0x408   : > { %v3654_v22 = vsel %vm3635_vm11, %v3621_v0, %v4984_v37  ;;  %v7730_v4 = vpop.permute.xlu0 %5041  ;;  %v5007_v40 = vpop.permute.xlu1 %5006  ;;  %v3655_v59 = vsel %vm3635_vm11, %v3622_v13, %v5013_v57  ;;  %v2662_v37 = vld [vmem:[#allocation2 + $0x112] sm:$0xff]  ;;  %v4834_v0 = vunpack.i.h.bf16 %v7414_v23  ;;  %v2621_v13 = vld [vmem:[#allocation2 + $0xa9] sm:$0xff] }
 0x409   : > { %v5008_v60 = vunpack.i.l.bf16 %v5007_v40  ;;  %v3687_v61 = vsel %vm3668_vm12, %v3654_v22, %v4989_v56  ;;  %v5009_v24 = vunpack.i.h.bf16 %v5007_v40  ;;  %v3591_v56 = vsel %vm1692_vm4, %v7312_v55, %v4833_v6  ;;  %v7767_v23 = vld [vmem:[#allocation2 + $0x92] sm:$0xff] }
 0x40a   : > { %5331 = vrot.lane.b32.xlu0 %v5330_v62, %s5374_s23  ;;  %5296 = vrot.lane.b32.xlu1 %v7608_v38, %s5375_s8  ;;  %v3720_v16 = vsel %vm3701_vm13, %v3687_v61, %v4994_v19  ;;  %v5305_v38 = vpack.i.bf16 %v2609_v35, %v2588_v45  ;;  %v5023_v62 = vunpack.i.l.bf16 %v7700_v25  ;;  %v4783_v22 = vunpack.i.l.bf16 %v7375_v54  ;;  %v2386_v61 = vld [vmem:[#allocation2] sm:$0xff] }
 0x40b   : > { %v3785_v15 = vsel %vm3767_vm15, %v3752_v48, %v5008_v60  ;;  %v3753_v47 = vsel %vm3734_vm14, %v3720_v16, %v5004_v1  ;;  %v5033_v45 = vunpack.i.l.bf16 %v7714_v11  ;;  %v5325_v53 = vpack.i.bf16 %v7759_v49, %v7767_v23 }
 0x40c   : > { %v7744_v34 = vpop.permute.xlu0 %5051  ;;  %v5017_v36 = vpop.permute.xlu1 %5016  ;;  %4064 = vmatmul.mubr.f32.gmra.mrb[12].mxu1 %v3785_v15  ;;  %v3786_v28 = vsel %vm3767_vm15, %v3753_v47, %v5009_v24  ;;  %v3592_v43 = vsel %vm1692_vm4, %v7339_v12, %v4834_v0  ;;  %v4863_v24 = vunpack.i.l.bf16 %v7443_v27  ;;  %v5024_v15 = vunpack.i.h.bf16 %v7700_v25 }
 0x40d   : > { %v5018_v3 = vunpack.i.l.bf16 %v5017_v36  ;;  %4589 = vmatprep.mubr.msk.f32.mxu1 %vm1692_vm4, %v2661_v63  ;;  %v5019_v35 = vunpack.i.h.bf16 %v5017_v36  ;;  %v2642_v63 = vld [vmem:[#allocation2 + $0x1a1] sm:$0xff]  ;;  %v5034_v36 = vunpack.i.h.bf16 %v7714_v11  ;;  %v3571_v8 = vsel %vm1692_vm4, %v2386_v61, %v4783_v22 }
 0x40e   : > { %5306 = vrot.lane.b32.xlu1 %v5305_v38, %s5374_s23  ;;  %v5043_v38 = vunpack.i.l.bf16 %v7730_v4  ;;  %v5044_v6 = vunpack.i.h.bf16 %v7730_v4  ;;  %v5053_v4 = vunpack.i.l.bf16 %v7744_v34 }
 0x40f   : > { %v3688_v29 = vsel %vm3668_vm12, %v3655_v59, %v5018_v3 }
 0x410   : > { %v7754_v10 = vpop.permute.xlu0 %5061  ;;  %v5027_v51 = vpop.permute.xlu1 %5026  ;;  %4069 = vmatmul.mubr.f32.gmra.mrb[14].mxu1 %v3786_v28  ;;  %v3721_v60 = vsel %vm3701_vm13, %v3688_v29, %v5023_v62  ;;  %v2663_v28 = vld [vmem:[#allocation2 + $0x122] sm:$0xff]  ;;  %v5335_v29 = vpack.i.bf16 %v2642_v63, %v2621_v13  ;;  %v2644_v13 = vld [vmem:[#allocation2 + $0x3a] sm:$0xff] }
 0x411   : > { %v5028_v44 = vunpack.i.l.bf16 %v5027_v51  ;;  %4590 = vmatprep.mubr.msk.f32.mxu1 %vm1692_vm4, %v2662_v37  ;;  %v5029_v40 = vunpack.i.h.bf16 %v5027_v51  ;;  %v3754_v47 = vsel %vm3734_vm14, %v3721_v60, %v5033_v45  ;;  %v3603_v37 = vsel %vm1824_vm8, %v3571_v8, %v4863_v24 }
 0x412   : > { %5316 = vrot.lane.b32.xlu1 %v5315_v31, %s5376_s9  ;;  %v3636_v62 = vsel %vm3635_vm11, %v3603_v37, %v5043_v38  ;;  %v5063_v60 = vunpack.i.l.bf16 %v7754_v10  ;;  %v2387_v38 = vld [vmem:[#allocation2 + $0x8] sm:$0xff] }
 0x413   : > { %v3623_v19 = vsel %vm1824_vm8, %v3591_v56, %v5028_v44  ;;  %v3624_v3 = vsel %vm1824_vm8, %v3592_v43, %v5029_v40  ;;  %v5054_v44 = vunpack.i.h.bf16 %v7744_v34  ;;  %v2664_v34 = vld [vmem:[#allocation2 + $0x12a] sm:$0xff] }
 0x414   : > { %v3656_v1 = vsel %vm3635_vm11, %v3623_v19, %v5014_v33  ;;  %v5072_v48 = vpop.permute.xlu0 %5071  ;;  %v5037_v55 = vpop.permute.xlu1 %5036  ;;  %v3657_v56 = vsel %vm3635_vm11, %v3624_v3, %v5044_v6  ;;  %v5064_v19 = vunpack.i.h.bf16 %v7754_v10 }
 0x415   : > { %v5038_v16 = vunpack.i.l.bf16 %v5037_v55  ;;  %v3689_v57 = vsel %vm3668_vm12, %v3656_v1, %v5019_v35  ;;  %v5039_v12 = vunpack.i.h.bf16 %v5037_v55  ;;  %v5074_v61 = vunpack.i.h.bf16 %v5072_v48 }
 0x416   : > { %5326 = vrot.lane.b32.xlu1 %v5325_v53, %s5373_s18  ;;  %v3722_v25 = vsel %vm3701_vm13, %v3689_v57, %v5024_v15  ;;  %v5073_v53 = vunpack.i.l.bf16 %v5072_v48  ;;  %v4784_v48 = vunpack.i.h.bf16 %v7375_v54 }
 0x417   : > { %v3787_v5 = vsel %vm3767_vm15, %v3754_v47, %v5038_v16  ;;  %v3755_v51 = vsel %vm3734_vm14, %v3722_v25, %v5034_v36  ;;  %v4838_v36 = vunpack.i.l.bf16 %v7454_v7  ;;  %v4864_v47 = vunpack.i.h.bf16 %v7443_v27 }
 0x418   : > { %v7788_v11 = vpop.permute.xlu0 %5081  ;;  %v5047_v59 = vpop.permute.xlu1 %5046  ;;  %4074 = vmatmul.mubr.f32.gmra.mrb[16].mxu1 %v3787_v5  ;;  %v3788_v40 = vsel %vm3767_vm15, %v3755_v51, %v5039_v12 }
 0x419   : > { %v5049_v31 = vunpack.i.h.bf16 %v5047_v59  ;;  %v5048_v0 = vunpack.i.l.bf16 %v5047_v59  ;;  %4591 = vmatprep.mubr.msk.f32.mxu1 %vm1692_vm4, %v2663_v28  ;;  %v3572_v59 = vsel %vm1692_vm4, %v2387_v38, %v4784_v48 }
 0x41a   : > { %5336 = vrot.lane.b32.xlu1 %v5335_v29, %s5376_s9  ;;  %v3604_v54 = vsel %vm1824_vm8, %v3572_v59, %v4864_v47  ;;  %v4843_v59 = vunpack.i.l.bf16 %v7420_v26 }
 0x41b   : > { %v3669_v33 = vsel %vm3668_vm12, %v3636_v62, %v5048_v0  ;;  %v3690_v22 = vsel %vm3668_vm12, %v3657_v56, %v5049_v31 }
 0x41c   : > { %v3702_v45 = vsel %vm3701_vm13, %v3669_v33, %v5053_v4  ;;  %v7804_v35 = vpop.permute.xlu0 %5091  ;;  %v7806_v1 = vpop.permute.xlu1 %5056  ;;  %4079 = vmatmul.mubr.f32.gmra.mrb[18].mxu1 %v3788_v40  ;;  %v3723_v55 = vsel %vm3701_vm13, %v3690_v22, %v5054_v44  ;;  %v5084_v4 = vunpack.i.h.bf16 %v7788_v11 }
 0x41d   : > { %4592 = vmatprep.mubr.msk.f32.mxu1 %vm1692_vm4, %v2664_v34  ;;  %v3735_v43 = vsel %vm3734_vm14, %v3702_v45, %v5063_v60  ;;  %v3756_v24 = vsel %vm3734_vm14, %v3723_v55, %v5064_v19  ;;  %v5058_v57 = vunpack.i.l.bf16 %v7806_v1  ;;  %v4839_v55 = vunpack.i.h.bf16 %v7454_v7  ;;  %v5345_v7 = vld [vmem:[#allocation2 + $0x110] sm:$0xff] }
 0x41e   : > { %v3768_v10 = vsel %vm3767_vm15, %v3735_v43, %v5073_v53  ;;  %v3789_v63 = vsel %vm3767_vm15, %v3756_v24, %v5074_v61  ;;  %v5094_v48 = vunpack.i.h.bf16 %v7804_v35 }
 0x41f   : > { %3979 = vmatmul.mubr.f32.vlgmr.msra.gmra.mrb[32].mxu0 %v3768_v10  ;;  %v2645_v10 = vld [vmem:[#allocation2 + $0x4a] sm:$0xff] }
 0x420   : > { %v7813_v15 = vpop.permute.xlu0 %5101  ;;  %v5067_v16 = vpop.permute.xlu1 %5066  ;;  %4572 = vmatprep.mubr.msk.f32.mxu0 %vm1692_vm4, %v2644_v13  ;;  %4084 = vmatmul.mubr.f32.gmra.mrb[20].mxu1 %v3789_v63  ;;  %v5093_v13 = vunpack.i.l.bf16 %v7804_v35  ;;  %v3594_v63 = vsel %vm1692_vm4, %v5345_v7, %v4839_v55  ;;  %v2646_v55 = vld [vmem:[#allocation2 + $0x52] sm:$0xff]  ;;  %v4844_v7 = vunpack.i.h.bf16 %v7420_v26 }
 0x421   : > { %4593 = vmatprep.mubr.msk.f32.mxu1 %vm1692_vm4, %v7459_v30  ;;  %v5069_v5 = vunpack.i.h.bf16 %v5067_v16  ;;  %v5068_v25 = vunpack.i.l.bf16 %v5067_v16  ;;  %v3593_v30 = vsel %vm1692_vm4, %v7334_v18, %v4838_v36  ;;  %v5083_v18 = vunpack.i.l.bf16 %v7788_v11  ;;  %v2666_v16 = vld [vmem:[#allocation2 + $0x142] sm:$0xff] }
 0x422   : > { %v3625_v28 = vsel %vm1824_vm8, %v3593_v30, %v5058_v57  ;;  %v5059_v11 = vunpack.i.h.bf16 %v7806_v1  ;;  %v5103_v1 = vunpack.i.l.bf16 %v7813_v15  ;;  %v5104_v38 = vunpack.i.h.bf16 %v7813_v15 }
 0x423   : > { %v3637_v51 = vsel %vm3635_vm11, %v3604_v54, %v5068_v25  ;;  %v3658_v37 = vsel %vm3635_vm11, %v3625_v28, %v5069_v5  ;;  %v3638_v25 = vsel %vm3635_vm11, %v7518_v20, %v5093_v13 }
 0x424   : > { %v7823_v3 = vpop.permute.xlu0 %5111  ;;  %v5077_v12 = vpop.permute.xlu1 %5076  ;;  %v3626_v36 = vsel %vm1824_vm8, %v3594_v63, %v5059_v11  ;;  %v3671_v35 = vsel %vm3668_vm12, %v3638_v25, %v5103_v1 }
 0x425   : > { %v5079_v8 = vunpack.i.h.bf16 %v5077_v12  ;;  %v5078_v6 = vunpack.i.l.bf16 %v5077_v12  ;;  %v3659_v30 = vsel %vm3635_vm11, %v3626_v36, %v5094_v48  ;;  %v5113_v28 = vunpack.i.l.bf16 %v7823_v3 }
 0x426   : > { %v3692_v54 = vsel %vm3668_vm12, %v3659_v30, %v5104_v38 }
 0x427   : > { %v3670_v31 = vsel %vm3668_vm12, %v3637_v51, %v5078_v6  ;;  %v3691_v0 = vsel %vm3668_vm12, %v3658_v37, %v5079_v8 }
 0x428   : > { %v7830_v29 = vpop.permute.xlu0 %5121  ;;  %v5087_v27 = vpop.permute.xlu1 %5086  ;;  %v3703_v19 = vsel %vm3701_vm13, %v3670_v31, %v5083_v18  ;;  %v3724_v60 = vsel %vm3701_vm13, %v3691_v0, %v5084_v4 }
 0x429   : > { %v5089_v62 = vunpack.i.h.bf16 %v5087_v27  ;;  %v5088_v44 = vunpack.i.l.bf16 %v5087_v27  ;;  %v5124_v15 = vunpack.i.h.bf16 %v7830_v29  ;;  %v5123_v27 = vunpack.i.l.bf16 %v7830_v29 }
 0x42b   : > { %v3736_v45 = vsel %vm3734_vm14, %v3703_v19, %v5088_v44  ;;  %v3757_v34 = vsel %vm3734_vm14, %v3724_v60, %v5089_v62 }
 0x42c   : > { %v7838_v56 = vpop.permute.xlu0 %5131  ;;  %v5097_v33 = vpop.permute.xlu1 %5096 }
 0x42d   : > { %v5099_v22 = vunpack.i.h.bf16 %v5097_v33  ;;  %v5098_v40 = vunpack.i.l.bf16 %v5097_v33  ;;  %v5134_v44 = vunpack.i.h.bf16 %v7838_v56  ;;  %v5133_v4 = vunpack.i.l.bf16 %v7838_v56 }
 0x42e   : > { %v3639_v56 = vsel %vm3635_vm11, %v7515_v17, %v5123_v27 }
 0x42f   : > { %v3769_v53 = vsel %vm3767_vm15, %v3736_v45, %v5098_v40  ;;  %v3790_v61 = vsel %vm3767_vm15, %v3757_v34, %v5099_v22  ;;  %v5346_v22 = vld [vmem:[#allocation2 + $0x120] sm:$0xff] }
 0x430   : > { %v7848_v43 = vpop.permute.xlu0 %5141  ;;  %v5107_v24 = vpop.permute.xlu1 %5106  ;;  %3984 = vmatmul.mubr.f32.gmra.mrb[34].mxu0 %v3769_v53  ;;  %4089 = vmatmul.mubr.f32.gmra.mrb[22].mxu1 %v3790_v61  ;;  %v3595_v29 = vsel %vm1692_vm4, %v5346_v22, %v4843_v59 }
 0x431   : > { %4573 = vmatprep.mubr.msk.f32.mxu0 %vm1692_vm4, %v2645_v10  ;;  %4594 = vmatprep.mubr.msk.f32.mxu1 %vm1692_vm4, %v2666_v16  ;;  %v5109_v12 = vunpack.i.h.bf16 %v5107_v24  ;;  %v5108_v5 = vunpack.i.l.bf16 %v5107_v24  ;;  %v3627_v60 = vsel %vm1824_vm8, %v3595_v29, %v5113_v28  ;;  %v3672_v24 = vsel %vm3668_vm12, %v3639_v56, %v5133_v4 }
 0x432   : > { %v3660_v53 = vsel %vm3635_vm11, %v3627_v60, %v5124_v15  ;;  %v5144_v16 = vunpack.i.h.bf16 %v7848_v43  ;;  %v5143_v13 = vunpack.i.l.bf16 %v7848_v43 }
 0x433   : > { %v3704_v0 = vsel %vm3701_vm13, %v3671_v35, %v5108_v5  ;;  %v3725_v62 = vsel %vm3701_vm13, %v3692_v54, %v5109_v12  ;;  %v3693_v10 = vsel %vm3668_vm12, %v3660_v53, %v5134_v44  ;;  %v5114_v12 = vunpack.i.h.bf16 %v7823_v3 }
 0x434   : > { %v5152_v47 = vpop.permute.xlu0 %5151  ;;  %v5117_v57 = vpop.permute.xlu1 %5116 }
 0x435   : > { %v5119_v8 = vunpack.i.h.bf16 %v5117_v57  ;;  %v5118_v6 = vunpack.i.l.bf16 %v5117_v57  ;;  %v5154_v48 = vunpack.i.h.bf16 %v5152_v47  ;;  %v5153_v1 = vunpack.i.l.bf16 %v5152_v47 }
 0x437   : > { %v3737_v18 = vsel %vm3734_vm14, %v3704_v0, %v5118_v6  ;;  %v3758_v33 = vsel %vm3734_vm14, %v3725_v62, %v5119_v8  ;;  %v2647_v8 = vld [vmem:[#allocation2 + $0x62] sm:$0xff] }
 0x438   : > { %v7867_v51 = vpop.permute.xlu0 %5161  ;;  %v5127_v37 = vpop.permute.xlu1 %5126  ;;  %v5347_v6 = vld [vmem:[#allocation2 + $0x128] sm:$0xff] }
 0x439   : > { %v5129_v20 = vunpack.i.h.bf16 %v5127_v37  ;;  %v5128_v31 = vunpack.i.l.bf16 %v5127_v37  ;;  %v3596_v47 = vsel %vm1692_vm4, %v5347_v6, %v4844_v7  ;;  %v5164_v28 = vunpack.i.h.bf16 %v7867_v51 }
 0x43a   : > { %v3628_v3 = vsel %vm1824_vm8, %v3596_v47, %v5114_v12  ;;  %v5163_v15 = vunpack.i.l.bf16 %v7867_v51  ;;  %v4849_v6 = vunpack.i.h.bf16 %v7474_v21 }
 0x43b   : > { %v3770_v40 = vsel %vm3767_vm15, %v3737_v18, %v5128_v31  ;;  %v3791_v19 = vsel %vm3767_vm15, %v3758_v33, %v5129_v20 }
 0x43c   : > { %v5172_v45 = vpop.permute.xlu0 %5171  ;;  %v5137_v34 = vpop.permute.xlu1 %5136  ;;  %3989 = vmatmul.mubr.f32.gmra.mrb[36].mxu0 %v3770_v40  ;;  %4094 = vmatmul.mubr.f32.gmra.mrb[24].mxu1 %v3791_v19 }
 0x43d   : > { %v5139_v61 = vunpack.i.h.bf16 %v5137_v34  ;;  %v5138_v11 = vunpack.i.l.bf16 %v5137_v34  ;;  %4574 = vmatprep.mubr.msk.f32.mxu0 %vm1692_vm4, %v2646_v55  ;;  %4595 = vmatprep.mubr.msk.f32.mxu1 %vm1692_vm4, %v7496_v14  ;;  %v5173_v0 = vunpack.i.l.bf16 %v5172_v45 }
 0x43f   : > { %v3705_v17 = vsel %vm3701_vm13, %v3672_v24, %v5138_v11  ;;  %v3726_v63 = vsel %vm3701_vm13, %v3693_v10, %v5139_v61  ;;  %v5348_v10 = vld [vmem:[#allocation2 + $0x138] sm:$0xff] }
 0x440   : > { %v5182_v36 = vpop.permute.xlu0 %5181  ;;  %v5147_v38 = vpop.permute.xlu1 %5146  ;;  %v3738_v14 = vsel %vm3734_vm14, %v3705_v17, %v5143_v13  ;;  %v3759_v57 = vsel %vm3734_vm14, %v3726_v63, %v5144_v16 }
 0x441   : > { %v5149_v5 = vunpack.i.h.bf16 %v5147_v38  ;;  %v5148_v25 = vunpack.i.l.bf16 %v5147_v38  ;;  %v3771_v43 = vsel %vm3767_vm15, %v3738_v14, %v5153_v1  ;;  %v3792_v26 = vsel %vm3767_vm15, %v3759_v57, %v5154_v48 }
 0x442   : > { %3994 = vmatmul.mubr.f32.gmra.mrb[38].mxu0 %v3771_v43  ;;  %4099 = vmatmul.mubr.f32.gmra.mrb[26].mxu1 %v3792_v26  ;;  %v5183_v33 = vunpack.i.l.bf16 %v5182_v36  ;;  %v5184_v51 = vunpack.i.h.bf16 %v5182_v36 }
 0x443   : > { %4575 = vmatprep.mubr.msk.f32.mxu0 %vm1692_vm4, %v2647_v8  ;;  %4596 = vmatprep.mubr.msk.f32.mxu1 %vm1692_vm4, %v7542_v50  ;;  %v3661_v27 = vsel %vm3635_vm11, %v3628_v3, %v5149_v5  ;;  %v3640_v37 = vsel %vm3635_vm11, %v7472_v52, %v5148_v25  ;;  %v5174_v50 = vunpack.i.h.bf16 %v5172_v45  ;;  %v4848_v45 = vunpack.i.l.bf16 %v7474_v21 }
 0x444   : > { %v5192_v59 = vpop.permute.xlu0 %5191  ;;  %v5157_v30 = vpop.permute.xlu1 %5156 }
 0x445   : > { %v5159_v35 = vunpack.i.h.bf16 %v5157_v30  ;;  %v5158_v54 = vunpack.i.l.bf16 %v5157_v30  ;;  %v3597_v16 = vsel %vm1692_vm4, %v5348_v10, %v4848_v45  ;;  %v5194_v38 = vunpack.i.h.bf16 %v5192_v59 }
 0x446   : > { %v5193_v14 = vunpack.i.l.bf16 %v5192_v59 }
 0x447   : > { %v3673_v20 = vsel %vm3668_vm12, %v3640_v37, %v5158_v54  ;;  %v3694_v31 = vsel %vm3668_vm12, %v3661_v27, %v5159_v35  ;;  %v2649_v54 = vld [vmem:[#allocation2 + $0x7a] sm:$0xff] }
 0x448   : > { %v7909_v62 = vpop.permute.xlu0 %5201  ;;  %v5167_v44 = vpop.permute.xlu1 %5166  ;;  %v3706_v4 = vsel %vm3701_vm13, %v3673_v20, %v5163_v15  ;;  %v3727_v18 = vsel %vm3701_vm13, %v3694_v31, %v5164_v28  ;;  %v5349_v15 = vld [vmem:[#allocation2 + $0x140] sm:$0xff] }
 0x449   : > { %v3739_v22 = vsel %vm3734_vm14, %v3706_v4, %v5173_v0  ;;  %v3760_v29 = vsel %vm3734_vm14, %v3727_v18, %v5174_v50  ;;  %v5168_v34 = vunpack.i.l.bf16 %v5167_v44  ;;  %v5169_v59 = vunpack.i.h.bf16 %v5167_v44 }
 0x44a   : > { %v3772_v52 = vsel %vm3767_vm15, %v3739_v22, %v5183_v33  ;;  %v3793_v40 = vsel %vm3767_vm15, %v3760_v29, %v5184_v51  ;;  %v5203_v28 = vunpack.i.l.bf16 %v7909_v62  ;;  %v3598_v21 = vsel %vm1692_vm4, %v5349_v15, %v4849_v6 }
 0x44b   : > { %3999 = vmatmul.mubr.f32.gmra.mrb[40].mxu0 %v3772_v52  ;;  %4104 = vmatmul.mubr.f32.gmra.mrb[28].mxu1 %v3793_v40  ;;  %v3629_v13 = vsel %vm1824_vm8, %v3597_v16, %v5168_v34  ;;  %v5204_v27 = vunpack.i.h.bf16 %v7909_v62  ;;  %v3630_v20 = vsel %vm1824_vm8, %v3598_v21, %v5169_v59  ;;  %v4853_v51 = vunpack.i.l.bf16 %v7430_v39  ;;  %v5350_v16 = vld [vmem:[#allocation2 + $0x150] sm:$0xff] }
 0x44c   : > { %v7917_v19 = vpop.permute.xlu0 %5211  ;;  %v5177_v60 = vpop.permute.xlu1 %5176  ;;  %4576 = vmatprep.mubr.msk.f32.mxu0 %vm1692_vm4, %v7646_v58  ;;  %4597 = vmatprep.mubr.msk.f32.mxu1 %vm1692_vm4, %v7636_v32 }
 0x44d   : > { %v5179_v53 = vunpack.i.h.bf16 %v5177_v60  ;;  %v5178_v61 = vunpack.i.l.bf16 %v5177_v60  ;;  %v5213_v37 = vunpack.i.l.bf16 %v7917_v19  ;;  %v5214_v31 = vunpack.i.h.bf16 %v7917_v19 }
 0x44e   : > { %v3663_v22 = vsel %vm3635_vm11, %v3630_v20, %v5204_v27 }
 0x44f   : > { %v3641_v32 = vsel %vm3635_vm11, %v7469_v41, %v5178_v61  ;;  %v3662_v17 = vsel %vm3635_vm11, %v3629_v13, %v5179_v53  ;;  %v3696_v29 = vsel %vm3668_vm12, %v3663_v22, %v5214_v31  ;;  %v3599_v13 = vsel %vm1692_vm4, %v5350_v16, %v4853_v51 }
 0x450   : > { %v7924_v55 = vpop.permute.xlu0 %5221  ;;  %v5187_v56 = vpop.permute.xlu1 %5186 }
 0x451   : > { %v5189_v11 = vunpack.i.h.bf16 %v5187_v56  ;;  %v5188_v24 = vunpack.i.l.bf16 %v5187_v56  ;;  %v5223_v52 = vunpack.i.l.bf16 %v7924_v55 }
 0x453   : > { %v3674_v63 = vsel %vm3668_vm12, %v3641_v32, %v5188_v24  ;;  %v3695_v48 = vsel %vm3668_vm12, %v3662_v17, %v5189_v11  ;;  %v3631_v32 = vsel %vm1824_vm8, %v3599_v13, %v5223_v52 }
 0x454   : > { %v7928_v7 = vpop.permute.xlu0 %5231  ;;  %v5197_v58 = vpop.permute.xlu1 %5196  ;;  %v3707_v43 = vsel %vm3701_vm13, %v3674_v63, %v5193_v14  ;;  %v3728_v26 = vsel %vm3701_vm13, %v3695_v48, %v5194_v38  ;;  %v8444_v48 = vld [vmem:[#allocation32_spill] sm:$0xff] }
 0x455   : > { %v5199_v1 = vunpack.i.h.bf16 %v5197_v58  ;;  %v5198_v36 = vunpack.i.l.bf16 %v5197_v58  ;;  %v5234_v40 = vunpack.i.h.bf16 %v7928_v7  ;;  %v5233_v19 = vunpack.i.l.bf16 %v7928_v7 }
 0x457   : > { %v3740_v41 = vsel %vm3734_vm14, %v3707_v43, %v5198_v36  ;;  %v3761_v8 = vsel %vm3734_vm14, %v3728_v26, %v5199_v1  ;;  %v3664_v63 = vsel %vm3635_vm11, %v3631_v32, %v5234_v40  ;;  %v3643_v1 = vsel %vm3635_vm11, %v8444_v48, %v5233_v19  ;;  %v5352_v32 = vld [vmem:[#allocation2 + $0x168] sm:$0xff] }
 0x458   : > { %v7935_v57 = vpop.permute.xlu0 %5241  ;;  %v5207_v12 = vpop.permute.xlu1 %5206 }
 0x459   : > { %v5209_v5 = vunpack.i.h.bf16 %v5207_v12  ;;  %v5208_v25 = vunpack.i.l.bf16 %v5207_v12  ;;  %v5244_v61 = vunpack.i.h.bf16 %v7935_v57  ;;  %v5243_v11 = vunpack.i.l.bf16 %v7935_v57 }
 0x45b   : > { %v3773_v47 = vsel %vm3767_vm15, %v3740_v41, %v5208_v25  ;;  %v3794_v30 = vsel %vm3767_vm15, %v3761_v8, %v5209_v5  ;;  %v3676_v14 = vsel %vm3668_vm12, %v3643_v1, %v5243_v11  ;;  %v3697_v57 = vsel %vm3668_vm12, %v3664_v63, %v5244_v61 }
 0x45c   : > { %v5217_v3 = vpop.permute.xlu1 %5216  ;;  %4004 = vmatmul.mubr.f32.gmra.mrb[42].mxu0 %v3773_v47  ;;  %4109 = vmatmul.mubr.f32.gmra.mrb[30].mxu1 %v3794_v30  ;;  %v7944_v35 = vpop.permute.xlu0 %5251  ;;  %v4854_v25 = vunpack.i.h.bf16 %v7430_v39  ;;  %v5224_v30 = vunpack.i.h.bf16 %v7924_v55 }
 0x45d   : > { %4577 = vmatprep.mubr.msk.f32.mxu0 %vm1692_vm4, %v2649_v54  ;;  %4598 = vmatprep.mubr.msk.f32.mxu1 %vm1692_vm4, %v7610_v9  ;;  %v5219_v44 = vunpack.i.h.bf16 %v5217_v3  ;;  %v5218_v4 = vunpack.i.l.bf16 %v5217_v3  ;;  %v3642_v9 = vsel %vm3635_vm11, %v7535_v2, %v5203_v28  ;;  %v5254_v12 = vunpack.i.h.bf16 %v7944_v35  ;;  %v5351_v54 = vld [vmem:[#allocation2 + $0x158] sm:$0xff] }
 0x45e   : > { %v3675_v62 = vsel %vm3668_vm12, %v3642_v9, %v5213_v37  ;;  %v5253_v5 = vunpack.i.l.bf16 %v7944_v35  ;;  %v3600_v28 = vsel %vm1692_vm4, %v5351_v54, %v4854_v25 }
 0x45f   : > { %v3708_v56 = vsel %vm3701_vm13, %v3675_v62, %v5218_v4  ;;  %v3729_v53 = vsel %vm3701_vm13, %v3696_v29, %v5219_v44  ;;  %v3632_v55 = vsel %vm1824_vm8, %v3600_v28, %v5224_v30 }
 0x460   : > { %v5227_v50 = vpop.permute.xlu1 %5226  ;;  %v5262_v0 = vpop.permute.xlu0 %5261 }
 0x461   : > { %v5229_v18 = vunpack.i.h.bf16 %v5227_v50  ;;  %v5228_v33 = vunpack.i.l.bf16 %v5227_v50  ;;  %v5264_v8 = vunpack.i.h.bf16 %v5262_v0 }
 0x463   : > { %v3741_v24 = vsel %vm3734_vm14, %v3708_v56, %v5228_v33  ;;  %v3762_v10 = vsel %vm3734_vm14, %v3729_v53, %v5229_v18  ;;  %v8446_v56 = vld [vmem:[#allocation38_spill] sm:$0xff] }
 0x464   : > { %v5237_v60 = vpop.permute.xlu1 %5236  ;;  %v5272_v2 = vpop.permute.xlu0 %5271  ;;  %v4858_v53 = vunpack.i.l.bf16 %v8446_v56 }
 0x465   : > { %v5239_v45 = vunpack.i.h.bf16 %v5237_v60  ;;  %v5238_v34 = vunpack.i.l.bf16 %v5237_v60  ;;  %v5274_v20 = vunpack.i.h.bf16 %v5272_v2  ;;  %v5273_v31 = vunpack.i.l.bf16 %v5272_v2  ;;  %v2673_v60 = vld [vmem:[#allocation2 + $0x19a] sm:$0xff] }
 0x467   : > { %v3774_v7 = vsel %vm3767_vm15, %v3741_v24, %v5238_v34  ;;  %v3795_v58 = vsel %vm3767_vm15, %v3762_v10, %v5239_v45  ;;  %v2652_v34 = vld [vmem:[#allocation2 + $0x9a] sm:$0xff] }
 0x468   : > { %v5247_v17 = vpop.permute.xlu1 %5246  ;;  %4009 = vmatmul.mubr.f32.gmra.mrb[44].mxu0 %v3774_v7  ;;  %4114 = vmatmul.mubr.f32.gmra.mrb[32].mxu1 %v3795_v58  ;;  %v5282_v43 = vpop.permute.xlu0 %5281  ;;  %v4859_v58 = vunpack.i.h.bf16 %v8446_v56 }
 0x469   : > { %v5249_v36 = vunpack.i.h.bf16 %v5247_v17  ;;  %v5248_v38 = vunpack.i.l.bf16 %v5247_v17  ;;  %4578 = vmatprep.mubr.msk.f32.mxu0 %vm1692_vm4, %v7678_v46  ;;  %4599 = vmatprep.mubr.msk.f32.mxu1 %vm1692_vm4, %v7666_v42  ;;  %v5263_v46 = vunpack.i.l.bf16 %v5262_v0  ;;  %v8445_v0 = vld [vmem:[#allocation30_spill] sm:$0xff]  ;;  %v5284_v9 = vunpack.i.h.bf16 %v5282_v43 }
 0x46a   : > { %v5283_v18 = vunpack.i.l.bf16 %v5282_v43  ;;  %v3601_v17 = vsel %vm1692_vm4, %v5352_v32, %v4858_v53  ;;  %v8448_v43 = vld [vmem:[#allocation31_spill] sm:$0xff] }
 0x46b   : > { %v3709_v26 = vsel %vm3701_vm13, %v3676_v14, %v5248_v38  ;;  %v3730_v41 = vsel %vm3701_vm13, %v3697_v57, %v5249_v36  ;;  %v8447_v38 = vld [vmem:[#allocation33_spill] sm:$0xff] }
 0x46c   : > { %v5257_v6 = vpop.permute.xlu1 %5256  ;;  %v3742_v42 = vsel %vm3734_vm14, %v3709_v26, %v5253_v5  ;;  %v3763_v47 = vsel %vm3734_vm14, %v3730_v41, %v5254_v12  ;;  %v5292_v21 = vpop.permute.xlu0 %5291  ;;  %v4808_v26 = vunpack.i.l.bf16 %v8448_v43  ;;  %v5353_v41 = vld [vmem:[#allocation2 + $0x170] sm:$0xff] }
 0x46d   : > { %v5259_v59 = vunpack.i.h.bf16 %v5257_v6  ;;  %v5258_v3 = vunpack.i.l.bf16 %v5257_v6  ;;  %v3775_v35 = vsel %vm3767_vm15, %v3742_v42, %v5263_v46  ;;  %v3796_v39 = vsel %vm3767_vm15, %v3763_v47, %v5264_v8  ;;  %v8449_v47 = vld [vmem:[#allocation39_spill] sm:$0xff] }
 0x46e   : > { %4014 = vmatmul.mubr.f32.gmra.mrb[46].mxu0 %v3775_v35  ;;  %4119 = vmatmul.mubr.f32.gmra.mrb[34].mxu1 %v3796_v39  ;;  %v5293_v22 = vunpack.i.l.bf16 %v5292_v21  ;;  %v5294_v62 = vunpack.i.h.bf16 %v5292_v21  ;;  %v3602_v8 = vsel %vm1692_vm4, %v5353_v41, %v4859_v58  ;;  %v4888_v30 = vunpack.i.l.bf16 %v8449_v47  ;;  %v2396_v21 = vld [vmem:[#allocation2 + $0x78] sm:$0xff] }
 0x46f   : > { %4579 = vmatprep.mubr.msk.f32.mxu0 %vm1692_vm4, %v7767_v23  ;;  %4600 = vmatprep.mubr.msk.f32.mxu1 %vm1692_vm4, %v7759_v49  ;;  %v3665_v50 = vsel %vm3635_vm11, %v3632_v55, %v5259_v59  ;;  %v3644_v44 = vsel %vm3635_vm11, %v8445_v0, %v5258_v3  ;;  %v3581_v0 = vsel %vm1692_vm4, %v2396_v21, %v4808_v26 }
 0x470   : > { %v5267_v15 = vpop.permute.xlu1 %5266  ;;  %v5302_v40 = vpop.permute.xlu0 %5301 }
 0x471   : > { %v5269_v27 = vunpack.i.h.bf16 %v5267_v15  ;;  %v5268_v37 = vunpack.i.l.bf16 %v5267_v15  ;;  %v5304_v46 = vunpack.i.h.bf16 %v5302_v40  ;;  %v5303_v6 = vunpack.i.l.bf16 %v5302_v40 }
 0x473   : > { %v3677_v4 = vsel %vm3668_vm12, %v3644_v44, %v5268_v37  ;;  %v3698_v23 = vsel %vm3668_vm12, %v3665_v50, %v5269_v27  ;;  %v2674_v50 = vld [vmem:[#allocation2 + $0x1a2] sm:$0xff] }
 0x474   : > { %v5277_v49 = vpop.permute.xlu1 %5276  ;;  %v3710_v33 = vsel %vm3701_vm13, %v3677_v4, %v5273_v31  ;;  %v3731_v51 = vsel %vm3701_vm13, %v3698_v23, %v5274_v20  ;;  %v5312_v24 = vpop.permute.xlu0 %5311  ;;  %v3613_v23 = vsel %vm1824_vm8, %v3581_v0, %v4888_v30 }
 0x475   : > { %v3743_v29 = vsel %vm3734_vm14, %v3710_v33, %v5283_v18  ;;  %v3764_v52 = vsel %vm3734_vm14, %v3731_v51, %v5284_v9  ;;  %v5278_v61 = vunpack.i.l.bf16 %v5277_v49  ;;  %v5279_v63 = vunpack.i.h.bf16 %v5277_v49  ;;  %v2653_v18 = vld [vmem:[#allocation2 + $0xaa] sm:$0xff] }
 0x476   : > { %v3776_v19 = vsel %vm3767_vm15, %v3743_v29, %v5293_v22  ;;  %v3797_v45 = vsel %vm3767_vm15, %v3764_v52, %v5294_v62  ;;  %v5314_v3 = vunpack.i.h.bf16 %v5312_v24  ;;  %v5313_v35 = vunpack.i.l.bf16 %v5312_v24 }
 0x477   : > { %4019 = vmatmul.mubr.f32.gmra.mrb[48].mxu0 %v3776_v19  ;;  %4124 = vmatmul.mubr.f32.gmra.mrb[36].mxu1 %v3797_v45  ;;  %v3633_v48 = vsel %vm1824_vm8, %v3601_v17, %v5278_v61  ;;  %v3634_v59 = vsel %vm1824_vm8, %v3602_v8, %v5279_v63 }
 0x478   : > { %v5287_v2 = vpop.permute.xlu1 %5286  ;;  %4580 = vmatprep.mubr.msk.f32.mxu0 %vm1692_vm4, %v2652_v34  ;;  %4601 = vmatprep.mubr.msk.f32.mxu1 %vm1692_vm4, %v2673_v60  ;;  %v5322_v42 = vpop.permute.xlu0 %5321  ;;  %v3667_v49 = vsel %vm3635_vm11, %v3634_v59, %v5314_v3  ;;  %v3646_v33 = vsel %vm3635_vm11, %v3613_v23, %v5313_v35 }
 0x479   : > { %v5289_v10 = vunpack.i.h.bf16 %v5287_v2  ;;  %v5288_v16 = vunpack.i.l.bf16 %v5287_v2  ;;  %v5324_v27 = vunpack.i.h.bf16 %v5322_v42  ;;  %v5323_v37 = vunpack.i.l.bf16 %v5322_v42 }
 0x47b   : > { %v3666_v36 = vsel %vm3635_vm11, %v3633_v48, %v5289_v10  ;;  %v3645_v14 = vsel %vm3635_vm11, %v8447_v38, %v5288_v16  ;;  %v3679_v29 = vsel %vm3668_vm12, %v3646_v33, %v5323_v37  ;;  %v3700_v52 = vsel %vm3668_vm12, %v3667_v49, %v5324_v27  ;;  %v8048_v10 = vld [vmem:[%s8197_s5] ss:$0 sm:$0xff] }
 0x47c   : > { %v5297_v11 = vpop.permute.xlu1 %5296  ;;  %v5332_v51 = vpop.permute.xlu0 %5331 }
 0x47d   : > { %v5299_v13 = vunpack.i.h.bf16 %v5297_v11  ;;  %v5298_v7 = vunpack.i.l.bf16 %v5297_v11  ;;  %v5334_v60 = vunpack.i.h.bf16 %v5332_v51  ;;  %v5333_v45 = vunpack.i.l.bf16 %v5332_v51 }
 0x47f   : > { %v3678_v57 = vsel %vm3668_vm12, %v3645_v14, %v5298_v7  ;;  %v3699_v12 = vsel %vm3668_vm12, %v3666_v36, %v5299_v13  ;;  %v8053_v13 = vld [vmem:[%s8198_s6] ss:$0 sm:$0xff] }
 0x480   : > { %v5307_v1 = vpop.permute.xlu1 %5306  ;;  %v3711_v15 = vsel %vm3701_vm13, %v3678_v57, %v5303_v6  ;;  %v3732_v55 = vsel %vm3701_vm13, %v3699_v12, %v5304_v46 }
 0x481   : > { %v5309_v5 = vunpack.i.h.bf16 %v5307_v1  ;;  %v5308_v25 = vunpack.i.l.bf16 %v5307_v1 }
 0x483   : > { %v3744_v20 = vsel %vm3734_vm14, %v3711_v15, %v5308_v25  ;;  %v3765_v31 = vsel %vm3734_vm14, %v3732_v55, %v5309_v5 }
 0x484   : > { %v5317_v39 = vpop.permute.xlu1 %5316 }
 0x485   : > { %v5319_v54 = vunpack.i.h.bf16 %v5317_v39  ;;  %v5318_v28 = vunpack.i.l.bf16 %v5317_v39 }
 0x487   : > { %v3777_v44 = vsel %vm3767_vm15, %v3744_v20, %v5318_v28  ;;  %v3798_v4 = vsel %vm3767_vm15, %v3765_v31, %v5319_v54 }
 0x488   : > { %v5327_v9 = vpop.permute.xlu1 %5326  ;;  %4024 = vmatmul.mubr.f32.gmra.mrb[50].mxu0 %v3777_v44  ;;  %4129 = vmatmul.mubr.f32.gmra.mrb[38].mxu1 %v3798_v4 }
 0x489   : > { %v5329_v22 = vunpack.i.h.bf16 %v5327_v9  ;;  %v5328_v62 = vunpack.i.l.bf16 %v5327_v9  ;;  %4581 = vmatprep.mubr.msk.f32.mxu0 %vm1692_vm4, %v2653_v18  ;;  %4602 = vmatprep.mubr.msk.f32.mxu1 %vm1692_vm4, %v2674_v50 }
 0x48b   : > { %v3712_v40 = vsel %vm3701_vm13, %v3679_v29, %v5328_v62  ;;  %v3733_v19 = vsel %vm3701_vm13, %v3700_v52, %v5329_v22 }
 0x48c   : > { %v5337_v34 = vpop.permute.xlu1 %5336  ;;  %v3745_v53 = vsel %vm3734_vm14, %v3712_v40, %v5333_v45  ;;  %v3766_v61 = vsel %vm3734_vm14, %v3733_v19, %v5334_v60 }
 0x48d   : > { %v5339_v2 = vunpack.i.h.bf16 %v5337_v34  ;;  %v5338_v56 = vunpack.i.l.bf16 %v5337_v34 }
 0x48f   : > { %v3778_v11 = vsel %vm3767_vm15, %v3745_v53, %v5338_v56  ;;  %v3799_v24 = vsel %vm3767_vm15, %v3766_v61, %v5339_v2 }
 0x490   : > { %4029 = vmatmul.mubr.f32.gmra.mrb[52].mxu0 %v3778_v11  ;;  %4134 = vmatmul.mubr.f32.gmra.mrb[40].mxu1 %v3799_v24 }
 0x4bb   : > { %v4035_v16 = vpop.f32.mrb[0].mxu1 }
 0x4bc   : > { %v4157_v7 = vmul.f32 %v8048_v10, %v4035_v16  ;;  %v4037_v58 = vpop.f32.mrb[1].mxu1 }
 0x4be   : > { %v4196_v32 = vadd.f32 %v8053_v13, %v4157_v7 }
 0x4bf   : > { %v4040_v17 = vpop.f32.mrb[2].mxu1 }
 0x4c0   : > { %v4228_v63 = vmax.f32 %v4196_v32, 0.0  ;;  %v4158_v48 = vmul.f32 %v8048_v10, %v4040_v17  ;;  %v4042_v1 = vpop.f32.mrb[3].mxu1 }
 0x4c2   : > { %4260 = vst.msk [vmem:[%s8061_s10 + $0x58] sm:$0xff] %vm1692_vm4, %v4228_v63  ;;  %v4197_v36 = vadd.f32 %v8053_v13, %v4158_v48 }
 0x4c4   : > { %v4229_v38 = vmax.f32 %v4197_v36, 0.0 }
 0x4c6   : > { %4261 = vst.msk [vmem:[%s8061_s10 + $0x60] sm:$0xff] %vm1692_vm4, %v4229_v38 }
 0x4c7   : > { %v4045_v14 = vpop.f32.mrb[4].mxu1 }
 0x4c8   : > { %v4159_v57 = vmul.f32 %v8048_v10, %v4045_v14  ;;  %v4047_v12 = vpop.f32.mrb[5].mxu1 }
 0x4ca   : > { %v4198_v5 = vadd.f32 %v8053_v13, %v4159_v57 }
 0x4cb   : > { %v4050_v25 = vpop.f32.mrb[6].mxu1 }
 0x4cc   : > { %v4230_v43 = vmax.f32 %v4198_v5, 0.0  ;;  %v4160_v26 = vmul.f32 %v8048_v10, %v4050_v25  ;;  %v4052_v41 = vpop.f32.mrb[7].mxu1 }
 0x4ce   : > { %4262 = vst.msk [vmem:[%s8061_s10 + $0x68] sm:$0xff] %vm1692_vm4, %v4230_v43  ;;  %v4199_v8 = vadd.f32 %v8053_v13, %v4160_v26 }
 0x4d0   : > { %v4231_v46 = vmax.f32 %v4199_v8, 0.0 }
 0x4d2   : > { %4263 = vst.msk [vmem:[%s8061_s10 + $0x70] sm:$0xff] %vm1692_vm4, %v4231_v46 }
 0x4d3   : > { %v4055_v6 = vpop.f32.mrb[8].mxu1 }
 0x4d4   : > { %v4161_v42 = vmul.f32 %v8048_v10, %v4055_v6  ;;  %v4057_v47 = vpop.f32.mrb[9].mxu1 }
 0x4d6   : > { %v4200_v30 = vadd.f32 %v8053_v13, %v4161_v42 }
 0x4d7   : > { %v4060_v59 = vpop.f32.mrb[10].mxu1 }
 0x4d8   : > { %v4232_v3 = vmax.f32 %v4200_v30, 0.0  ;;  %v4162_v35 = vmul.f32 %v8048_v10, %v4060_v59  ;;  %v4062_v39 = vpop.f32.mrb[11].mxu1 }
 0x4da   : > { %4264 = vst.msk [vmem:[%s8061_s10 + $0x78] sm:$0xff] %vm1692_vm4, %v4232_v3  ;;  %v4201_v54 = vadd.f32 %v8053_v13, %v4162_v35 }
 0x4dc   : > { %v4233_v28 = vmax.f32 %v4201_v54, 0.0 }
 0x4de   : > { %4265 = vst.msk [vmem:[%s8061_s10 + $0x80] sm:$0xff] %vm1692_vm4, %v4233_v28 }
 0x4df   : > { %v4065_v15 = vpop.f32.mrb[12].mxu1 }
 0x4e0   : > { %v4163_v55 = vmul.f32 %v8048_v10, %v4065_v15  ;;  %v4067_v21 = vpop.f32.mrb[13].mxu1 }
 0x4e2   : > { %v4202_v27 = vadd.f32 %v8053_v13, %v4163_v55 }
 0x4e3   : > { %v4070_v37 = vpop.f32.mrb[14].mxu1 }
 0x4e4   : > { %v4234_v20 = vmax.f32 %v4202_v27, 0.0  ;;  %v4164_v31 = vmul.f32 %v8048_v10, %v4070_v37  ;;  %v4072_v50 = vpop.f32.mrb[15].mxu1 }
 0x4e6   : > { %4266 = vst.msk [vmem:[%s8061_s10 + $0x88] sm:$0xff] %vm1692_vm4, %v4234_v20  ;;  %v4203_v0 = vadd.f32 %v8053_v13, %v4164_v31 }
 0x4e8   : > { %v4235_v44 = vmax.f32 %v4203_v0, 0.0 }
 0x4ea   : > { %4267 = vst.msk [vmem:[%s8061_s10 + $0x90] sm:$0xff] %vm1692_vm4, %v4235_v44 }
 0x4eb   : > { %v4075_v4 = vpop.f32.mrb[16].mxu1 }
 0x4ec   : > { %v4165_v23 = vmul.f32 %v8048_v10, %v4075_v4  ;;  %v4077_v9 = vpop.f32.mrb[17].mxu1 }
 0x4ee   : > { %v4204_v18 = vadd.f32 %v8053_v13, %v4165_v23 }
 0x4ef   : > { %v4080_v49 = vpop.f32.mrb[18].mxu1 }
 0x4f0   : > { %v4236_v33 = vmax.f32 %v4204_v18, 0.0  ;;  %v4166_v51 = vmul.f32 %v8048_v10, %v4080_v49  ;;  %v4082_v22 = vpop.f32.mrb[19].mxu1 }
 0x4f2   : > { %4268 = vst.msk [vmem:[%s8061_s10 + $0x98] sm:$0xff] %vm1692_vm4, %v4236_v33  ;;  %v4205_v62 = vadd.f32 %v8053_v13, %v4166_v51  ;;  %v3980_v29 = vpop.f32.mrb[32].mxu0 }
 0x4f3   : > { %v4146_v40 = vmul.f32 %v8048_v10, %v3980_v29  ;;  %v3982_v19 = vpop.f32.mrb[33].mxu0  ;;  %v4085_v60 = vpop.f32.mrb[20].mxu1 }
 0x4f4   : > { %v4237_v52 = vmax.f32 %v4205_v62, 0.0  ;;  %v4167_v45 = vmul.f32 %v8048_v10, %v4085_v60  ;;  %v4087_v34 = vpop.f32.mrb[21].mxu1 }
 0x4f5   : > { %v4185_v2 = vadd.f32 %v8053_v13, %v4146_v40 }
 0x4f6   : > { %4269 = vst.msk [vmem:[%s8061_s10 + $0xa0] sm:$0xff] %vm1692_vm4, %v4237_v52  ;;  %v4206_v56 = vadd.f32 %v8053_v13, %v4167_v45 }
 0x4f7   : > { %v4217_v53 = vmax.f32 %v4185_v2, 0.0 }
 0x4f8   : > { %v4238_v61 = vmax.f32 %v4206_v56, 0.0 }
 0x4f9   : > { %4249 = vst.msk [vmem:[%s8061_s10] sm:$0xff] %vm1692_vm4, %v4217_v53 }
 0x4fa   : > { %4270 = vst.msk [vmem:[%s8061_s10 + $0xa8] sm:$0xff] %vm1692_vm4, %v4238_v61 }
 0x503   : > { %v3985_v11 = vpop.f32.mrb[34].mxu0  ;;  %v4090_v24 = vpop.f32.mrb[22].mxu1 }
 0x504   : > { %v4147_v16 = vmul.f32 %v8048_v10, %v3985_v11  ;;  %v4168_v7 = vmul.f32 %v8048_v10, %v4090_v24  ;;  %v3987_v58 = vpop.f32.mrb[35].mxu0  ;;  %v4092_v32 = vpop.f32.mrb[23].mxu1 }
 0x506   : > { %v4186_v17 = vadd.f32 %v8053_v13, %v4147_v16  ;;  %v4207_v63 = vadd.f32 %v8053_v13, %v4168_v7 }
 0x508   : > { %v4218_v48 = vmax.f32 %v4186_v17, 0.0  ;;  %v4239_v1 = vmax.f32 %v4207_v63, 0.0 }
 0x50a   : > { %4250 = vst.msk [vmem:[%s8061_s10 + $0x8] sm:$0xff] %vm1692_vm4, %v4218_v48  ;;  %4271 = vst.msk [vmem:[%s8061_s10 + $0xb0] sm:$0xff] %vm1692_vm4, %v4239_v1 }
 0x50f   : > { %v3990_v36 = vpop.f32.mrb[36].mxu0  ;;  %v4095_v38 = vpop.f32.mrb[24].mxu1 }
 0x510   : > { %v4148_v14 = vmul.f32 %v8048_v10, %v3990_v36  ;;  %v4169_v57 = vmul.f32 %v8048_v10, %v4095_v38  ;;  %v3992_v12 = vpop.f32.mrb[37].mxu0  ;;  %v4097_v5 = vpop.f32.mrb[25].mxu1 }
 0x512   : > { %v4187_v25 = vadd.f32 %v8053_v13, %v4148_v14  ;;  %v4208_v43 = vadd.f32 %v8053_v13, %v4169_v57 }
 0x514   : > { %v4219_v26 = vmax.f32 %v4187_v25, 0.0  ;;  %v4240_v41 = vmax.f32 %v4208_v43, 0.0 }
 0x515   : > { %v3995_v8 = vpop.f32.mrb[38].mxu0  ;;  %v4100_v46 = vpop.f32.mrb[26].mxu1 }
 0x516   : > { %4251 = vst.msk [vmem:[%s8061_s10 + $0x10] sm:$0xff] %vm1692_vm4, %v4219_v26  ;;  %4272 = vst.msk [vmem:[%s8061_s10 + $0xb8] sm:$0xff] %vm1692_vm4, %v4240_v41  ;;  %v4149_v6 = vmul.f32 %v8048_v10, %v3995_v8  ;;  %v4170_v42 = vmul.f32 %v8048_v10, %v4100_v46  ;;  %v3997_v47 = vpop.f32.mrb[39].mxu0  ;;  %v4102_v30 = vpop.f32.mrb[27].mxu1 }
 0x518   : > { %v4188_v59 = vadd.f32 %v8053_v13, %v4149_v6  ;;  %v4209_v3 = vadd.f32 %v8053_v13, %v4170_v42 }
 0x51a   : > { %v4220_v35 = vmax.f32 %v4188_v59, 0.0  ;;  %v4241_v39 = vmax.f32 %v4209_v3, 0.0 }
 0x51c   : > { %4252 = vst.msk [vmem:[%s8061_s10 + $0x18] sm:$0xff] %vm1692_vm4, %v4220_v35  ;;  %4273 = vst.msk [vmem:[%s8061_s10 + $0xc0] sm:$0xff] %vm1692_vm4, %v4241_v39 }
 0x51e   : > { %v4000_v54 = vpop.f32.mrb[40].mxu0  ;;  %v4105_v15 = vpop.f32.mrb[28].mxu1 }
 0x51f   : > { %v4150_v28 = vmul.f32 %v8048_v10, %v4000_v54  ;;  %v4002_v55 = vpop.f32.mrb[41].mxu0  ;;  %v4171_v21 = vmul.f32 %v8048_v10, %v4105_v15  ;;  %v4107_v27 = vpop.f32.mrb[29].mxu1 }
 0x521   : > { %v4189_v37 = vadd.f32 %v8053_v13, %v4150_v28  ;;  %v4210_v20 = vadd.f32 %v8053_v13, %v4171_v21 }
 0x523   : > { %v4221_v31 = vmax.f32 %v4189_v37, 0.0  ;;  %v4242_v50 = vmax.f32 %v4210_v20, 0.0 }
 0x525   : > { %4253 = vst.msk [vmem:[%s8061_s10 + $0x20] sm:$0xff] %vm1692_vm4, %v4221_v31  ;;  %4274 = vst.msk [vmem:[%s8061_s10 + $0xc8] sm:$0xff] %vm1692_vm4, %v4242_v50 }
 0x52f   : > { %v4005_v0 = vpop.f32.mrb[42].mxu0  ;;  %v4110_v44 = vpop.f32.mrb[30].mxu1 }
 0x530   : > { %v4151_v4 = vmul.f32 %v8048_v10, %v4005_v0  ;;  %v4172_v23 = vmul.f32 %v8048_v10, %v4110_v44  ;;  %v4007_v9 = vpop.f32.mrb[43].mxu0  ;;  %v4112_v18 = vpop.f32.mrb[31].mxu1 }
 0x532   : > { %v4190_v49 = vadd.f32 %v8053_v13, %v4151_v4  ;;  %v4211_v33 = vadd.f32 %v8053_v13, %v4172_v23 }
 0x534   : > { %v4222_v51 = vmax.f32 %v4190_v49, 0.0  ;;  %v4243_v22 = vmax.f32 %v4211_v33, 0.0 }
 0x536   : > { %4254 = vst.msk [vmem:[%s8061_s10 + $0x28] sm:$0xff] %vm1692_vm4, %v4222_v51  ;;  %4275 = vst.msk [vmem:[%s8061_s10 + $0xd0] sm:$0xff] %vm1692_vm4, %v4243_v22 }
 0x53b   : > { %v4010_v62 = vpop.f32.mrb[44].mxu0  ;;  %v4115_v29 = vpop.f32.mrb[32].mxu1 }
 0x53c   : > { %v4152_v52 = vmul.f32 %v8048_v10, %v4010_v62  ;;  %v4173_v40 = vmul.f32 %v8048_v10, %v4115_v29  ;;  %v4012_v19 = vpop.f32.mrb[45].mxu0  ;;  %v4117_v60 = vpop.f32.mrb[33].mxu1 }
 0x53e   : > { %v4191_v45 = vadd.f32 %v8053_v13, %v4152_v52  ;;  %v4212_v34 = vadd.f32 %v8053_v13, %v4173_v40 }
 0x540   : > { %v4223_v2 = vmax.f32 %v4191_v45, 0.0  ;;  %v4244_v56 = vmax.f32 %v4212_v34, 0.0 }
 0x541   : > { %v4015_v53 = vpop.f32.mrb[46].mxu0  ;;  %v4120_v61 = vpop.f32.mrb[34].mxu1 }
 0x542   : > { %4255 = vst.msk [vmem:[%s8061_s10 + $0x30] sm:$0xff] %vm1692_vm4, %v4223_v2  ;;  %4276 = vst.msk [vmem:[%s8061_s10 + $0xd8] sm:$0xff] %vm1692_vm4, %v4244_v56  ;;  %v4153_v11 = vmul.f32 %v8048_v10, %v4015_v53  ;;  %v4174_v24 = vmul.f32 %v8048_v10, %v4120_v61  ;;  %v4017_v16 = vpop.f32.mrb[47].mxu0  ;;  %v4122_v7 = vpop.f32.mrb[35].mxu1 }
 0x544   : > { %v4192_v58 = vadd.f32 %v8053_v13, %v4153_v11  ;;  %v4213_v32 = vadd.f32 %v8053_v13, %v4174_v24 }
 0x546   : > { %v4224_v17 = vmax.f32 %v4192_v58, 0.0  ;;  %v4245_v63 = vmax.f32 %v4213_v32, 0.0 }
 0x548   : > { %4256 = vst.msk [vmem:[%s8061_s10 + $0x38] sm:$0xff] %vm1692_vm4, %v4224_v17  ;;  %4277 = vst.msk [vmem:[%s8061_s10 + $0xe0] sm:$0xff] %vm1692_vm4, %v4245_v63 }
 0x54a   : > { %v4020_v48 = vpop.f32.mrb[48].mxu0  ;;  %v4125_v36 = vpop.f32.mrb[36].mxu1 }
 0x54b   : > { %v4154_v1 = vmul.f32 %v8048_v10, %v4020_v48  ;;  %v4022_v38 = vpop.f32.mrb[49].mxu0  ;;  %v4175_v14 = vmul.f32 %v8048_v10, %v4125_v36  ;;  %v4127_v57 = vpop.f32.mrb[37].mxu1 }
 0x54d   : > { %v4193_v12 = vadd.f32 %v8053_v13, %v4154_v1  ;;  %v4214_v5 = vadd.f32 %v8053_v13, %v4175_v14 }
 0x54f   : > { %v4225_v25 = vmax.f32 %v4193_v12, 0.0  ;;  %v4246_v43 = vmax.f32 %v4214_v5, 0.0 }
 0x551   : > { %4257 = vst.msk [vmem:[%s8061_s10 + $0x40] sm:$0xff] %vm1692_vm4, %v4225_v25  ;;  %4278 = vst.msk [vmem:[%s8061_s10 + $0xe8] sm:$0xff] %vm1692_vm4, %v4246_v43 }
 0x55b   : > { %v4025_v26 = vpop.f32.mrb[50].mxu0  ;;  %v4130_v41 = vpop.f32.mrb[38].mxu1 }
 0x55c   : > { %v4155_v8 = vmul.f32 %v8048_v10, %v4025_v26  ;;  %v4176_v46 = vmul.f32 %v8048_v10, %v4130_v41  ;;  %v4027_v6 = vpop.f32.mrb[51].mxu0  ;;  %v4132_v42 = vpop.f32.mrb[39].mxu1 }
 0x55e   : > { %v4194_v47 = vadd.f32 %v8053_v13, %v4155_v8  ;;  %v4215_v30 = vadd.f32 %v8053_v13, %v4176_v46 }
 0x560   : > { %v4226_v59 = vmax.f32 %v4194_v47, 0.0  ;;  %v4247_v3 = vmax.f32 %v4215_v30, 0.0 }
 0x562   : > { %4258 = vst.msk [vmem:[%s8061_s10 + $0x48] sm:$0xff] %vm1692_vm4, %v4226_v59  ;;  %4279 = vst.msk [vmem:[%s8061_s10 + $0xf0] sm:$0xff] %vm1692_vm4, %v4247_v3 }
 0x563   : > { %v4030_v35 = vpop.f32.mrb[52].mxu0  ;;  %v4135_v39 = vpop.f32.mrb[40].mxu1 }
 0x564   : > { %v4156_v54 = vmul.f32 %v8048_v10, %v4030_v35  ;;  %v4177_v28 = vmul.f32 %v8048_v10, %v4135_v39  ;;  %v4032_v15 = vpop.f32.mrb[53].mxu0  ;;  %v4137_v55 = vpop.f32.mrb[41].mxu1 }
 0x566   : > { %v4195_v21 = vadd.f32 %v8053_v13, %v4156_v54  ;;  %v4216_v27 = vadd.f32 %v8053_v13, %v4177_v28 }
 0x568   : > { %v4227_v37 = vmax.f32 %v4195_v21, 0.0  ;;  %v4248_v20 = vmax.f32 %v4216_v27, 0.0 }
 0x56a   : > { %4259 = vst.msk [vmem:[%s8061_s10 + $0x50] sm:$0xff] %vm1692_vm4, %v4227_v37  ;;  %4280 = vst.msk [vmem:[%s8061_s10 + $0xf8] sm:$0xff] %vm1692_vm4, %v4248_v20 }
 0x56b PF: > { %s17_s24 = sadd.s32 1, %s5360_s24  }
 0x56c   : > { %p14_p4 = scmp.ge.s32.totalorder %s17_s24, 4  }
 0x56e   :  { %16 = sbr.rel (!%p14_p4) target bundleno = 1 (0x1), region = 82 }

</bundles_post_ra>
